<compile_context>
chip_gen: v6e
topology: v6e:2x2x1
jax: 0.10.0
libtpu: 0.0.40
codegen_flags: <defaults>
</compile_context>

<pallas_src>
import jax
import jax.numpy as jnp
from jax import lax
from jax.experimental import pallas as pl
from jax.experimental.pallas import tpu as pltpu

_SQRT_HALF = 0.7071067811865476


def _vmem_limit_bytes():
    # generation-aware scoped-VMEM limit (v7x has only 64 MiB physical VMEM).
    try:
        cap = int(pltpu.get_tpu_info().vmem_capacity_bytes)
    except Exception:
        cap = 64 * 1024 * 1024
    return int(min(cap * 3 // 4, 100 * 1024 * 1024))


_VMEM_LIMIT = _vmem_limit_bytes()


# ---------------------------------------------------------------------------
# elementwise helpers (used INSIDE kernels, f32)
# ---------------------------------------------------------------------------
def _erf(x):
    # Abramowitz & Stegun 7.1.26 polynomial approximation, |err| <= 1.5e-7.
    a1, a2, a3, a4, a5 = (0.254829592, -0.284496736, 1.421413741,
                          -1.453152027, 1.061405429)
    p = 0.3275911
    ax = jnp.abs(x)
    t = 1.0 / (1.0 + p * ax)
    poly = ((((a5 * t + a4) * t + a3) * t + a2) * t + a1) * t
    y = 1.0 - poly * jnp.exp(-ax * ax)
    return jnp.where(x >= 0, y, -y)


def _gelu(x):
    # exact (erf-based) GELU, like torch.nn.GELU() default
    return 0.5 * x * (1.0 + _erf(x * _SQRT_HALF))


def _same_pads(k, dil):
    # PyTorch padding='same' rule (asymmetric for even kernels)
    total = dil * (k - 1)
    lo = total // 2
    return lo, total - lo


# ---------------------------------------------------------------------------
# 'same'-padded 3D convolution, kernel 3x3x3, dilation 1 or 2 (Pallas).
# Lane-dense flat layout, manual double-buffered DMA of overlapping D-windows,
# lane-shift + boundary-mask taps, bf16 MXU dots with f32 accumulation.
# ---------------------------------------------------------------------------
def conv3d_same(x, w, b, dilation=1, gelu=False,
                in_scale=None, in_shift=None, compute_stats=False):
    """x: (Cin, D, H, W); w: (Cout, Cin, 3, 3, 3) torch layout; b: (Cout,).

    Optional per-channel input affine (in_scale, in_shift) is applied in the
    glue BEFORE zero padding (exact fusion of a preceding GroupNorm).
    If compute_stats, also returns per-channel (sum, sumsq) of the post-GELU
    output (fused accumulation for the following GroupNorm).
    """
    Cin, D, H, W = x.shape
    Cout, Cin_w, KD, KH, KW = w.shape
    assert Cin_w == Cin
    dl = dilation
    pdl, pdh = _same_pads(KD, dl)
    phl, _ = _same_pads(KH, dl)
    pwl, _ = _same_pads(KW, dl)
    HW = H * W
    assert HW % 128 == 0, (H, W)
    td = min(D, 8)
    assert D % td == 0, (D, td)
    nT = D // td
    ext = td + pdl + pdh
    M = td * HW
    Dp = D + pdl + pdh

    # --- glue: affine + lane-dense flat layout + D-only zero pad (one pass) ---
    xf = x.astype(jnp.float32)
    if in_scale is not None:
        xf = xf * in_scale.reshape(Cin, 1, 1, 1) + in_shift.reshape(Cin, 1, 1, 1)
    xp = jnp.pad(xf.reshape(Cin, D, HW), ((0, 0), (pdl, pdh), (0, 0)))
    xp = xp.astype(jnp.bfloat16).reshape(Cin, Dp * HW)

    wk = jnp.transpose(w, (2, 3, 4, 0, 1)).reshape(
        KD * KH * KW, Cout, Cin).astype(jnp.bfloat16)
    bk = b.reshape(Cout, 1).astype(jnp.float32)

    # boundary masks (one {0,1} row per in-plane tap); H/W 'same' padding is
    # realized by these masks so no spatially padded copy exists anywhere.
    j = jnp.arange(M, dtype=jnp.int32)
    r = j % HW
    hh = r // W
    ww = r % W
    mrows = []
    for kh in range(KH):
        for kw in range(KW):
            oh = kh * dl - phl
            ow = kw * dl - pwl
            ok = (hh + oh >= 0) & (hh + oh < H) & (ww + ow >= 0) & (ww + ow < W)
            mrows.append(ok.astype(jnp.float32))
    masks = jnp.stack(mrows, axis=0)                      # (KH*KW, M)

    def kernel(x_hbm, w_ref, b_ref, m_ref, *rest):
        if compute_stats:
            o_ref, s_ref, ss_ref, xbuf, sem = rest
        else:
            o_ref, xbuf, sem = rest
        t = pl.program_id(0)
        n = pl.num_programs(0)
        slot = t % 2

        def fetch(tile, sl_):
            pltpu.make_async_copy(
                x_hbm.at[:, pl.ds(tile * (td * HW), ext * HW)],
                xbuf.at[sl_], sem.at[sl_]).start()

        @pl.when(t == 0)
        def _prime():
            fetch(0, 0)
            if compute_stats:
                s_ref[...] = jnp.zeros_like(s_ref)
                ss_ref[...] = jnp.zeros_like(ss_ref)

        @pl.when(t + 1 < n)
        def _prefetch():
            fetch(t + 1, 1 - slot)

        # wait for the current tile's overlapping window
        pltpu.make_async_copy(
            x_hbm.at[:, pl.ds(t * (td * HW), ext * HW)],
            xbuf.at[slot], sem.at[slot]).wait()

        xall = xbuf[slot]                                 # (Cin, ext*HW) bf16
        acc = jnp.zeros((Cout, M), jnp.float32)

        for kh in range(KH):
            for kw in range(KW):
                oh = kh * dl - phl
                ow = kw * dl - pwl
                off = oh * W + ow
                # lane shift: xs[:, j] = xall[:, j + off] (wrap values are
                # masked below, so the wrap-around content never matters)
                if off == 0:
                    xs = xall
                elif off > 0:
                    xs = jnp.concatenate([xall[:, off:], xall[:, :off]], axis=1)
                else:
                    o = -off
                    xs = jnp.concatenate([xall[:, -o:], xall[:, :-o]], axis=1)
                masked = (oh != 0) or (ow != 0)
                if masked:
                    mrow = m_ref[pl.ds(kh * KW + kw, 1), :]       # (1, M) f32
                for kd in range(KD):
                    # free, lane-aligned column slice (no relayout, no casts)
                    sl = xs[:, kd * dl * HW: kd * dl * HW + M]    # (Cin, M) bf16
                    wkk = w_ref[(kd * KH + kh) * KW + kw]         # (Cout, Cin)
                    if Cin == 1:
                        contrib = (wkk.astype(jnp.float32).reshape(Cout, 1)
                                   * sl.astype(jnp.float32))
                    else:
                        contrib = jnp.dot(wkk, sl,
                                          preferred_element_type=jnp.float32)
                    if masked:
                        contrib = contrib * mrow
                    acc = acc + contrib

        acc = acc + b_ref[...]
        if gelu:
            acc = _gelu(acc)
        if compute_stats:
            s_ref[...] += jnp.sum(acc, axis=1, keepdims=True)
            ss_ref[...] += jnp.sum(acc * acc, axis=1, keepdims=True)
        # lane-dense flat store: minor dim td*H*W (multiple of 128)
        o_ref[...] = acc.astype(o_ref.dtype)

    in_specs = [
        pl.BlockSpec(memory_space=pl.ANY),                            # HBM act
        pl.BlockSpec((KD * KH * KW, Cout, Cin), lambda t: (0, 0, 0)),
        pl.BlockSpec((Cout, 1), lambda t: (0, 0)),
        pl.BlockSpec((KH * KW, M), lambda t: (0, 0)),
    ]
    y_spec = pl.BlockSpec((Cout, M), lambda t: (0, t))
    scratch = [pltpu.VMEM((2, Cin, ext * HW), jnp.bfloat16),
               pltpu.SemaphoreType.DMA((2,))]
    if compute_stats:
        out_shape = (jax.ShapeDtypeStruct((Cout, D * HW), jnp.bfloat16),
                     jax.ShapeDtypeStruct((Cout, 1), jnp.float32),
                     jax.ShapeDtypeStruct((Cout, 1), jnp.float32))
        out_specs = (y_spec,
                     pl.BlockSpec((Cout, 1), lambda t: (0, 0)),
                     pl.BlockSpec((Cout, 1), lambda t: (0, 0)))
    else:
        out_shape = jax.ShapeDtypeStruct((Cout, D * HW), jnp.bfloat16)
        out_specs = y_spec

    res = pl.pallas_call(
        kernel,
        out_shape=out_shape,
        grid_spec=pltpu.PrefetchScalarGridSpec(
            num_scalar_prefetch=0, grid=(nT,),
            in_specs=in_specs, out_specs=out_specs,
            scratch_shapes=scratch),
        compiler_params=pltpu.CompilerParams(
            # cross-step DMA prefetch + resident stats => sequential grid
            dimension_semantics=("arbitrary",),
            vmem_limit_bytes=_VMEM_LIMIT),
    )(xp, wk, bk, masks)

    if compute_stats:
        y, s, ss = res
        return y.reshape(Cout, D, H, W), s.reshape(Cout), ss.reshape(Cout)
    return res.reshape(Cout, D, H, W)


# ---------------------------------------------------------------------------
# (M,K) @ (K,N) + bias(M,1) [+GELU], tiled over M and N, bf16 MXU / f32 acc
# ---------------------------------------------------------------------------
def matmul_bias(a, b, bias_col, gelu=False, out_dtype=jnp.bfloat16):
    M, K = a.shape
    N = b.shape[1]
    tm = M if M <= 256 else 256
    tn = min(N, 2048)
    assert M % tm == 0 and N % tn == 0, (M, N, tm, tn)
    nM, nN = M // tm, N // tn

    def kernel(a_ref, b_ref, c_ref, o_ref):
        acc = jnp.dot(a_ref[...], b_ref[...],
                      preferred_element_type=jnp.float32) + c_ref[...]
        if gelu:
            acc = _gelu(acc)
        o_ref[...] = acc.astype(o_ref.dtype)

    return pl.pallas_call(
        kernel,
        out_shape=jax.ShapeDtypeStruct((M, N), out_dtype),
        grid_spec=pltpu.PrefetchScalarGridSpec(
            num_scalar_prefetch=0, grid=(nM, nN),
            in_specs=[pl.BlockSpec((tm, K), lambda i, j: (i, 0)),
                      pl.BlockSpec((K, tn), lambda i, j: (0, j)),
                      pl.BlockSpec((tm, 1), lambda i, j: (i, 0))],
            out_specs=pl.BlockSpec((tm, tn), lambda i, j: (i, j))),
        compiler_params=pltpu.CompilerParams(
            dimension_semantics=("parallel", "parallel"),
            vmem_limit_bytes=_VMEM_LIMIT),
    )(a.astype(jnp.bfloat16), b.astype(jnp.bfloat16),
      bias_col.astype(jnp.float32))


# stride-4 / kernel-4 downsampling conv; preceding GroupNorm affine folded
# EXACTLY into weights/bias (kernel == stride, each voxel used once).
def pool_conv4(x, w, b, gn_scale=None, gn_shift=None):
    C, D, H, W = x.shape
    Cout = w.shape[0]
    if gn_scale is not None:
        wf = w * gn_scale.reshape(1, C, 1, 1, 1)
        bf = b + jnp.einsum('ocijk,c->o', w, gn_shift)
    else:
        wf, bf = w, b
    Dq, Hq, Wq = D // 4, H // 4, W // 4
    N = Dq * Hq * Wq
    # TODO(synk): the 7-D patchify transpose (minor dim 4) stays in XLA; an
    # in-kernel regroup would save one strided HBM pass at the 64^3 level.
    patches = x.reshape(C, Dq, 4, Hq, 4, Wq, 4)
    patches = patches.transpose(0, 2, 4, 6, 1, 3, 5).reshape(C * 64, N)
    wm = wf.reshape(Cout, C * 64)
    if N >= 2048:
        y = matmul_bias(wm, patches, bf.reshape(Cout, 1))
    else:
        y = jnp.dot(wm.astype(jnp.float32),
                    patches.astype(jnp.float32)) + bf.reshape(Cout, 1)
    return y.reshape(Cout, Dq, Hq, Wq)


# stride-4 / kernel-4 ConvTranspose3d + GELU; optional preceding GroupNorm
# affine folded EXACTLY into weights + per-(o,i,j,k) bias (kernel == stride).
def upconv4_gelu(x, w, b, gn_scale=None, gn_shift=None):
    C, D, H, W = x.shape
    Cout = w.shape[1]
    if gn_scale is not None:
        wf = w * gn_scale.reshape(C, 1, 1, 1, 1)
        bijk = b.reshape(Cout, 1, 1, 1) + jnp.einsum('coijk,c->oijk', w, gn_shift)
    else:
        wf = w
        bijk = jnp.broadcast_to(b.reshape(Cout, 1, 1, 1), (Cout, 4, 4, 4))
    wm = jnp.transpose(wf, (1, 2, 3, 4, 0)).reshape(Cout * 64, C)
    bm = bijk.reshape(Cout * 64, 1)
    N = D * H * W
    if N >= 2048:
        y = matmul_bias(wm, x.reshape(C, N), bm, gelu=True)
    else:
        y = jnp.dot(wm.astype(jnp.float32),
                    x.reshape(C, N).astype(jnp.float32)) + bm
        y = jax.nn.gelu(y, approximate=False)
    # TODO(synk): the scatter back to (Cout, 4D, 4H, 4W) is a strided XLA
    # transpose; an in-kernel scattered store would save one HBM pass at 64^3.
    y = y.reshape(Cout, 4, 4, 4, D, H, W).transpose(0, 4, 1, 5, 2, 6, 3)
    return y.reshape(Cout, 4 * D, 4 * H, 4 * W)


# ---------------------------------------------------------------------------
# GroupNorm(8, C) coefficients from fused per-channel sums (tiny glue math)
# ---------------------------------------------------------------------------
def gn_affine(s, ss, gamma, beta, n_spatial, num_groups=8, eps=1e-5):
    C = s.shape[0]
    gs = C // num_groups
    n = gs * n_spatial
    gsum = s.reshape(num_groups, gs).sum(axis=1)
    gsq = ss.reshape(num_groups, gs).sum(axis=1)
    mean = gsum / n
    var = jnp.maximum(gsq / n - mean * mean, 0.0)   # biased variance (torch GN)
    inv = 1.0 / jnp.sqrt(var + eps)
    mean_c = jnp.repeat(mean, gs)
    inv_c = jnp.repeat(inv, gs)
    a = gamma * inv_c
    sh = beta - mean_c * a
    return a, sh


# final GroupNorm affine + (scalar) output conv + exact sigmoid, fused
def gn_sigmoid_out(x, gn_scale, gn_shift, out_w, out_b):
    C, D, H, W = x.shape
    N = D * H * W
    a2 = (gn_scale * out_w).reshape(C, 1).astype(jnp.float32)
    b2 = (gn_shift * out_w + out_b).reshape(C, 1).astype(jnp.float32)
    tn = min(N, 32768)
    assert N % tn == 0
    nT = N // tn

    def kernel(x_ref, a_ref, b_ref, o_ref):
        y = x_ref[...].astype(jnp.float32) * a_ref[...] + b_ref[...]
        o_ref[...] = 1.0 / (1.0 + jnp.exp(-y))          # exact sigmoid

    out = pl.pallas_call(
        kernel,
        out_shape=jax.ShapeDtypeStruct((C, N), jnp.float32),
        grid_spec=pltpu.PrefetchScalarGridSpec(
            num_scalar_prefetch=0, grid=(nT,),
            in_specs=[pl.BlockSpec((C, tn), lambda t: (0, t)),
                      pl.BlockSpec((C, 1), lambda t: (0, 0)),
                      pl.BlockSpec((C, 1), lambda t: (0, 0))],
            out_specs=pl.BlockSpec((C, tn), lambda t: (0, t))),
        compiler_params=pltpu.CompilerParams(
            dimension_semantics=("parallel",),
            vmem_limit_bytes=_VMEM_LIMIT),
    )(x.reshape(C, N), a2, b2)
    return out.reshape(C, D, H, W)


# ---------------------------------------------------------------------------
# tiny deep levels (4^3 / 1^3) run as plain XLA ops (review: consolidation)
# ---------------------------------------------------------------------------
def conv3d_xla(x, w, b, dilation=1):
    KD, KH, KW = w.shape[2:]
    pads = [_same_pads(KD, dilation), _same_pads(KH, dilation),
            _same_pads(KW, dilation)]
    y = lax.conv_general_dilated(
        x[None].astype(jnp.float32), w.astype(jnp.float32),
        window_strides=(1, 1, 1), padding=pads,
        rhs_dilation=(dilation, dilation, dilation),
        dimension_numbers=("NCDHW", "OIDHW", "NCDHW"))
    return y[0] + b.reshape(-1, 1, 1, 1)


def groupnorm_xla(x, gamma, beta, groups=8, eps=1e-5):
    C, D, H, W = x.shape
    xg = x.reshape(groups, C // groups, D, H, W).astype(jnp.float32)
    mean = xg.mean(axis=(1, 2, 3, 4), keepdims=True)
    var = xg.var(axis=(1, 2, 3, 4), keepdims=True)
    xn = ((xg - mean) / jnp.sqrt(var + eps)).reshape(C, D, H, W)
    return xn * gamma.reshape(-1, 1, 1, 1) + beta.reshape(-1, 1, 1, 1)


# ---------------------------------------------------------------------------
# parameters (deterministic synthetic init, torch-layout shapes)
# ---------------------------------------------------------------------------
def init_params(key):
    keys = iter(jax.random.split(key, 64))

    def conv_w(cout, cin, ks):
        fan = cin * ks[0] * ks[1] * ks[2]
        w = jax.random.normal(next(keys), (cout, cin) + ks, jnp.float32) / jnp.sqrt(fan)
        b = jax.random.normal(next(keys), (cout,), jnp.float32) * 0.01
        return w, b

    def convT_w(cin, cout, ks):
        fan = cin * ks[0] * ks[1] * ks[2]
        w = jax.random.normal(next(keys), (cin, cout) + ks, jnp.float32) / jnp.sqrt(fan)
        b = jax.random.normal(next(keys), (cout,), jnp.float32) * 0.01
        return w, b

    params = {}
    analysis = []
    for cin, cout in [(1, 16), (16, 64), (64, 128)]:
        w1, b1 = conv_w(cout, cin, (3, 3, 3))
        w2, b2 = conv_w(cout, cout, (3, 3, 3))
        wp, bp = conv_w(cout, cout, (4, 4, 4))
        analysis.append(dict(w1=w1, b1=b1, w2=w2, b2=b2, wp=wp, bp=bp,
                             g=jnp.ones((cout,), jnp.float32),
                             bt=jnp.zeros((cout,), jnp.float32)))
    params["analysis"] = analysis

    bottom = []
    for _ in range(2):
        w, b = conv_w(128, 128, (2, 3, 3))
        bottom.append(dict(w=w, b=b))
    params["bottom"] = bottom

    synthesis = []
    for cin, skip, cout in [(128, 128, 128), (128, 64, 64), (64, 16, 16)]:
        wu, bu = convT_w(cin, cout, (4, 4, 4))
        w1, b1 = conv_w(cout, cout + skip, (3, 3, 3))
        w2, b2 = conv_w(cout, cout, (3, 3, 3))
        synthesis.append(dict(wu=wu, bu=bu, w1=w1, b1=b1, w2=w2, b2=b2,
                              g=jnp.ones((cout,), jnp.float32),
                              bt=jnp.zeros((cout,), jnp.float32)))
    params["synthesis"] = synthesis

    wo, bo = conv_w(1, 1, (1, 1, 1))          # output_layer: Conv3d(1, 1, 1)
    params["out_w"] = wo.reshape(())
    params["out_b"] = bo.reshape(())
    return params


# ---------------------------------------------------------------------------
# Basic3DUNet forward
# ---------------------------------------------------------------------------
def _forward_one(x, params):
    """single-sample forward; x: (1, D, H, W) channels-first."""
    x = x.astype(jnp.float32)
    an = params["analysis"]
    skips = []

    # ---- analysis levels 0, 1 (64^3, 16^3): Pallas convs, fused GN stats ----
    for p in an[:2]:
        x = conv3d_same(x, p["w1"], p["b1"], gelu=True)
        x, s, ss = conv3d_same(x, p["w2"], p["b2"], gelu=True, compute_stats=True)
        C, D, H, W = x.shape
        a, sh = gn_affine(s, ss, p["g"], p["bt"], D * H * W)
        skips.append((x, a, sh))                    # un-normalized + GN affine
        x = pool_conv4(x, p["wp"], p["bp"], a, sh)  # GN folded into pool conv

    # ---- analysis level 2 (4^3): tiny, plain XLA ----
    p = an[2]
    x = jax.nn.gelu(conv3d_xla(x, p["w1"], p["b1"]), approximate=False)
    x = jax.nn.gelu(conv3d_xla(x, p["w2"], p["b2"]), approximate=False)
    x = groupnorm_xla(x, p["g"], p["bt"])
    skips.append((x, None, None))
    x = pool_conv4(x, p["wp"], p["bp"])             # 4^3 -> 1^3 (XLA dot)

    # ---- bottom (1^3, no activation in the reference) ----
    for p in params["bottom"]:
        x = conv3d_xla(x, p["w"], p["b"])

    # ---- synthesis level 0 (1^3 -> 4^3): tiny, plain XLA ----
    p = params["synthesis"][0]
    skip_x, _, _ = skips[2]
    x = upconv4_gelu(x, p["wu"], p["bu"])
    x = jnp.concatenate([x.astype(jnp.float32), skip_x.astype(jnp.float32)], 0)
    x = jax.nn.gelu(conv3d_xla(x, p["w1"], p["b1"], dilation=1), approximate=False)
    x = jax.nn.gelu(conv3d_xla(x, p["w2"], p["b2"], dilation=2), approximate=False)
    x = groupnorm_xla(x, p["g"], p["bt"])

    # ---- synthesis level 1 (4^3 -> 16^3): upconv XLA, convs Pallas ----
    p = params["synthesis"][1]
    skip_x, a_s, sh_s = skips[1]
    x = upconv4_gelu(x, p["wu"], p["bu"])            # input already normalized
    c_up = x.shape[0]
    xin = jnp.concatenate([x.astype(jnp.bfloat16), skip_x], axis=0)
    in_scale = jnp.concatenate([jnp.ones((c_up,), jnp.float32), a_s])
    in_shift = jnp.concatenate([jnp.zeros((c_up,), jnp.float32), sh_s])
    x = conv3d_same(xin, p["w1"], p["b1"], gelu=True,
                    in_scale=in_scale, in_shift=in_shift)
    x, s, ss = conv3d_same(x, p["w2"], p["b2"], dilation=2, gelu=True,
                           compute_stats=True)
    C, D, H, W = x.shape
    a1, sh1 = gn_affine(s, ss, p["g"], p["bt"], D * H * W)

    # ---- synthesis level 2 (16^3 -> 64^3): Pallas upconv + convs ----
    p = params["synthesis"][2]
    skip_x, a_s, sh_s = skips[0]
    x = upconv4_gelu(x, p["wu"], p["bu"], a1, sh1)   # prev GN folded (exact)
    c_up = x.shape[0]
    xin = jnp.concatenate([x, skip_x], axis=0)       # both bf16
    in_scale = jnp.concatenate([jnp.ones((c_up,), jnp.float32), a_s])
    in_shift = jnp.concatenate([jnp.zeros((c_up,), jnp.float32), sh_s])
    x = conv3d_same(xin, p["w1"], p["b1"], gelu=True,
                    in_scale=in_scale, in_shift=in_shift)
    x, s, ss = conv3d_same(x, p["w2"], p["b2"], dilation=2, gelu=True,
                           compute_stats=True)
    C, D, H, W = x.shape
    a2, sh2 = gn_affine(s, ss, p["g"], p["bt"], D * H * W)

    # TODO(synk): output_layer is nn.Conv3d(1, 1, 1) but the tensor here has 16
    # channels (shape bug in the reference module -> PyTorch would error); its
    # scalar weight/bias is applied elementwise per channel, fused with the
    # final GroupNorm and the exact sigmoid.
    return gn_sigmoid_out(x, a2, sh2, params["out_w"], params["out_b"])


_forward_one_jit = jax.jit(_forward_one)


def basic3d_unet_forward(x_ncdhw, params):
    # TODO(synk): per-sample loop (compiled once, reused); switch to jax.vmap /
    # a leading batch grid axis for large B.
    return jnp.stack([_forward_one_jit(x_ncdhw[n], params)
                      for n in range(x_ncdhw.shape[0])], axis=0)


# ---------------------------------------------------------------------------
def _conv_reference(x, w, b, dilation):
    KD, KH, KW = w.shape[2:]
    pads = [_same_pads(KD, dilation), _same_pads(KH, dilation),
            _same_pads(KW, dilation)]
    y = lax.conv_general_dilated(
        x[None], w, window_strides=(1, 1, 1), padding=pads,
        rhs_dilation=(dilation,) * 3,
        dimension_numbers=("NCDHW", "OIDHW", "NCDHW"))
    return y[0] + b.reshape(-1, 1, 1, 1)


if __name__ == "__main__":
    # small numerical self-check of the Pallas conv vs XLA (bf16-rounded
    # inputs for both, so only accumulation / output rounding differ)
    k1, k2, k3 = jax.random.split(jax.random.PRNGKey(0), 3)
    xt = jax.random.normal(k1, (16, 16, 16, 8), jnp.float32)
    wt = jax.random.normal(k2, (16, 16, 3, 3, 3), jnp.float32) / jnp.sqrt(16 * 27)
    bt = jax.random.normal(k3, (16,), jnp.float32) * 0.01
    xt_b = xt.astype(jnp.bfloat16).astype(jnp.float32)
    wt_b = wt.astype(jnp.bfloat16).astype(jnp.float32)
    for dil in (1, 2):
        got = conv3d_same(xt, wt, bt, dilation=dil).astype(jnp.float32)
        ref = _conv_reference(xt_b, wt_b, bt, dil)
        err = float(jnp.max(jnp.abs(got - ref)))
        assert err < 5e-2, ("conv self-check failed", dil, err)

    # smallest spatial size compatible with three stride-4 stages: 64^3
    x = jax.random.normal(jax.random.PRNGKey(0), (1, 1, 64, 64, 64), jnp.float32)
    params = init_params(jax.random.PRNGKey(1))
    out = basic3d_unet_forward(x, params)
    out = jax.block_until_ready(out)
    assert out.shape == (1, 16, 64, 64, 64), out.shape
    assert bool(jnp.all(jnp.isfinite(out)))
    assert bool(jnp.all((out >= 0.0) & (out <= 1.0)))      # sigmoid output
    print("KERNEL_OK")
</pallas_src>

<mosaic_0001>
module attributes {stable_mosaic.version = 11 : i64} {
  func.func @kernel(%arg0: i32, %arg1: memref<16x2304xbf16, #tpu.memory_space<any>>, %arg2: memref<27x16x16xbf16, #tpu.memory_space<vmem>>, %arg3: memref<16x1xf32, #tpu.memory_space<vmem>>, %arg4: memref<9x1024xf32, #tpu.memory_space<vmem>>, %arg5: memref<16x1024xbf16, #tpu.memory_space<vmem>>, %arg6: memref<2x16x1280xbf16, #tpu.memory_space<vmem>>, %arg7: memref<2x!tpu.dma_semaphore, #tpu.memory_space<semaphore_mem>>) attributes {dimension_semantics = [#tpu.dimension_semantics<arbitrary>], iteration_bounds = array<i64: 2>, scalar_prefetch = 0 : i64, scratch_operands = 2 : i64, tpu.core_type = #tpu.core_type<tc>, window_params = [{}, {pipeline_mode = #tpu.pipeline_mode<synchronous>, transform_indices = @transform_1, window_bounds = array<i64: 27, 16, 16>}, {pipeline_mode = #tpu.pipeline_mode<synchronous>, transform_indices = @transform_2, window_bounds = array<i64: 16, 1>}, {pipeline_mode = #tpu.pipeline_mode<synchronous>, transform_indices = @transform_3, window_bounds = array<i64: 9, 1024>}, {transform_indices = @transform_4, window_bounds = array<i64: 16, 1024>}]} {
    %c2_i32 = arith.constant 2 : i32
    %c0_i32 = arith.constant 0 : i32
    %0 = arith.cmpi eq, %c2_i32, %c0_i32 : i32
    %c1_i32 = arith.constant 1 : i32
    %1 = arith.select %0, %c1_i32, %c2_i32 : i32
    %2 = arith.remsi %arg0, %1 : i32
    %c0_i32_0 = arith.constant 0 : i32
    %3 = arith.cmpi ne, %2, %c0_i32_0 : i32
    %c0_i32_1 = arith.constant 0 : i32
    %4 = arith.cmpi slt, %2, %c0_i32_1 : i32
    %c0_i32_2 = arith.constant 0 : i32
    %5 = arith.cmpi slt, %1, %c0_i32_2 : i32
    %6 = arith.xori %4, %5 : i1
    %7 = arith.andi %6, %3 : i1
    %8 = arith.addi %2, %1 : i32
    %9 = arith.select %7, %8, %2 : i32
    %c0_i32_3 = arith.constant 0 : i32
    %10 = arith.cmpi eq, %arg0, %c0_i32_3 : i32
    %11 = arith.extui %10 : i1 to i32
    %c0_i32_4 = arith.constant 0 : i32
    %12 = arith.cmpi ne, %11, %c0_i32_4 : i32
    scf.if %12 {
      %c0_i32_114 = arith.constant 0 : i32
      %c0_i32_115 = arith.constant 0 : i32
      %c0_i32_116 = arith.constant 0 : i32
      %c0_i32_117 = arith.constant 0 : i32
      %247 = tpu.memref_slice %arg1[%c0_i32_116, %c0_i32_117] : memref<16x2304xbf16, #tpu.memory_space<any>> -> memref<16x1280xbf16, #tpu.memory_space<any>>
      %c0_i32_118 = arith.constant 0 : i32
      %c0_i32_119 = arith.constant 0 : i32
      %248 = tpu.memref_slice %arg6[%c0_i32_114, %c0_i32_118, %c0_i32_119] : memref<2x16x1280xbf16, #tpu.memory_space<vmem>> -> memref<1x16x1280xbf16, #tpu.memory_space<vmem>>
      %249 = tpu.memref_squeeze %248 : memref<1x16x1280xbf16, #tpu.memory_space<vmem>> -> memref<16x1280xbf16, #tpu.memory_space<vmem>>
      %250 = tpu.memref_slice %arg7[%c0_i32_115] : memref<2x!tpu.dma_semaphore, #tpu.memory_space<semaphore_mem>> -> memref<1x!tpu.dma_semaphore, #tpu.memory_space<semaphore_mem>>
      %251 = tpu.memref_squeeze %250 : memref<1x!tpu.dma_semaphore, #tpu.memory_space<semaphore_mem>> -> memref<!tpu.dma_semaphore, #tpu.memory_space<semaphore_mem>>
      tpu.enqueue_dma source(%247 : memref<16x1280xbf16, #tpu.memory_space<any>>) target(%249 : memref<16x1280xbf16, #tpu.memory_space<vmem>>) target_semaphore(%251 : memref<!tpu.dma_semaphore, #tpu.memory_space<semaphore_mem>>)
    } else {
    }
    %c1_i32_5 = arith.constant 1 : i32
    %13 = arith.addi %arg0, %c1_i32_5 : i32
    %c2_i32_6 = arith.constant 2 : i32
    %14 = arith.cmpi slt, %13, %c2_i32_6 : i32
    %15 = arith.extui %14 : i1 to i32
    %c0_i32_7 = arith.constant 0 : i32
    %16 = arith.cmpi ne, %15, %c0_i32_7 : i32
    scf.if %16 {
      %c1_i32_114 = arith.constant 1 : i32
      %247 = arith.addi %arg0, %c1_i32_114 : i32
      %c1_i32_115 = arith.constant 1 : i32
      %248 = arith.subi %c1_i32_115, %9 : i32
      %c1024_i32_116 = arith.constant 1024 : i32
      %249 = arith.muli %247, %c1024_i32_116 : i32
      %c0_i32_117 = arith.constant 0 : i32
      %250 = tpu.memref_slice %arg1[%c0_i32_117, %249] : memref<16x2304xbf16, #tpu.memory_space<any>> -> memref<16x1280xbf16, #tpu.memory_space<any>>
      %c0_i32_118 = arith.constant 0 : i32
      %c0_i32_119 = arith.constant 0 : i32
      %251 = tpu.memref_slice %arg6[%248, %c0_i32_118, %c0_i32_119] : memref<2x16x1280xbf16, #tpu.memory_space<vmem>> -> memref<1x16x1280xbf16, #tpu.memory_space<vmem>>
      %252 = tpu.memref_squeeze %251 : memref<1x16x1280xbf16, #tpu.memory_space<vmem>> -> memref<16x1280xbf16, #tpu.memory_space<vmem>>
      %253 = tpu.memref_slice %arg7[%248] : memref<2x!tpu.dma_semaphore, #tpu.memory_space<semaphore_mem>> -> memref<1x!tpu.dma_semaphore, #tpu.memory_space<semaphore_mem>>
      %254 = tpu.memref_squeeze %253 : memref<1x!tpu.dma_semaphore, #tpu.memory_space<semaphore_mem>> -> memref<!tpu.dma_semaphore, #tpu.memory_space<semaphore_mem>>
      tpu.enqueue_dma source(%250 : memref<16x1280xbf16, #tpu.memory_space<any>>) target(%252 : memref<16x1280xbf16, #tpu.memory_space<vmem>>) target_semaphore(%254 : memref<!tpu.dma_semaphore, #tpu.memory_space<semaphore_mem>>)
    } else {
    }
    %c1024_i32 = arith.constant 1024 : i32
    %17 = arith.muli %arg0, %c1024_i32 : i32
    %c0_i32_8 = arith.constant 0 : i32
    %18 = tpu.memref_slice %arg1[%c0_i32_8, %17] : memref<16x2304xbf16, #tpu.memory_space<any>> -> memref<16x1280xbf16, #tpu.memory_space<any>>
    %c0_i32_9 = arith.constant 0 : i32
    %c0_i32_10 = arith.constant 0 : i32
    %19 = tpu.memref_slice %arg6[%9, %c0_i32_9, %c0_i32_10] : memref<2x16x1280xbf16, #tpu.memory_space<vmem>> -> memref<1x16x1280xbf16, #tpu.memory_space<vmem>>
    %20 = tpu.memref_squeeze %19 : memref<1x16x1280xbf16, #tpu.memory_space<vmem>> -> memref<16x1280xbf16, #tpu.memory_space<vmem>>
    %21 = tpu.memref_slice %arg7[%9] : memref<2x!tpu.dma_semaphore, #tpu.memory_space<semaphore_mem>> -> memref<1x!tpu.dma_semaphore, #tpu.memory_space<semaphore_mem>>
    %22 = tpu.memref_squeeze %21 : memref<1x!tpu.dma_semaphore, #tpu.memory_space<semaphore_mem>> -> memref<!tpu.dma_semaphore, #tpu.memory_space<semaphore_mem>>
    tpu.wait_dma2 semaphore(%22 : memref<!tpu.dma_semaphore, #tpu.memory_space<semaphore_mem>>) src(%18 : memref<16x1280xbf16, #tpu.memory_space<any>>) dst(%20 : memref<16x1280xbf16, #tpu.memory_space<vmem>>)
    %23 = arith.index_cast %9 : i32 to index
    %c0 = arith.constant 0 : index
    %c0_11 = arith.constant 0 : index
    %24 = vector.load %arg6[%23, %c0, %c0_11] : memref<2x16x1280xbf16, #tpu.memory_space<vmem>>, vector<1x16x1280xbf16>
    %25 = vector.shape_cast %24 : vector<1x16x1280xbf16> to vector<16x1280xbf16>
    %cst = arith.constant 0.000000e+00 : f32
    %26 = vector.broadcast %cst : f32 to vector<16x1024xf32>
    %27 = vector.extract_strided_slice %25 {offsets = [0, 1271], sizes = [16, 9], strides = [1, 1]} : vector<16x1280xbf16> to vector<16x9xbf16>
    %28 = vector.extract_strided_slice %25 {offsets = [0, 0], sizes = [16, 1271], strides = [1, 1]} : vector<16x1280xbf16> to vector<16x1271xbf16>
    %29 = tpu.concatenate %27, %28 in 1 : vector<16x9xbf16>, vector<16x1271xbf16> -> vector<16x1280xbf16>
    %c0_12 = arith.constant 0 : index
    %c0_13 = arith.constant 0 : index
    %30 = vector.load %arg4[%c0_12, %c0_13] : memref<9x1024xf32, #tpu.memory_space<vmem>>, vector<1x1024xf32>
    %31 = vector.extract_strided_slice %29 {offsets = [0, 0], sizes = [16, 1024], strides = [1, 1]} : vector<16x1280xbf16> to vector<16x1024xbf16>
    %c0_14 = arith.constant 0 : index
    %c0_15 = arith.constant 0 : index
    %c0_16 = arith.constant 0 : index
    %32 = vector.load %arg2[%c0_14, %c0_15, %c0_16] : memref<27x16x16xbf16, #tpu.memory_space<vmem>>, vector<1x16x16xbf16>
    %33 = vector.shape_cast %32 : vector<1x16x16xbf16> to vector<16x16xbf16>
    %cst_17 = arith.constant dense<0.000000e+00> : vector<16x1024xf32>
    %34 = tpu.matmul %33, %31, %cst_17 {dimension_numbers = #tpu.dot_dimension_numbers<[1], [0], [0], [1], [0, 0, 1, 1], [], []>} : vector<16x16xbf16>, vector<16x1024xbf16>, vector<16x1024xf32> -> vector<16x1024xf32>
    %35 = vector.broadcast %30 : vector<1x1024xf32> to vector<16x1024xf32>
    %36 = arith.mulf %34, %35 : vector<16x1024xf32>
    %37 = arith.addf %26, %36 : vector<16x1024xf32>
    %38 = vector.extract_strided_slice %29 {offsets = [0, 128], sizes = [16, 1024], strides = [1, 1]} : vector<16x1280xbf16> to vector<16x1024xbf16>
    %c9 = arith.constant 9 : index
    %c0_18 = arith.constant 0 : index
    %c0_19 = arith.constant 0 : index
    %39 = vector.load %arg2[%c9, %c0_18, %c0_19] : memref<27x16x16xbf16, #tpu.memory_space<vmem>>, vector<1x16x16xbf16>
    %40 = vector.shape_cast %39 : vector<1x16x16xbf16> to vector<16x16xbf16>
    %cst_20 = arith.constant dense<0.000000e+00> : vector<16x1024xf32>
    %41 = tpu.matmul %40, %38, %cst_20 {dimension_numbers = #tpu.dot_dimension_numbers<[1], [0], [0], [1], [0, 0, 1, 1], [], []>} : vector<16x16xbf16>, vector<16x1024xbf16>, vector<16x1024xf32> -> vector<16x1024xf32>
    %42 = vector.broadcast %30 : vector<1x1024xf32> to vector<16x1024xf32>
    %43 = arith.mulf %41, %42 : vector<16x1024xf32>
    %44 = arith.addf %37, %43 : vector<16x1024xf32>
    %45 = vector.extract_strided_slice %29 {offsets = [0, 256], sizes = [16, 1024], strides = [1, 1]} : vector<16x1280xbf16> to vector<16x1024xbf16>
    %c18 = arith.constant 18 : index
    %c0_21 = arith.constant 0 : index
    %c0_22 = arith.constant 0 : index
    %46 = vector.load %arg2[%c18, %c0_21, %c0_22] : memref<27x16x16xbf16, #tpu.memory_space<vmem>>, vector<1x16x16xbf16>
    %47 = vector.shape_cast %46 : vector<1x16x16xbf16> to vector<16x16xbf16>
    %cst_23 = arith.constant dense<0.000000e+00> : vector<16x1024xf32>
    %48 = tpu.matmul %47, %45, %cst_23 {dimension_numbers = #tpu.dot_dimension_numbers<[1], [0], [0], [1], [0, 0, 1, 1], [], []>} : vector<16x16xbf16>, vector<16x1024xbf16>, vector<16x1024xf32> -> vector<16x1024xf32>
    %49 = vector.broadcast %30 : vector<1x1024xf32> to vector<16x1024xf32>
    %50 = arith.mulf %48, %49 : vector<16x1024xf32>
    %51 = arith.addf %44, %50 : vector<16x1024xf32>
    %52 = vector.extract_strided_slice %25 {offsets = [0, 1272], sizes = [16, 8], strides = [1, 1]} : vector<16x1280xbf16> to vector<16x8xbf16>
    %53 = vector.extract_strided_slice %25 {offsets = [0, 0], sizes = [16, 1272], strides = [1, 1]} : vector<16x1280xbf16> to vector<16x1272xbf16>
    %54 = tpu.concatenate %52, %53 in 1 : vector<16x8xbf16>, vector<16x1272xbf16> -> vector<16x1280xbf16>
    %c1 = arith.constant 1 : index
    %c0_24 = arith.constant 0 : index
    %55 = vector.load %arg4[%c1, %c0_24] : memref<9x1024xf32, #tpu.memory_space<vmem>>, vector<1x1024xf32>
    %56 = vector.extract_strided_slice %54 {offsets = [0, 0], sizes = [16, 1024], strides = [1, 1]} : vector<16x1280xbf16> to vector<16x1024xbf16>
    %c1_25 = arith.constant 1 : index
    %c0_26 = arith.constant 0 : index
    %c0_27 = arith.constant 0 : index
    %57 = vector.load %arg2[%c1_25, %c0_26, %c0_27] : memref<27x16x16xbf16, #tpu.memory_space<vmem>>, vector<1x16x16xbf16>
    %58 = vector.shape_cast %57 : vector<1x16x16xbf16> to vector<16x16xbf16>
    %cst_28 = arith.constant dense<0.000000e+00> : vector<16x1024xf32>
    %59 = tpu.matmul %58, %56, %cst_28 {dimension_numbers = #tpu.dot_dimension_numbers<[1], [0], [0], [1], [0, 0, 1, 1], [], []>} : vector<16x16xbf16>, vector<16x1024xbf16>, vector<16x1024xf32> -> vector<16x1024xf32>
    %60 = vector.broadcast %55 : vector<1x1024xf32> to vector<16x1024xf32>
    %61 = arith.mulf %59, %60 : vector<16x1024xf32>
    %62 = arith.addf %51, %61 : vector<16x1024xf32>
    %63 = vector.extract_strided_slice %54 {offsets = [0, 128], sizes = [16, 1024], strides = [1, 1]} : vector<16x1280xbf16> to vector<16x1024xbf16>
    %c10 = arith.constant 10 : index
    %c0_29 = arith.constant 0 : index
    %c0_30 = arith.constant 0 : index
    %64 = vector.load %arg2[%c10, %c0_29, %c0_30] : memref<27x16x16xbf16, #tpu.memory_space<vmem>>, vector<1x16x16xbf16>
    %65 = vector.shape_cast %64 : vector<1x16x16xbf16> to vector<16x16xbf16>
    %cst_31 = arith.constant dense<0.000000e+00> : vector<16x1024xf32>
    %66 = tpu.matmul %65, %63, %cst_31 {dimension_numbers = #tpu.dot_dimension_numbers<[1], [0], [0], [1], [0, 0, 1, 1], [], []>} : vector<16x16xbf16>, vector<16x1024xbf16>, vector<16x1024xf32> -> vector<16x1024xf32>
    %67 = vector.broadcast %55 : vector<1x1024xf32> to vector<16x1024xf32>
    %68 = arith.mulf %66, %67 : vector<16x1024xf32>
    %69 = arith.addf %62, %68 : vector<16x1024xf32>
    %70 = vector.extract_strided_slice %54 {offsets = [0, 256], sizes = [16, 1024], strides = [1, 1]} : vector<16x1280xbf16> to vector<16x1024xbf16>
    %c19 = arith.constant 19 : index
    %c0_32 = arith.constant 0 : index
    %c0_33 = arith.constant 0 : index
    %71 = vector.load %arg2[%c19, %c0_32, %c0_33] : memref<27x16x16xbf16, #tpu.memory_space<vmem>>, vector<1x16x16xbf16>
    %72 = vector.shape_cast %71 : vector<1x16x16xbf16> to vector<16x16xbf16>
    %cst_34 = arith.constant dense<0.000000e+00> : vector<16x1024xf32>
    %73 = tpu.matmul %72, %70, %cst_34 {dimension_numbers = #tpu.dot_dimension_numbers<[1], [0], [0], [1], [0, 0, 1, 1], [], []>} : vector<16x16xbf16>, vector<16x1024xbf16>, vector<16x1024xf32> -> vector<16x1024xf32>
    %74 = vector.broadcast %55 : vector<1x1024xf32> to vector<16x1024xf32>
    %75 = arith.mulf %73, %74 : vector<16x1024xf32>
    %76 = arith.addf %69, %75 : vector<16x1024xf32>
    %77 = vector.extract_strided_slice %25 {offsets = [0, 1273], sizes = [16, 7], strides = [1, 1]} : vector<16x1280xbf16> to vector<16x7xbf16>
    %78 = vector.extract_strided_slice %25 {offsets = [0, 0], sizes = [16, 1273], strides = [1, 1]} : vector<16x1280xbf16> to vector<16x1273xbf16>
    %79 = tpu.concatenate %77, %78 in 1 : vector<16x7xbf16>, vector<16x1273xbf16> -> vector<16x1280xbf16>
    %c2 = arith.constant 2 : index
    %c0_35 = arith.constant 0 : index
    %80 = vector.load %arg4[%c2, %c0_35] : memref<9x1024xf32, #tpu.memory_space<vmem>>, vector<1x1024xf32>
    %81 = vector.extract_strided_slice %79 {offsets = [0, 0], sizes = [16, 1024], strides = [1, 1]} : vector<16x1280xbf16> to vector<16x1024xbf16>
    %c2_36 = arith.constant 2 : index
    %c0_37 = arith.constant 0 : index
    %c0_38 = arith.constant 0 : index
    %82 = vector.load %arg2[%c2_36, %c0_37, %c0_38] : memref<27x16x16xbf16, #tpu.memory_space<vmem>>, vector<1x16x16xbf16>
    %83 = vector.shape_cast %82 : vector<1x16x16xbf16> to vector<16x16xbf16>
    %cst_39 = arith.constant dense<0.000000e+00> : vector<16x1024xf32>
    %84 = tpu.matmul %83, %81, %cst_39 {dimension_numbers = #tpu.dot_dimension_numbers<[1], [0], [0], [1], [0, 0, 1, 1], [], []>} : vector<16x16xbf16>, vector<16x1024xbf16>, vector<16x1024xf32> -> vector<16x1024xf32>
    %85 = vector.broadcast %80 : vector<1x1024xf32> to vector<16x1024xf32>
    %86 = arith.mulf %84, %85 : vector<16x1024xf32>
    %87 = arith.addf %76, %86 : vector<16x1024xf32>
    %88 = vector.extract_strided_slice %79 {offsets = [0, 128], sizes = [16, 1024], strides = [1, 1]} : vector<16x1280xbf16> to vector<16x1024xbf16>
    %c11 = arith.constant 11 : index
    %c0_40 = arith.constant 0 : index
    %c0_41 = arith.constant 0 : index
    %89 = vector.load %arg2[%c11, %c0_40, %c0_41] : memref<27x16x16xbf16, #tpu.memory_space<vmem>>, vector<1x16x16xbf16>
    %90 = vector.shape_cast %89 : vector<1x16x16xbf16> to vector<16x16xbf16>
    %cst_42 = arith.constant dense<0.000000e+00> : vector<16x1024xf32>
    %91 = tpu.matmul %90, %88, %cst_42 {dimension_numbers = #tpu.dot_dimension_numbers<[1], [0], [0], [1], [0, 0, 1, 1], [], []>} : vector<16x16xbf16>, vector<16x1024xbf16>, vector<16x1024xf32> -> vector<16x1024xf32>
    %92 = vector.broadcast %80 : vector<1x1024xf32> to vector<16x1024xf32>
    %93 = arith.mulf %91, %92 : vector<16x1024xf32>
    %94 = arith.addf %87, %93 : vector<16x1024xf32>
    %95 = vector.extract_strided_slice %79 {offsets = [0, 256], sizes = [16, 1024], strides = [1, 1]} : vector<16x1280xbf16> to vector<16x1024xbf16>
    %c20 = arith.constant 20 : index
    %c0_43 = arith.constant 0 : index
    %c0_44 = arith.constant 0 : index
    %96 = vector.load %arg2[%c20, %c0_43, %c0_44] : memref<27x16x16xbf16, #tpu.memory_space<vmem>>, vector<1x16x16xbf16>
    %97 = vector.shape_cast %96 : vector<1x16x16xbf16> to vector<16x16xbf16>
    %cst_45 = arith.constant dense<0.000000e+00> : vector<16x1024xf32>
    %98 = tpu.matmul %97, %95, %cst_45 {dimension_numbers = #tpu.dot_dimension_numbers<[1], [0], [0], [1], [0, 0, 1, 1], [], []>} : vector<16x16xbf16>, vector<16x1024xbf16>, vector<16x1024xf32> -> vector<16x1024xf32>
    %99 = vector.broadcast %80 : vector<1x1024xf32> to vector<16x1024xf32>
    %100 = arith.mulf %98, %99 : vector<16x1024xf32>
    %101 = arith.addf %94, %100 : vector<16x1024xf32>
    %102 = vector.extract_strided_slice %25 {offsets = [0, 1279], sizes = [16, 1], strides = [1, 1]} : vector<16x1280xbf16> to vector<16x1xbf16>
    %103 = vector.extract_strided_slice %25 {offsets = [0, 0], sizes = [16, 1279], strides = [1, 1]} : vector<16x1280xbf16> to vector<16x1279xbf16>
    %104 = tpu.concatenate %102, %103 in 1 : vector<16x1xbf16>, vector<16x1279xbf16> -> vector<16x1280xbf16>
    %c3 = arith.constant 3 : index
    %c0_46 = arith.constant 0 : index
    %105 = vector.load %arg4[%c3, %c0_46] : memref<9x1024xf32, #tpu.memory_space<vmem>>, vector<1x1024xf32>
    %106 = vector.extract_strided_slice %104 {offsets = [0, 0], sizes = [16, 1024], strides = [1, 1]} : vector<16x1280xbf16> to vector<16x1024xbf16>
    %c3_47 = arith.constant 3 : index
    %c0_48 = arith.constant 0 : index
    %c0_49 = arith.constant 0 : index
    %107 = vector.load %arg2[%c3_47, %c0_48, %c0_49] : memref<27x16x16xbf16, #tpu.memory_space<vmem>>, vector<1x16x16xbf16>
    %108 = vector.shape_cast %107 : vector<1x16x16xbf16> to vector<16x16xbf16>
    %cst_50 = arith.constant dense<0.000000e+00> : vector<16x1024xf32>
    %109 = tpu.matmul %108, %106, %cst_50 {dimension_numbers = #tpu.dot_dimension_numbers<[1], [0], [0], [1], [0, 0, 1, 1], [], []>} : vector<16x16xbf16>, vector<16x1024xbf16>, vector<16x1024xf32> -> vector<16x1024xf32>
    %110 = vector.broadcast %105 : vector<1x1024xf32> to vector<16x1024xf32>
    %111 = arith.mulf %109, %110 : vector<16x1024xf32>
    %112 = arith.addf %101, %111 : vector<16x1024xf32>
    %113 = vector.extract_strided_slice %104 {offsets = [0, 128], sizes = [16, 1024], strides = [1, 1]} : vector<16x1280xbf16> to vector<16x1024xbf16>
    %c12 = arith.constant 12 : index
    %c0_51 = arith.constant 0 : index
    %c0_52 = arith.constant 0 : index
    %114 = vector.load %arg2[%c12, %c0_51, %c0_52] : memref<27x16x16xbf16, #tpu.memory_space<vmem>>, vector<1x16x16xbf16>
    %115 = vector.shape_cast %114 : vector<1x16x16xbf16> to vector<16x16xbf16>
    %cst_53 = arith.constant dense<0.000000e+00> : vector<16x1024xf32>
    %116 = tpu.matmul %115, %113, %cst_53 {dimension_numbers = #tpu.dot_dimension_numbers<[1], [0], [0], [1], [0, 0, 1, 1], [], []>} : vector<16x16xbf16>, vector<16x1024xbf16>, vector<16x1024xf32> -> vector<16x1024xf32>
    %117 = vector.broadcast %105 : vector<1x1024xf32> to vector<16x1024xf32>
    %118 = arith.mulf %116, %117 : vector<16x1024xf32>
    %119 = arith.addf %112, %118 : vector<16x1024xf32>
    %120 = vector.extract_strided_slice %104 {offsets = [0, 256], sizes = [16, 1024], strides = [1, 1]} : vector<16x1280xbf16> to vector<16x1024xbf16>
    %c21 = arith.constant 21 : index
    %c0_54 = arith.constant 0 : index
    %c0_55 = arith.constant 0 : index
    %121 = vector.load %arg2[%c21, %c0_54, %c0_55] : memref<27x16x16xbf16, #tpu.memory_space<vmem>>, vector<1x16x16xbf16>
    %122 = vector.shape_cast %121 : vector<1x16x16xbf16> to vector<16x16xbf16>
    %cst_56 = arith.constant dense<0.000000e+00> : vector<16x1024xf32>
    %123 = tpu.matmul %122, %120, %cst_56 {dimension_numbers = #tpu.dot_dimension_numbers<[1], [0], [0], [1], [0, 0, 1, 1], [], []>} : vector<16x16xbf16>, vector<16x1024xbf16>, vector<16x1024xf32> -> vector<16x1024xf32>
    %124 = vector.broadcast %105 : vector<1x1024xf32> to vector<16x1024xf32>
    %125 = arith.mulf %123, %124 : vector<16x1024xf32>
    %126 = arith.addf %119, %125 : vector<16x1024xf32>
    %127 = vector.extract_strided_slice %25 {offsets = [0, 0], sizes = [16, 1024], strides = [1, 1]} : vector<16x1280xbf16> to vector<16x1024xbf16>
    %c4 = arith.constant 4 : index
    %c0_57 = arith.constant 0 : index
    %c0_58 = arith.constant 0 : index
    %128 = vector.load %arg2[%c4, %c0_57, %c0_58] : memref<27x16x16xbf16, #tpu.memory_space<vmem>>, vector<1x16x16xbf16>
    %129 = vector.shape_cast %128 : vector<1x16x16xbf16> to vector<16x16xbf16>
    %cst_59 = arith.constant dense<0.000000e+00> : vector<16x1024xf32>
    %130 = tpu.matmul %129, %127, %cst_59 {dimension_numbers = #tpu.dot_dimension_numbers<[1], [0], [0], [1], [0, 0, 1, 1], [], []>} : vector<16x16xbf16>, vector<16x1024xbf16>, vector<16x1024xf32> -> vector<16x1024xf32>
    %131 = arith.addf %126, %130 : vector<16x1024xf32>
    %132 = vector.extract_strided_slice %25 {offsets = [0, 128], sizes = [16, 1024], strides = [1, 1]} : vector<16x1280xbf16> to vector<16x1024xbf16>
    %c13 = arith.constant 13 : index
    %c0_60 = arith.constant 0 : index
    %c0_61 = arith.constant 0 : index
    %133 = vector.load %arg2[%c13, %c0_60, %c0_61] : memref<27x16x16xbf16, #tpu.memory_space<vmem>>, vector<1x16x16xbf16>
    %134 = vector.shape_cast %133 : vector<1x16x16xbf16> to vector<16x16xbf16>
    %cst_62 = arith.constant dense<0.000000e+00> : vector<16x1024xf32>
    %135 = tpu.matmul %134, %132, %cst_62 {dimension_numbers = #tpu.dot_dimension_numbers<[1], [0], [0], [1], [0, 0, 1, 1], [], []>} : vector<16x16xbf16>, vector<16x1024xbf16>, vector<16x1024xf32> -> vector<16x1024xf32>
    %136 = arith.addf %131, %135 : vector<16x1024xf32>
    %137 = vector.extract_strided_slice %25 {offsets = [0, 256], sizes = [16, 1024], strides = [1, 1]} : vector<16x1280xbf16> to vector<16x1024xbf16>
    %c22 = arith.constant 22 : index
    %c0_63 = arith.constant 0 : index
    %c0_64 = arith.constant 0 : index
    %138 = vector.load %arg2[%c22, %c0_63, %c0_64] : memref<27x16x16xbf16, #tpu.memory_space<vmem>>, vector<1x16x16xbf16>
    %139 = vector.shape_cast %138 : vector<1x16x16xbf16> to vector<16x16xbf16>
    %cst_65 = arith.constant dense<0.000000e+00> : vector<16x1024xf32>
    %140 = tpu.matmul %139, %137, %cst_65 {dimension_numbers = #tpu.dot_dimension_numbers<[1], [0], [0], [1], [0, 0, 1, 1], [], []>} : vector<16x16xbf16>, vector<16x1024xbf16>, vector<16x1024xf32> -> vector<16x1024xf32>
    %141 = arith.addf %136, %140 : vector<16x1024xf32>
    %142 = vector.extract_strided_slice %25 {offsets = [0, 1], sizes = [16, 1279], strides = [1, 1]} : vector<16x1280xbf16> to vector<16x1279xbf16>
    %143 = vector.extract_strided_slice %25 {offsets = [0, 0], sizes = [16, 1], strides = [1, 1]} : vector<16x1280xbf16> to vector<16x1xbf16>
    %144 = tpu.concatenate %142, %143 in 1 : vector<16x1279xbf16>, vector<16x1xbf16> -> vector<16x1280xbf16>
    %c5 = arith.constant 5 : index
    %c0_66 = arith.constant 0 : index
    %145 = vector.load %arg4[%c5, %c0_66] : memref<9x1024xf32, #tpu.memory_space<vmem>>, vector<1x1024xf32>
    %146 = vector.extract_strided_slice %144 {offsets = [0, 0], sizes = [16, 1024], strides = [1, 1]} : vector<16x1280xbf16> to vector<16x1024xbf16>
    %c5_67 = arith.constant 5 : index
    %c0_68 = arith.constant 0 : index
    %c0_69 = arith.constant 0 : index
    %147 = vector.load %arg2[%c5_67, %c0_68, %c0_69] : memref<27x16x16xbf16, #tpu.memory_space<vmem>>, vector<1x16x16xbf16>
    %148 = vector.shape_cast %147 : vector<1x16x16xbf16> to vector<16x16xbf16>
    %cst_70 = arith.constant dense<0.000000e+00> : vector<16x1024xf32>
    %149 = tpu.matmul %148, %146, %cst_70 {dimension_numbers = #tpu.dot_dimension_numbers<[1], [0], [0], [1], [0, 0, 1, 1], [], []>} : vector<16x16xbf16>, vector<16x1024xbf16>, vector<16x1024xf32> -> vector<16x1024xf32>
    %150 = vector.broadcast %145 : vector<1x1024xf32> to vector<16x1024xf32>
    %151 = arith.mulf %149, %150 : vector<16x1024xf32>
    %152 = arith.addf %141, %151 : vector<16x1024xf32>
    %153 = vector.extract_strided_slice %144 {offsets = [0, 128], sizes = [16, 1024], strides = [1, 1]} : vector<16x1280xbf16> to vector<16x1024xbf16>
    %c14 = arith.constant 14 : index
    %c0_71 = arith.constant 0 : index
    %c0_72 = arith.constant 0 : index
    %154 = vector.load %arg2[%c14, %c0_71, %c0_72] : memref<27x16x16xbf16, #tpu.memory_space<vmem>>, vector<1x16x16xbf16>
    %155 = vector.shape_cast %154 : vector<1x16x16xbf16> to vector<16x16xbf16>
    %cst_73 = arith.constant dense<0.000000e+00> : vector<16x1024xf32>
    %156 = tpu.matmul %155, %153, %cst_73 {dimension_numbers = #tpu.dot_dimension_numbers<[1], [0], [0], [1], [0, 0, 1, 1], [], []>} : vector<16x16xbf16>, vector<16x1024xbf16>, vector<16x1024xf32> -> vector<16x1024xf32>
    %157 = vector.broadcast %145 : vector<1x1024xf32> to vector<16x1024xf32>
    %158 = arith.mulf %156, %157 : vector<16x1024xf32>
    %159 = arith.addf %152, %158 : vector<16x1024xf32>
    %160 = vector.extract_strided_slice %144 {offsets = [0, 256], sizes = [16, 1024], strides = [1, 1]} : vector<16x1280xbf16> to vector<16x1024xbf16>
    %c23 = arith.constant 23 : index
    %c0_74 = arith.constant 0 : index
    %c0_75 = arith.constant 0 : index
    %161 = vector.load %arg2[%c23, %c0_74, %c0_75] : memref<27x16x16xbf16, #tpu.memory_space<vmem>>, vector<1x16x16xbf16>
    %162 = vector.shape_cast %161 : vector<1x16x16xbf16> to vector<16x16xbf16>
    %cst_76 = arith.constant dense<0.000000e+00> : vector<16x1024xf32>
    %163 = tpu.matmul %162, %160, %cst_76 {dimension_numbers = #tpu.dot_dimension_numbers<[1], [0], [0], [1], [0, 0, 1, 1], [], []>} : vector<16x16xbf16>, vector<16x1024xbf16>, vector<16x1024xf32> -> vector<16x1024xf32>
    %164 = vector.broadcast %145 : vector<1x1024xf32> to vector<16x1024xf32>
    %165 = arith.mulf %163, %164 : vector<16x1024xf32>
    %166 = arith.addf %159, %165 : vector<16x1024xf32>
    %167 = vector.extract_strided_slice %25 {offsets = [0, 7], sizes = [16, 1273], strides = [1, 1]} : vector<16x1280xbf16> to vector<16x1273xbf16>
    %168 = vector.extract_strided_slice %25 {offsets = [0, 0], sizes = [16, 7], strides = [1, 1]} : vector<16x1280xbf16> to vector<16x7xbf16>
    %169 = tpu.concatenate %167, %168 in 1 : vector<16x1273xbf16>, vector<16x7xbf16> -> vector<16x1280xbf16>
    %c6 = arith.constant 6 : index
    %c0_77 = arith.constant 0 : index
    %170 = vector.load %arg4[%c6, %c0_77] : memref<9x1024xf32, #tpu.memory_space<vmem>>, vector<1x1024xf32>
    %171 = vector.extract_strided_slice %169 {offsets = [0, 0], sizes = [16, 1024], strides = [1, 1]} : vector<16x1280xbf16> to vector<16x1024xbf16>
    %c6_78 = arith.constant 6 : index
    %c0_79 = arith.constant 0 : index
    %c0_80 = arith.constant 0 : index
    %172 = vector.load %arg2[%c6_78, %c0_79, %c0_80] : memref<27x16x16xbf16, #tpu.memory_space<vmem>>, vector<1x16x16xbf16>
    %173 = vector.shape_cast %172 : vector<1x16x16xbf16> to vector<16x16xbf16>
    %cst_81 = arith.constant dense<0.000000e+00> : vector<16x1024xf32>
    %174 = tpu.matmul %173, %171, %cst_81 {dimension_numbers = #tpu.dot_dimension_numbers<[1], [0], [0], [1], [0, 0, 1, 1], [], []>} : vector<16x16xbf16>, vector<16x1024xbf16>, vector<16x1024xf32> -> vector<16x1024xf32>
    %175 = vector.broadcast %170 : vector<1x1024xf32> to vector<16x1024xf32>
    %176 = arith.mulf %174, %175 : vector<16x1024xf32>
    %177 = arith.addf %166, %176 : vector<16x1024xf32>
    %178 = vector.extract_strided_slice %169 {offsets = [0, 128], sizes = [16, 1024], strides = [1, 1]} : vector<16x1280xbf16> to vector<16x1024xbf16>
    %c15 = arith.constant 15 : index
    %c0_82 = arith.constant 0 : index
    %c0_83 = arith.constant 0 : index
    %179 = vector.load %arg2[%c15, %c0_82, %c0_83] : memref<27x16x16xbf16, #tpu.memory_space<vmem>>, vector<1x16x16xbf16>
    %180 = vector.shape_cast %179 : vector<1x16x16xbf16> to vector<16x16xbf16>
    %cst_84 = arith.constant dense<0.000000e+00> : vector<16x1024xf32>
    %181 = tpu.matmul %180, %178, %cst_84 {dimension_numbers = #tpu.dot_dimension_numbers<[1], [0], [0], [1], [0, 0, 1, 1], [], []>} : vector<16x16xbf16>, vector<16x1024xbf16>, vector<16x1024xf32> -> vector<16x1024xf32>
    %182 = vector.broadcast %170 : vector<1x1024xf32> to vector<16x1024xf32>
    %183 = arith.mulf %181, %182 : vector<16x1024xf32>
    %184 = arith.addf %177, %183 : vector<16x1024xf32>
    %185 = vector.extract_strided_slice %169 {offsets = [0, 256], sizes = [16, 1024], strides = [1, 1]} : vector<16x1280xbf16> to vector<16x1024xbf16>
    %c24 = arith.constant 24 : index
    %c0_85 = arith.constant 0 : index
    %c0_86 = arith.constant 0 : index
    %186 = vector.load %arg2[%c24, %c0_85, %c0_86] : memref<27x16x16xbf16, #tpu.memory_space<vmem>>, vector<1x16x16xbf16>
    %187 = vector.shape_cast %186 : vector<1x16x16xbf16> to vector<16x16xbf16>
    %cst_87 = arith.constant dense<0.000000e+00> : vector<16x1024xf32>
    %188 = tpu.matmul %187, %185, %cst_87 {dimension_numbers = #tpu.dot_dimension_numbers<[1], [0], [0], [1], [0, 0, 1, 1], [], []>} : vector<16x16xbf16>, vector<16x1024xbf16>, vector<16x1024xf32> -> vector<16x1024xf32>
    %189 = vector.broadcast %170 : vector<1x1024xf32> to vector<16x1024xf32>
    %190 = arith.mulf %188, %189 : vector<16x1024xf32>
    %191 = arith.addf %184, %190 : vector<16x1024xf32>
    %192 = vector.extract_strided_slice %25 {offsets = [0, 8], sizes = [16, 1272], strides = [1, 1]} : vector<16x1280xbf16> to vector<16x1272xbf16>
    %193 = vector.extract_strided_slice %25 {offsets = [0, 0], sizes = [16, 8], strides = [1, 1]} : vector<16x1280xbf16> to vector<16x8xbf16>
    %194 = tpu.concatenate %192, %193 in 1 : vector<16x1272xbf16>, vector<16x8xbf16> -> vector<16x1280xbf16>
    %c7 = arith.constant 7 : index
    %c0_88 = arith.constant 0 : index
    %195 = vector.load %arg4[%c7, %c0_88] : memref<9x1024xf32, #tpu.memory_space<vmem>>, vector<1x1024xf32>
    %196 = vector.extract_strided_slice %194 {offsets = [0, 0], sizes = [16, 1024], strides = [1, 1]} : vector<16x1280xbf16> to vector<16x1024xbf16>
    %c7_89 = arith.constant 7 : index
    %c0_90 = arith.constant 0 : index
    %c0_91 = arith.constant 0 : index
    %197 = vector.load %arg2[%c7_89, %c0_90, %c0_91] : memref<27x16x16xbf16, #tpu.memory_space<vmem>>, vector<1x16x16xbf16>
    %198 = vector.shape_cast %197 : vector<1x16x16xbf16> to vector<16x16xbf16>
    %cst_92 = arith.constant dense<0.000000e+00> : vector<16x1024xf32>
    %199 = tpu.matmul %198, %196, %cst_92 {dimension_numbers = #tpu.dot_dimension_numbers<[1], [0], [0], [1], [0, 0, 1, 1], [], []>} : vector<16x16xbf16>, vector<16x1024xbf16>, vector<16x1024xf32> -> vector<16x1024xf32>
    %200 = vector.broadcast %195 : vector<1x1024xf32> to vector<16x1024xf32>
    %201 = arith.mulf %199, %200 : vector<16x1024xf32>
    %202 = arith.addf %191, %201 : vector<16x1024xf32>
    %203 = vector.extract_strided_slice %194 {offsets = [0, 128], sizes = [16, 1024], strides = [1, 1]} : vector<16x1280xbf16> to vector<16x1024xbf16>
    %c16 = arith.constant 16 : index
    %c0_93 = arith.constant 0 : index
    %c0_94 = arith.constant 0 : index
    %204 = vector.load %arg2[%c16, %c0_93, %c0_94] : memref<27x16x16xbf16, #tpu.memory_space<vmem>>, vector<1x16x16xbf16>
    %205 = vector.shape_cast %204 : vector<1x16x16xbf16> to vector<16x16xbf16>
    %cst_95 = arith.constant dense<0.000000e+00> : vector<16x1024xf32>
    %206 = tpu.matmul %205, %203, %cst_95 {dimension_numbers = #tpu.dot_dimension_numbers<[1], [0], [0], [1], [0, 0, 1, 1], [], []>} : vector<16x16xbf16>, vector<16x1024xbf16>, vector<16x1024xf32> -> vector<16x1024xf32>
    %207 = vector.broadcast %195 : vector<1x1024xf32> to vector<16x1024xf32>
    %208 = arith.mulf %206, %207 : vector<16x1024xf32>
    %209 = arith.addf %202, %208 : vector<16x1024xf32>
    %210 = vector.extract_strided_slice %194 {offsets = [0, 256], sizes = [16, 1024], strides = [1, 1]} : vector<16x1280xbf16> to vector<16x1024xbf16>
    %c25 = arith.constant 25 : index
    %c0_96 = arith.constant 0 : index
    %c0_97 = arith.constant 0 : index
    %211 = vector.load %arg2[%c25, %c0_96, %c0_97] : memref<27x16x16xbf16, #tpu.memory_space<vmem>>, vector<1x16x16xbf16>
    %212 = vector.shape_cast %211 : vector<1x16x16xbf16> to vector<16x16xbf16>
    %cst_98 = arith.constant dense<0.000000e+00> : vector<16x1024xf32>
    %213 = tpu.matmul %212, %210, %cst_98 {dimension_numbers = #tpu.dot_dimension_numbers<[1], [0], [0], [1], [0, 0, 1, 1], [], []>} : vector<16x16xbf16>, vector<16x1024xbf16>, vector<16x1024xf32> -> vector<16x1024xf32>
    %214 = vector.broadcast %195 : vector<1x1024xf32> to vector<16x1024xf32>
    %215 = arith.mulf %213, %214 : vector<16x1024xf32>
    %216 = arith.addf %209, %215 : vector<16x1024xf32>
    %217 = vector.extract_strided_slice %25 {offsets = [0, 9], sizes = [16, 1271], strides = [1, 1]} : vector<16x1280xbf16> to vector<16x1271xbf16>
    %218 = vector.extract_strided_slice %25 {offsets = [0, 0], sizes = [16, 9], strides = [1, 1]} : vector<16x1280xbf16> to vector<16x9xbf16>
    %219 = tpu.concatenate %217, %218 in 1 : vector<16x1271xbf16>, vector<16x9xbf16> -> vector<16x1280xbf16>
    %c8 = arith.constant 8 : index
    %c0_99 = arith.constant 0 : index
    %220 = vector.load %arg4[%c8, %c0_99] : memref<9x1024xf32, #tpu.memory_space<vmem>>, vector<1x1024xf32>
    %221 = vector.extract_strided_slice %219 {offsets = [0, 0], sizes = [16, 1024], strides = [1, 1]} : vector<16x1280xbf16> to vector<16x1024xbf16>
    %c8_100 = arith.constant 8 : index
    %c0_101 = arith.constant 0 : index
    %c0_102 = arith.constant 0 : index
    %222 = vector.load %arg2[%c8_100, %c0_101, %c0_102] : memref<27x16x16xbf16, #tpu.memory_space<vmem>>, vector<1x16x16xbf16>
    %223 = vector.shape_cast %222 : vector<1x16x16xbf16> to vector<16x16xbf16>
    %cst_103 = arith.constant dense<0.000000e+00> : vector<16x1024xf32>
    %224 = tpu.matmul %223, %221, %cst_103 {dimension_numbers = #tpu.dot_dimension_numbers<[1], [0], [0], [1], [0, 0, 1, 1], [], []>} : vector<16x16xbf16>, vector<16x1024xbf16>, vector<16x1024xf32> -> vector<16x1024xf32>
    %225 = vector.broadcast %220 : vector<1x1024xf32> to vector<16x1024xf32>
    %226 = arith.mulf %224, %225 : vector<16x1024xf32>
    %227 = arith.addf %216, %226 : vector<16x1024xf32>
    %228 = vector.extract_strided_slice %219 {offsets = [0, 128], sizes = [16, 1024], strides = [1, 1]} : vector<16x1280xbf16> to vector<16x1024xbf16>
    %c17 = arith.constant 17 : index
    %c0_104 = arith.constant 0 : index
    %c0_105 = arith.constant 0 : index
    %229 = vector.load %arg2[%c17, %c0_104, %c0_105] : memref<27x16x16xbf16, #tpu.memory_space<vmem>>, vector<1x16x16xbf16>
    %230 = vector.shape_cast %229 : vector<1x16x16xbf16> to vector<16x16xbf16>
    %cst_106 = arith.constant dense<0.000000e+00> : vector<16x1024xf32>
    %231 = tpu.matmul %230, %228, %cst_106 {dimension_numbers = #tpu.dot_dimension_numbers<[1], [0], [0], [1], [0, 0, 1, 1], [], []>} : vector<16x16xbf16>, vector<16x1024xbf16>, vector<16x1024xf32> -> vector<16x1024xf32>
    %232 = vector.broadcast %220 : vector<1x1024xf32> to vector<16x1024xf32>
    %233 = arith.mulf %231, %232 : vector<16x1024xf32>
    %234 = arith.addf %227, %233 : vector<16x1024xf32>
    %235 = vector.extract_strided_slice %219 {offsets = [0, 256], sizes = [16, 1024], strides = [1, 1]} : vector<16x1280xbf16> to vector<16x1024xbf16>
    %c26 = arith.constant 26 : index
    %c0_107 = arith.constant 0 : index
    %c0_108 = arith.constant 0 : index
    %236 = vector.load %arg2[%c26, %c0_107, %c0_108] : memref<27x16x16xbf16, #tpu.memory_space<vmem>>, vector<1x16x16xbf16>
    %237 = vector.shape_cast %236 : vector<1x16x16xbf16> to vector<16x16xbf16>
    %cst_109 = arith.constant dense<0.000000e+00> : vector<16x1024xf32>
    %238 = tpu.matmul %237, %235, %cst_109 {dimension_numbers = #tpu.dot_dimension_numbers<[1], [0], [0], [1], [0, 0, 1, 1], [], []>} : vector<16x16xbf16>, vector<16x1024xbf16>, vector<16x1024xf32> -> vector<16x1024xf32>
    %239 = vector.broadcast %220 : vector<1x1024xf32> to vector<16x1024xf32>
    %240 = arith.mulf %238, %239 : vector<16x1024xf32>
    %241 = arith.addf %234, %240 : vector<16x1024xf32>
    %c0_110 = arith.constant 0 : index
    %c0_111 = arith.constant 0 : index
    %242 = vector.load %arg3[%c0_110, %c0_111] : memref<16x1xf32, #tpu.memory_space<vmem>>, vector<16x1xf32>
    %243 = vector.broadcast %242 : vector<16x1xf32> to vector<16x1024xf32>
    %244 = arith.addf %241, %243 : vector<16x1024xf32>
    %245 = arith.truncf %244 : vector<16x1024xf32> to vector<16x1024xbf16>
    %c0_112 = arith.constant 0 : index
    %c0_113 = arith.constant 0 : index
    %246 = vector.load %arg5[%c0_112, %c0_113] : memref<16x1024xbf16, #tpu.memory_space<vmem>>, vector<16x1024xbf16>
    tpu.vector_store %arg5[%c0_112, %c0_113], %245 {strides = array<i32>} : memref<16x1024xbf16, #tpu.memory_space<vmem>>, vector<16x1024xbf16>,
    return
  }
  func.func @transform_1(%arg0: i32) -> (i32, i32, i32) {
    %c0_i32 = arith.constant 0 : i32
    %c0_i32_0 = arith.constant 0 : i32
    %c0_i32_1 = arith.constant 0 : i32
    %c0_i32_2 = arith.constant 0 : i32
    return %c0_i32, %c0_i32_0, %c0_i32_1 : i32, i32, i32
  }
  func.func @transform_2(%arg0: i32) -> (i32, i32) {
    %c0_i32 = arith.constant 0 : i32
    %c0_i32_0 = arith.constant 0 : i32
    %c0_i32_1 = arith.constant 0 : i32
    return %c0_i32, %c0_i32_0 : i32, i32
  }
  func.func @transform_3(%arg0: i32) -> (i32, i32) {
    %c0_i32 = arith.constant 0 : i32
    %c0_i32_0 = arith.constant 0 : i32
    %c0_i32_1 = arith.constant 0 : i32
    return %c0_i32, %c0_i32_0 : i32, i32
  }
  func.func @transform_4(%arg0: i32) -> (i32, i32) {
    %c0_i32 = arith.constant 0 : i32
    %c0_i32_0 = arith.constant 0 : i32
    return %c0_i32, %arg0 : i32, i32
  }
}

</mosaic_0001>

<bundles_post_ra>
// kernel: tpu_custom_call.1
= control target key start
LH: loop header
LB: loop body
LE: loop exit
PB: predicated region body
PF: predicated region fallthrough
CT: control target
= control target key end

     0   :  { %9 = vsyncpa [#allocation5], 0  ;;  %s9866_s0 = inlined_call_operand.vmem [shape: bf16[16,2304], index: 0, kind: input, shape index: {}]   ;;  %s9867_s1 = inlined_call_operand.vmem [shape: bf16[27,16,16], index: 1, kind: input, shape index: {}]   ;;  %s9868_s2 = inlined_call_operand.vmem [shape: f32[16,1], index: 2, kind: input, shape index: {}]   ;;  %s9869_s3 = inlined_call_operand.vmem [shape: f32[9,1024], index: 3, kind: input, shape index: {}]   ;;  %s9870_s4 = inlined_call_operand.hbm [shape: bf16[16,2048], index: 4, kind: output, shape index: {}]  }
   0x1   :  { %11 = vsyncpa [#allocation5 + $0x1], 0  ;;  %s7486_s15 = smov 0   ;;  %s7488_s16 = smov 0  }
   0x2   :  { %s7490_s17 = smov 0   ;;  %s7492_s18 = smov 0  }
   0x3 LB: > { %s7507_s19 = sadd.s32 4294967295, %s7446_s18   ;;  %s7030_s20 = sadd.s32 4294967294, %s7446_s18   ;;  %s7446_s18 = sphi %s7492_s18, %s9914_s18   ;;  %s7442_s17 = sphi %s7490_s17, %s9913_s17   ;;  %s7438_s16 = sphi %s7488_s16, %s9912_s16   ;;  %s7434_s15 = sphi %s7486_s15, %s9911_s15  }
   0x4   : > { %s7511_s21 = sadd.s32 1, %s7446_s18   ;;  %s87_s22 = sadd.s32 1, %s7442_s17 }
   0x5   : > { %s84_s23 = ssub.s32 %s7446_s18, %s7511_s21  ;;  %p97_p0 = scmp.ne.s32.totalorder %s7442_s17, %s7438_s16 }
   0x6   : > { %p85_p1 = scmp.eq.s32.totalorder %s84_s23, 0  ;;  %p98_p2 = scmp.eq.s32.totalorder %s7507_s19, 1 }
   0x7   : > { %p103_p3 = scmp.ne.s32.totalorder %s7438_s16, %s7434_s15  ;;  %p104_p4 = scmp.eq.s32.totalorder %s7030_s20, 1 }
   0x8   : > { %s7522_s24 = scalar_select %p85_p1, %s7442_s17, %s87_s22  }
   0x9   : > { %p7524_p5 = por %p98_p2, %p97_p0  ;;  %p7528_p6 = por %p104_p4, %p103_p3 }
   0xa   : > { %p7032_p7 = scmp.ge.s32.totalorder %s7446_s18, 1  ;;  %p131_p8 = scmp.lt.s32.totalorder %s7446_s18, 3 }
   0xc   : > { %p132_p9 = pnand %p7032_p7, %p131_p8 }
   0xe   : > { %135 = sbr.rel (%p132_p9) target bundleno = 832 (0x340), region = 32 }
  0x13   : > { %s147_s27 = sand.u32 1, %s7438_s16   ;;  %p152_p10 = scmp.lt.s32.totalorder %s7507_s19, 0 }
  0x14   : > { %s7033_s28 = sshll.u32 %s147_s27, 6  ;;  %s153_s29 = ssub.s32 0, %s7507_s19 }
  0x15   : > { %s7034_s30 = smin.u32 %s7507_s19, %s153_s29  ;;  %s7542_s8 = scalar_lea.vmem [#allocation4], %s7033_s28 }
  0x16   : > { %s155_s5 = sand.u32 1, %s7034_s30   ;;  %p7037_p12 = scmp.ne.s32.totalorder %s7507_s19, 0 }
  0x17   : > { %s156_s6 = ssub.s32 0, %s155_s5 }
  0x18   : > { %s9916_s6 = smov (!%p152_p10, %s156_s6), %s155_s5  ;;  %167 = sbr.rel (%p7037_p12) target bundleno = 36 (0x24), region = 36 }
  0x19   : > { %p7036_p11 = scmp.lt.s32.totalorder %s9916_s6, 0  ;;  %s162_s7 = sadd.s32 2, %s9916_s6 }
  0x1b   : > { %s9918_s7 = smov (!%p7036_p11, %s162_s7), %s9916_s6 }
  0x1d   : > { %v203_v0 = vld [vmem:[%s9866_s0] sm:$0xff]  ;;  %v205_v1 = vld [vmem:[%s9866_s0 + $0x8] sm:$0xff]  ;;  %v207_v2 = vld [vmem:[%s9866_s0 + $0x10] sm:$0xff] }
  0x1e   : > { %204 = vst [vmem:[#allocation2] sm:$0xff] %v203_v0  ;;  %206 = vst [vmem:[#allocation2 + $0x8] sm:$0xff] %v205_v1  ;;  %v209_v3 = vld [vmem:[%s9866_s0 + $0x18] sm:$0xff]  ;;  %v211_v4 = vld [vmem:[%s9866_s0 + $0x20] sm:$0xff] }
  0x1f   : > { %208 = vst [vmem:[#allocation2 + $0x10] sm:$0xff] %v207_v2  ;;  %v213_v5 = vld [vmem:[%s9866_s0 + $0x48] sm:$0xff]  ;;  %210 = vst [vmem:[#allocation2 + $0x18] sm:$0xff] %v209_v3  ;;  %v215_v6 = vld [vmem:[%s9866_s0 + $0x50] sm:$0xff] }
  0x20   : > { %212 = vst [vmem:[#allocation2 + $0x20] sm:$0xff] %v211_v4  ;;  %214 = vst [vmem:[#allocation2 + $0x28] sm:$0xff] %v213_v5  ;;  %v217_v7 = vld [vmem:[%s9866_s0 + $0x58] sm:$0xff]  ;;  %v219_v8 = vld [vmem:[%s9866_s0 + $0x60] sm:$0xff] }
  0x21   : > { %216 = vst [vmem:[#allocation2 + $0x30] sm:$0xff] %v215_v6  ;;  %218 = vst [vmem:[#allocation2 + $0x38] sm:$0xff] %v217_v7  ;;  %v221_v9 = vld [vmem:[%s9866_s0 + $0x68] sm:$0xff] }
  0x22   : > { %220 = vst [vmem:[#allocation2 + $0x40] sm:$0xff] %v219_v8  ;;  %222 = vst [vmem:[#allocation2 + $0x48] sm:$0xff] %v221_v9 }
  0x23   : > { %230 = vsyncadd [#allocation3], 1280 }
  0x24 PF: > { %s231_s20 = sadd.s32 1, %s7507_s19 }
  0x25   : > { %p7038_p13 = scmp.ge.s32.totalorder %s231_s20, 2 }
  0x26   : > { %s236_s22 = ssub.s32 (!%p7038_p13), 1, %s9918_s7  ;;  %s7269_s23 = sshll.u32 (!%p7038_p13), %s7507_s19, 10 }
  0x27   : > { %235 = sbr.rel (%p7038_p13) target bundleno = 51 (0x33), region = 74  ;;  %s7270_s28 = sadd.s32 (!%p7038_p13), 1024, %s7269_s23 }
  0x28   : > { %s7271_s29 = smul.u32 (!%p7038_p13), 80, %s236_s22  ;;  %s238_s30 = sshra.s32 (!%p7038_p13), %s7270_s28, 7 }
  0x29   : > { %s7040_s5 = sshll.u32 (!%p7038_p13), %s238_s30, 2  ;;  %s245_s12 = scalar_lea.sflag (!%p7038_p13), [#allocation3], %s236_s22 }
  0x2a   : > { %s241_s10 = scalar_lea.vmem (!%p7038_p13), %s9866_s0, %s7040_s5  ;;  %s244_s11 = scalar_lea.vmem (!%p7038_p13), [#allocation2], %s7271_s29 }
  0x2c   : > { %v281_v10 = vld [vmem:[%s241_s10] sm:$0xff]  ;;  %v283_v11 = vld [vmem:[%s241_s10 + $0x8] sm:$0xff]  ;;  %v285_v12 = vld [vmem:[%s241_s10 + $0x10] sm:$0xff] }
  0x2d   : > { %282 = vst [vmem:[%s244_s11] sm:$0xff] %v281_v10  ;;  %284 = vst [vmem:[%s244_s11 + $0x8] sm:$0xff] %v283_v11  ;;  %v287_v13 = vld [vmem:[%s241_s10 + $0x18] sm:$0xff]  ;;  %v289_v14 = vld [vmem:[%s241_s10 + $0x20] sm:$0xff] }
  0x2e   : > { %286 = vst [vmem:[%s244_s11 + $0x10] sm:$0xff] %v285_v12  ;;  %v291_v15 = vld [vmem:[%s241_s10 + $0x48] sm:$0xff]  ;;  %288 = vst [vmem:[%s244_s11 + $0x18] sm:$0xff] %v287_v13  ;;  %v293_v16 = vld [vmem:[%s241_s10 + $0x50] sm:$0xff] }
  0x2f   : > { %290 = vst [vmem:[%s244_s11 + $0x20] sm:$0xff] %v289_v14  ;;  %292 = vst [vmem:[%s244_s11 + $0x28] sm:$0xff] %v291_v15  ;;  %v295_v17 = vld [vmem:[%s241_s10 + $0x58] sm:$0xff]  ;;  %v297_v18 = vld [vmem:[%s241_s10 + $0x60] sm:$0xff] }
  0x30   : > { %294 = vst [vmem:[%s244_s11 + $0x30] sm:$0xff] %v293_v16  ;;  %296 = vst [vmem:[%s244_s11 + $0x38] sm:$0xff] %v295_v17  ;;  %v299_v19 = vld [vmem:[%s241_s10 + $0x68] sm:$0xff] }
  0x31   : > { %298 = vst [vmem:[%s244_s11 + $0x40] sm:$0xff] %v297_v18  ;;  %300 = vst [vmem:[%s244_s11 + $0x48] sm:$0xff] %v299_v19 }
  0x32   : > { %308 = vsyncadd %s245_s12, 1280 }
  0x33 PF: > { %s7272_s13 = smul.u32 80, %s9918_s7  ;;  %s312_s20 = scalar_lea.sflag [#allocation3], %s9918_s7 }
  0x35   : > { %s7582_s14 = scalar_lea.vmem [#allocation2], %s7272_s13 }
  0x36   : > { %7426 = dma.done.wait %s312_s20, 1280 }
  0x37   : > { %7427 = vsyncadd %s312_s20, 4294966016  ;;  %v7448_v20 = vmov 0   ;;  %s7449_s7 = smov 9   ;;  %s7450_s22 = smov 8   ;;  %vm387_vm0 = vcmask 72704   ;;  %v7350_v38 = vld [vmem:[%s9867_s1] sm:$0xff]  }
  0x38   : > { %457 = vmatprep.mubr.bf16.mxu0 %v7448_v20  ;;  %500 = vmatprep.mubr.bf16.mxu1 %v7448_v20  ;;  %v7590_v21 = vld [vmem:[%s7582_s14 + $0x8] ss:$40 sps:$4 sm:$0xff]   ;;  %v7597_v23 = vld [vmem:[%s7582_s14 + $0xc] ss:$40 sps:$4 sm:$0xff]   ;;  %v7612_v27 = vld [vmem:[%s7582_s14 + $0x18] ss:$40 sps:$4 sm:$0xff]  }
  0x39   : > { %7333 = vset.pattern.permute.xlu0 %v7448_v20  ;;  %7334 = vset.pattern.permute.xlu1 %v7448_v20  ;;  %v7593_v22 = vld [vmem:[%s7582_s14] ss:$40 sps:$4 sm:$0xff]   ;;  %v7600_v24 = vld [vmem:[%s7582_s14 + $0x4] ss:$40 sps:$4 sm:$0xff]   ;;  %v7605_v25 = vld [vmem:[%s7582_s14 + $0x10] ss:$40 sps:$4 sm:$0xff]  }
  0x3a   : > { %373 = vrot.lane.b32.xlu1 %v7590_v21, %s7449_s7  ;;  %369 = vrot.lane.b32.xlu0 %v7593_v22, %s7449_s7  ;;  %v7609_v26 = vld [vmem:[%s7582_s14 + $0x24] ss:$40 sps:$4 sm:$0xff]   ;;  %v7617_v28 = vld [vmem:[%s7582_s14 + $0x14] ss:$40 sps:$4 sm:$0xff]   ;;  %s7451_s23 = smov 7   ;;  %s7452_s28 = smov 1  }
  0x3b   : > { %v7620_v29 = vld [vmem:[%s7582_s14 + $0x20] ss:$40 sps:$4 sm:$0xff]   ;;  %v7623_v30 = vld [vmem:[%s7582_s14 + $0x1c] ss:$40 sps:$4 sm:$0xff]   ;;  %s7453_s29 = smov 127   ;;  %vm421_vm1 = vcmask 130048  }
  0x3c   : > { %v7351_v51 = vld [vmem:[%s9867_s1 + $0x48] sm:$0xff]   ;;  %vm1120_vm2 = vcmask 64512   ;;  %v7352_v57 = vld [vmem:[%s9867_s1 + $0x90] sm:$0xff]   ;;  %s7454_s12 = smov 121   ;;  %vm1854_vm3 = vcmask 56320   ;;  %v7355_v16 = vld [vmem:[%s9867_s1 + $0x98] sm:$0xff]  }
  0x3d   : > { %v7353_v5 = vld [vmem:[%s9867_s1 + $0x8] sm:$0xff]   ;;  %v7354_v10 = vld [vmem:[%s9867_s1 + $0x50] sm:$0xff]   ;;  %vm2588_vm4 = vcmask 7168   ;;  %vm3929_vm5 = vcmask 1039360   ;;  %vm4663_vm6 = vcmask 990208   ;;  %vm5397_vm7 = vcmask 982016  }
  0x3e   : > { %375 = vrot.lane.b32.xlu1 %v7597_v23, %s7449_s7  ;;  %371 = vrot.lane.b32.xlu0 %v7600_v24, %s7449_s7  ;;  %vm6131_vm8 = vcmask 973824   ;;  %s7281_s11 = sshll.u32 %s7507_s19, 9  ;;  %s9826_s19 = scalar_lea.sflag [#allocation5], %s147_s27 }
  0x42   : > { %377 = vrot.lane.b32.xlu1 %v7605_v25, %s7449_s7  ;;  %332 = vrot.lane.b32.xlu0 %v7609_v26, %s7449_s7 }
  0x46   : > { %381 = vrot.lane.b32.xlu1 %v7612_v27, %s7449_s7  ;;  %379 = vrot.lane.b32.xlu0 %v7617_v28, %s7449_s7 }
  0x4a   : > { %385 = vrot.lane.b32.xlu1 %v7620_v29, %s7449_s7  ;;  %383 = vrot.lane.b32.xlu0 %v7623_v30, %s7449_s7 }
  0x4e   : > { %1104 = vrot.lane.b32.xlu1 %v7600_v24, %s7450_s22  ;;  %1102 = vrot.lane.b32.xlu0 %v7593_v22, %s7450_s22 }
  0x52   : > { %1108 = vrot.lane.b32.xlu1 %v7597_v23, %s7450_s22  ;;  %1106 = vrot.lane.b32.xlu0 %v7590_v21, %s7450_s22 }
  0x56   : > { %1110 = vrot.lane.b32.xlu1 %v7605_v25, %s7450_s22  ;;  %1100 = vrot.lane.b32.xlu0 %v7609_v26, %s7450_s22 }
  0x5a   : > { %1114 = vrot.lane.b32.xlu1 %v7612_v27, %s7450_s22  ;;  %1112 = vrot.lane.b32.xlu0 %v7617_v28, %s7450_s22 }
  0x5e   : > { %1118 = vrot.lane.b32.xlu1 %v7620_v29, %s7450_s22  ;;  %1116 = vrot.lane.b32.xlu0 %v7623_v30, %s7450_s22  ;;  %s7457_s22 = smov [#allocation4]  }
  0x62   : > { %1838 = vrot.lane.b32.xlu1 %v7600_v24, %s7451_s23  ;;  %1836 = vrot.lane.b32.xlu0 %v7593_v22, %s7451_s23 }
  0x66   : > { %1842 = vrot.lane.b32.xlu1 %v7597_v23, %s7451_s23  ;;  %1840 = vrot.lane.b32.xlu0 %v7590_v21, %s7451_s23 }
  0x6a   : > { %1844 = vrot.lane.b32.xlu1 %v7605_v25, %s7451_s23  ;;  %1834 = vrot.lane.b32.xlu0 %v7609_v26, %s7451_s23 }
  0x6e   : > { %1848 = vrot.lane.b32.xlu1 %v7612_v27, %s7451_s23  ;;  %1846 = vrot.lane.b32.xlu0 %v7617_v28, %s7451_s23 }
  0x72   : > { %1852 = vrot.lane.b32.xlu1 %v7620_v29, %s7451_s23  ;;  %1850 = vrot.lane.b32.xlu0 %v7623_v30, %s7451_s23  ;;  %s7388_s23 = sshll.u32 %s7457_s22, 4  ;;  %s7389_s23 = int_to_ptr.vmem [resolvable:$false] %s7388_s23 }
  0x76   : > { %2572 = vrot.lane.b32.xlu1 %v7600_v24, %s7452_s28  ;;  %2570 = vrot.lane.b32.xlu0 %v7593_v22, %s7452_s28 }
  0x7a   : > { %2576 = vrot.lane.b32.xlu1 %v7597_v23, %s7452_s28  ;;  %2574 = vrot.lane.b32.xlu0 %v7590_v21, %s7452_s28 }
  0x7e   : > { %2578 = vrot.lane.b32.xlu1 %v7605_v25, %s7452_s28  ;;  %2568 = vrot.lane.b32.xlu0 %v7609_v26, %s7452_s28 }
  0x82   : > { %2582 = vrot.lane.b32.xlu1 %v7612_v27, %s7452_s28  ;;  %2580 = vrot.lane.b32.xlu0 %v7617_v28, %s7452_s28 }
  0x86   : > { %2586 = vrot.lane.b32.xlu1 %v7620_v29, %s7452_s28  ;;  %2584 = vrot.lane.b32.xlu0 %v7623_v30, %s7452_s28  ;;  %s7390_s28 = scalar_lea.vmem %s7389_s23, 2048 }
  0x8a   : > { %3913 = vrot.lane.b32.xlu1 %v7590_v21, %s7453_s29  ;;  %3911 = vrot.lane.b32.xlu0 %v7600_v24, %s7453_s29 }
  0x8e   : > { %3917 = vrot.lane.b32.xlu1 %v7605_v25, %s7453_s29  ;;  %3915 = vrot.lane.b32.xlu0 %v7597_v23, %s7453_s29 }
  0x92   : > { %3919 = vrot.lane.b32.xlu1 %v7617_v28, %s7453_s29  ;;  %3909 = vrot.lane.b32.xlu0 %v7593_v22, %s7453_s29 }
  0x96   : > { %3923 = vrot.lane.b32.xlu1 %v7623_v30, %s7453_s29  ;;  %3921 = vrot.lane.b32.xlu0 %v7612_v27, %s7453_s29 }
  0x9a   : > { %3927 = vrot.lane.b32.xlu1 %v7609_v26, %s7453_s29  ;;  %3925 = vrot.lane.b32.xlu0 %v7620_v29, %s7453_s29  ;;  %s7455_s29 = smov 120  }
  0x9e   : > { %4647 = vrot.lane.b32.xlu1 %v7590_v21, %s7454_s12  ;;  %4645 = vrot.lane.b32.xlu0 %v7600_v24, %s7454_s12 }
  0xa2   : > { %4651 = vrot.lane.b32.xlu1 %v7605_v25, %s7454_s12  ;;  %4649 = vrot.lane.b32.xlu0 %v7597_v23, %s7454_s12 }
  0xa6   : > { %4653 = vrot.lane.b32.xlu1 %v7617_v28, %s7454_s12  ;;  %4643 = vrot.lane.b32.xlu0 %v7593_v22, %s7454_s12 }
  0xaa   : > { %4657 = vrot.lane.b32.xlu1 %v7623_v30, %s7454_s12  ;;  %4655 = vrot.lane.b32.xlu0 %v7612_v27, %s7454_s12 }
  0xac   : > { %v374_v31 = vpop.permute.xlu1 %373  ;;  %v370_v32 = vpop.permute.xlu0 %369 }
  0xae   : > { %4661 = vrot.lane.b32.xlu1 %v7609_v26, %s7454_s12  ;;  %4659 = vrot.lane.b32.xlu0 %v7620_v29, %s7454_s12  ;;  %s7456_s12 = smov 119  }
  0xb0   : > { %v376_v33 = vpop.permute.xlu1 %375  ;;  %v372_v34 = vpop.permute.xlu0 %371 }
  0xb1   : > { %v390_v35 = vsel %vm387_vm0, %v374_v31, %v376_v33  ;;  %v388_v36 = vsel %vm387_vm0, %v370_v32, %v372_v34  ;;  %v389_v37 = vsel %vm387_vm0, %v372_v34, %v374_v31 }
  0xb2   : > { %482 = vmatprep.subr.bf16.mxu1 %v390_v35  ;;  %439 = vmatprep.subr.bf16.mxu0 %v388_v36 }
  0xb3   : > { %483 = vmatpush1.bf16.msra.mxu1 %v389_v37  ;;  %5381 = vrot.lane.b32.xlu1 %v7590_v21, %s7455_s29 }
  0xb4   : > { %v378_v39 = vpop.permute.xlu1 %377  ;;  %v333_v40 = vpop.permute.xlu0 %332  ;;  %5379 = vrot.lane.b32.xlu0 %v7600_v24, %s7455_s29 }
  0xb5   : > { %v409_v41 = vsel %vm387_vm0, %v333_v40, %v370_v32  ;;  %v391_v44 = vsel %vm387_vm0, %v376_v33, %v378_v39 }
  0xb6   : > { %7055 = vmatmul.mubr.msk.bf16.vlgmr.msra.gmra.mxu1 %vm421_vm1, %v7350_v38  ;;  %440 = vmatpush1.bf16.msra.mxu0 %v409_v41 }
  0xb7   : > { %586 = vmatprep.mubr.bf16.mxu1 %v7448_v20  ;;  %5385 = vrot.lane.b32.xlu1 %v7605_v25, %s7455_s29 }
  0xb8   : > { %v380_v42 = vpop.permute.xlu0 %379  ;;  %v382_v45 = vpop.permute.xlu1 %381  ;;  %5383 = vrot.lane.b32.xlu0 %v7597_v23, %s7455_s29 }
  0xb9   : > { %7054 = vmatmul.mubr.msk.bf16.vlgmr.msra.gmra.mxu0 %vm421_vm1, %v7350_v38  ;;  %v392_v43 = vsel %vm387_vm0, %v378_v39, %v380_v42  ;;  %v393_v48 = vsel %vm387_vm0, %v380_v42, %v382_v45  ;;  %v7356_v39 = vld [vmem:[%s9867_s1 + $0x10] sm:$0xff]  }
  0xba   : > { %525 = vmatprep.subr.bf16.mxu0 %v392_v43  ;;  %543 = vmatprep.mubr.bf16.mxu0 %v7448_v20 }
  0xbb   : > { %526 = vmatpush1.bf16.msra.mxu0 %v391_v44  ;;  %5387 = vrot.lane.b32.xlu1 %v7617_v28, %s7455_s29 }
  0xbc   : > { %695 = vmatprep.subr.bf16.mxu0 %v389_v37  ;;  %v384_v46 = vpop.permute.xlu0 %383  ;;  %v386_v49 = vpop.permute.xlu1 %385  ;;  %5377 = vrot.lane.b32.xlu0 %v7593_v22, %s7455_s29 }
  0xbd   : > { %v394_v47 = vsel %vm387_vm0, %v382_v45, %v384_v46  ;;  %v395_v50 = vsel %vm387_vm0, %v384_v46, %v386_v49  ;;  %v396_v55 = vsel %vm387_vm0, %v386_v49, %v333_v40 }
  0xbe   : > { %568 = vmatprep.subr.bf16.mxu1 %v394_v47 }
  0xbf   : > { %569 = vmatpush1.bf16.msra.mxu1 %v393_v48  ;;  %5391 = vrot.lane.b32.xlu1 %v7623_v30, %s7455_s29 }
  0xc0   : > { %738 = vmatprep.subr.bf16.mxu1 %v391_v44  ;;  %v1103_v52 = vpop.permute.xlu0 %1102  ;;  %v1105_v53 = vpop.permute.xlu1 %1104  ;;  %5389 = vrot.lane.b32.xlu0 %v7612_v27, %s7455_s29 }
  0xc1   : > { %7056 = vmatmul.mubr.msk.bf16.vlgmr.msra.gmra.mxu0 %vm421_vm1, %v7350_v38  ;;  %v1121_v59 = vsel %vm1120_vm2, %v1103_v52, %v1105_v53 }
  0xc2   : > { %696 = vmatpush1.bf16.msra.mxu0 %v388_v36  ;;  %7057 = vmatmul.mubr.msk.bf16.vlgmr.msra.gmra.mxu1 %vm421_vm1, %v7350_v38 }
  0xc3   : > { %781 = vmatprep.subr.bf16.mxu0 %v393_v48  ;;  %739 = vmatpush1.bf16.msra.mxu1 %v390_v35 }
  0xc4   : > { %824 = vmatprep.subr.bf16.mxu1 %v395_v50  ;;  %713 = vmatprep.mubr.bf16.mxu0 %v7448_v20  ;;  %v1107_v54 = vpop.permute.xlu0 %1106  ;;  %v1109_v56 = vpop.permute.xlu1 %1108 }
  0xc5   : > { %756 = vmatprep.mubr.bf16.mxu1 %v7448_v20  ;;  %v1123_v61 = vsel %vm1120_vm2, %v1107_v54, %v1109_v56  ;;  %v1122_v0 = vsel %vm1120_vm2, %v1105_v53, %v1107_v54  ;;  %5395 = vrot.lane.b32.xlu1 %v7609_v26, %s7455_s29 }
  0xc6   : > { %5393 = vrot.lane.b32.xlu0 %v7620_v29, %s7455_s29 }
  0xc8   : > { %v7704_v58 = vpop.permute.xlu0 %1100  ;;  %v1111_v62 = vpop.permute.xlu1 %1110 }
  0xc9   : > { %7061 = vmatmul.mubr.msk.bf16.vlgmr.msra.gmra.mxu0 %vm421_vm1, %v7351_v51  ;;  %v1142_v1 = vsel %vm1120_vm2, %v7704_v58, %v1103_v52  ;;  %v1124_v7 = vsel %vm1120_vm2, %v1109_v56, %v1111_v62  ;;  %6115 = vrot.lane.b32.xlu1 %v7590_v21, %s7456_s12 }
  0xca   : > { %782 = vmatpush1.bf16.msra.mxu0 %v392_v43  ;;  %7062 = vmatmul.mubr.msk.bf16.vlgmr.msra.gmra.mxu1 %vm421_vm1, %v7351_v51 }
  0xcb   : > { %825 = vmatpush1.bf16.msra.mxu1 %v394_v47  ;;  %910 = vmatprep.subr.bf16.mxu0 %v390_v35 }
  0xcc   : > { %953 = vmatprep.subr.bf16.mxu1 %v392_v43  ;;  %799 = vmatprep.mubr.bf16.mxu0 %v7448_v20  ;;  %v1113_v60 = vpop.permute.xlu0 %1112  ;;  %v1115_v2 = vpop.permute.xlu1 %1114 }
  0xcd   : > { %842 = vmatprep.mubr.bf16.mxu1 %v7448_v20  ;;  %v1125_v3 = vsel %vm1120_vm2, %v1111_v62, %v1113_v60  ;;  %v1126_v6 = vsel %vm1120_vm2, %v1113_v60, %v1115_v2  ;;  %6113 = vrot.lane.b32.xlu0 %v7600_v24, %s7456_s12  ;;  %v7359_v62 = vld [vmem:[%s9867_s1 + $0x18] sm:$0xff]  }
  0xce   : > { %6119 = vrot.lane.b32.xlu1 %v7605_v25, %s7456_s12 }
  0xd0   : > { %v1117_v63 = vpop.permute.xlu0 %1116  ;;  %v1119_v8 = vpop.permute.xlu1 %1118 }
  0xd1   : > { %7063 = vmatmul.mubr.msk.bf16.vlgmr.msra.gmra.mxu0 %vm421_vm1, %v7351_v51  ;;  %v1127_v4 = vsel %vm1120_vm2, %v1115_v2, %v1117_v63  ;;  %v1128_v9 = vsel %vm1120_vm2, %v1117_v63, %v1119_v8  ;;  %v1129_v14 = vsel %vm1120_vm2, %v1119_v8, %v7704_v58  ;;  %6117 = vrot.lane.b32.xlu0 %v7597_v23, %s7456_s12  ;;  %v7360_v2 = vld [vmem:[%s9867_s1 + $0x60] sm:$0xff]  }
  0xd2   : > { %911 = vmatpush1.bf16.msra.mxu0 %v389_v37  ;;  %7064 = vmatmul.mubr.msk.bf16.vlgmr.msra.gmra.mxu1 %vm421_vm1, %v7351_v51 }
  0xd3   : > { %954 = vmatpush1.bf16.msra.mxu1 %v391_v44  ;;  %996 = vmatprep.subr.bf16.mxu0 %v394_v47  ;;  %v7357_v44 = vld [vmem:[%s9867_s1 + $0x58] sm:$0xff]  }
  0xd4   : > { %1039 = vmatprep.subr.bf16.mxu1 %v396_v55  ;;  %928 = vmatprep.mubr.bf16.mxu0 %v7448_v20  ;;  %v1837_v11 = vpop.permute.xlu0 %1836  ;;  %v1839_v12 = vpop.permute.xlu1 %1838 }
  0xd5   : > { %971 = vmatprep.mubr.bf16.mxu1 %v7448_v20  ;;  %v1855_v18 = vsel %vm1854_vm3, %v1837_v11, %v1839_v12  ;;  %6121 = vrot.lane.b32.xlu1 %v7617_v28, %s7456_s12 }
  0xd6   : > { %6111 = vrot.lane.b32.xlu0 %v7593_v22, %s7456_s12 }
  0xd8   : > { %v1841_v13 = vpop.permute.xlu0 %1840  ;;  %v1843_v15 = vpop.permute.xlu1 %1842 }
  0xd9   : > { %7068 = vmatmul.mubr.msk.bf16.vlgmr.msra.gmra.mxu0 %vm421_vm1, %v7352_v57  ;;  %v1857_v31 = vsel %vm1854_vm3, %v1841_v13, %v1843_v15  ;;  %v1856_v34 = vsel %vm1854_vm3, %v1839_v12, %v1841_v13  ;;  %6125 = vrot.lane.b32.xlu1 %v7623_v30, %s7456_s12  ;;  %v411_v13 = vld [vmem:[%s9869_s3] ss:$8 sm:$0xf] }
  0xda   : > { %997 = vmatpush1.bf16.msra.mxu0 %v393_v48  ;;  %7069 = vmatmul.mubr.msk.bf16.vlgmr.msra.gmra.mxu1 %vm421_vm1, %v7352_v57 }
  0xdb   : > { %1040 = vmatpush1.bf16.msra.mxu1 %v395_v50  ;;  %1173 = vmatprep.subr.bf16.mxu0 %v1121_v59  ;;  %v7358_v50 = vld [vmem:[%s9867_s1 + $0xa0] sm:$0xff]  }
  0xdc   : > { %1014 = vmatprep.mubr.bf16.mxu0 %v7448_v20  ;;  %1057 = vmatprep.mubr.bf16.mxu1 %v7448_v20  ;;  %v7771_v17 = vpop.permute.xlu0 %1834  ;;  %v1845_v32 = vpop.permute.xlu1 %1844 }
  0xdd   : > { %1216 = vmatprep.subr.bf16.mxu1 %v1123_v61  ;;  %v1876_v35 = vsel %vm1854_vm3, %v7771_v17, %v1837_v11  ;;  %v1858_v41 = vsel %vm1854_vm3, %v1843_v15, %v1845_v32  ;;  %6123 = vrot.lane.b32.xlu0 %v7612_v27, %s7456_s12 }
  0xde   : > { %6129 = vrot.lane.b32.xlu1 %v7609_v26, %s7456_s12 }
  0xe0   : > { %v1847_v19 = vpop.permute.xlu0 %1846  ;;  %v1849_v36 = vpop.permute.xlu1 %1848 }
  0xe1   : > { %7070 = vmatmul.mubr.msk.bf16.vlgmr.msra.gmra.mxu0 %vm421_vm1, %v7352_v57  ;;  %v1859_v37 = vsel %vm1854_vm3, %v1845_v32, %v1847_v19  ;;  %v1860_v40 = vsel %vm1854_vm3, %v1847_v19, %v1849_v36  ;;  %6127 = vrot.lane.b32.xlu0 %v7620_v29, %s7456_s12  ;;  %s6943_s12 = sshll.u32 %s7542_s8, 4  ;;  %s9820_s12 = int_to_ptr.vmem [resolvable:$true] %s6943_s12 }
  0xe2   : > { %1174 = vmatpush1.bf16.msra.mxu0 %v1142_v1  ;;  %7071 = vmatmul.mubr.msk.bf16.vlgmr.msra.gmra.mxu1 %vm421_vm1, %v7352_v57  ;;  %s7384_s7 = scalar_lea.vmem %s9820_s12, 1024  ;;  %p7391_p3 = scmp.lt.s32.totalorder %s9820_s12, %s7389_s23 }
  0xe3   : > { %1217 = vmatpush1.bf16.msra.mxu1 %v1122_v0  ;;  %1191 = vmatprep.mubr.bf16.mxu0 %v7448_v20  ;;  %p7385_p0 = scmp.ne.s32.totalorder %s9820_s12, %s7384_s7  ;;  %p7392_p4 = scmp.lt.s32.totalorder %s7390_s28, %s7384_s7 }
  0xe4   : > { %1259 = vmatprep.subr.bf16.mxu0 %v1125_v3  ;;  %1234 = vmatprep.mubr.bf16.mxu1 %v7448_v20  ;;  %v1851_v33 = vpop.permute.xlu0 %1850  ;;  %v1853_v42 = vpop.permute.xlu1 %1852 }
  0xe5   : > { %1302 = vmatprep.subr.bf16.mxu1 %v1127_v4  ;;  %v1861_v38 = vsel %vm1854_vm3, %v1849_v36, %v1851_v33  ;;  %v1862_v43 = vsel %vm1854_vm3, %v1851_v33, %v1853_v42  ;;  %v1863_v48 = vsel %vm1854_vm3, %v1853_v42, %v7771_v17  ;;  %p7386_p1 = pnand %p7385_p0, %p7524_p5  ;;  %p7393_p7 = por %p7392_p4, %p7391_p3 }
  0xe7   : > { %p7387_p2 = pneg %p7386_p1 }
  0xe8   : > { %v2571_v45 = vpop.permute.xlu0 %2570  ;;  %v2573_v46 = vpop.permute.xlu1 %2572 }
  0xe9   : > { %7077 = vmatmul.mubr.msk.bf16.vlgmr.msra.gmra.mxu0 %vm421_vm1, %v7353_v5  ;;  %v2589_v52 = vsel %vm2588_vm4, %v2571_v45, %v2573_v46  ;;  %p7394_p8 = pnand %p7393_p7, %p7387_p2 }
  0xea   : > { %1260 = vmatpush1.bf16.msra.mxu0 %v1124_v7  ;;  %7078 = vmatmul.mubr.msk.bf16.vlgmr.msra.gmra.mxu1 %vm421_vm1, %v7353_v5 }
  0xeb   : > { %1303 = vmatpush1.bf16.msra.mxu1 %v1126_v6  ;;  %1429 = vmatprep.subr.bf16.mxu0 %v1122_v0 }
  0xec   : > { %1472 = vmatprep.subr.bf16.mxu1 %v1124_v7  ;;  %1277 = vmatprep.mubr.bf16.mxu0 %v7448_v20  ;;  %v2575_v47 = vpop.permute.xlu0 %2574  ;;  %v2577_v49 = vpop.permute.xlu1 %2576 }
  0xed   : > { %1320 = vmatprep.mubr.bf16.mxu1 %v7448_v20  ;;  %v2591_v54 = vsel %vm2588_vm4, %v2575_v47, %v2577_v49  ;;  %v2590_v57 = vsel %vm2588_vm4, %v2573_v46, %v2575_v47 }
  0xf0   : > { %v7838_v51 = vpop.permute.xlu0 %2568  ;;  %v2579_v55 = vpop.permute.xlu1 %2578 }
  0xf1   : > { %7079 = vmatmul.mubr.msk.bf16.vlgmr.msra.gmra.mxu0 %vm421_vm1, %v7353_v5  ;;  %v2610_v58 = vsel %vm2588_vm4, %v7838_v51, %v2571_v45 }
  0xf2   : > { %1430 = vmatpush1.bf16.msra.mxu0 %v1121_v59  ;;  %7080 = vmatmul.mubr.msk.bf16.vlgmr.msra.gmra.mxu1 %vm421_vm1, %v7353_v5 }
  0xf3   : > { %1473 = vmatpush1.bf16.msra.mxu1 %v1123_v61  ;;  %1515 = vmatprep.subr.bf16.mxu0 %v1126_v6 }
  0xf4   : > { %1558 = vmatprep.subr.bf16.mxu1 %v1128_v9  ;;  %1447 = vmatprep.mubr.bf16.mxu0 %v7448_v20  ;;  %v2581_v53 = vpop.permute.xlu0 %2580  ;;  %v2583_v59 = vpop.permute.xlu1 %2582 }
  0xf5   : > { %1490 = vmatprep.mubr.bf16.mxu1 %v7448_v20  ;;  %v2593_v60 = vsel %vm2588_vm4, %v2579_v55, %v2581_v53  ;;  %v2594_v63 = vsel %vm2588_vm4, %v2581_v53, %v2583_v59 }
  0xf8   : > { %v2585_v56 = vpop.permute.xlu0 %2584  ;;  %v2587_v1 = vpop.permute.xlu1 %2586 }
  0xf9   : > { %7084 = vmatmul.mubr.msk.bf16.vlgmr.msra.gmra.mxu0 %vm421_vm1, %v7354_v10  ;;  %v2596_v26 = vsel %vm2588_vm4, %v2585_v56, %v2587_v1 }
  0xfa   : > { %1516 = vmatpush1.bf16.msra.mxu0 %v1125_v3  ;;  %7085 = vmatmul.mubr.msk.bf16.vlgmr.msra.gmra.mxu1 %vm421_vm1, %v7354_v10 }
  0xfb   : > { %1559 = vmatpush1.bf16.msra.mxu1 %v1127_v4  ;;  %1644 = vmatprep.subr.bf16.mxu0 %v1123_v61  ;;  %v2595_v61 = vsel %vm2588_vm4, %v2583_v59, %v2585_v56 }
  0xfc   : > { %1687 = vmatprep.subr.bf16.mxu1 %v1125_v3  ;;  %1533 = vmatprep.mubr.bf16.mxu0 %v7448_v20  ;;  %v2597_v3 = vsel %vm2588_vm4, %v2587_v1, %v7838_v51  ;;  %v8040_v1 = vpop.permute.xlu1 %3913 }
  0xfd   : > { %1576 = vmatprep.mubr.bf16.mxu1 %v7448_v20 }
 0x101   : > { %7086 = vmatmul.mubr.msk.bf16.vlgmr.msra.gmra.mxu0 %vm421_vm1, %v7354_v10 }
 0x102   : > { %1645 = vmatpush1.bf16.msra.mxu0 %v1122_v0  ;;  %7087 = vmatmul.mubr.msk.bf16.vlgmr.msra.gmra.mxu1 %vm421_vm1, %v7354_v10  ;;  %v2592_v0 = vsel %vm2588_vm4, %v2577_v49, %v2579_v55  ;;  %v7377_v55 = vld [vmem:[%s7582_s14 + $0xc] ss:$40 sps:$4 sm:$0xff]  }
 0x103   : > { %1688 = vmatpush1.bf16.msra.mxu1 %v1124_v7  ;;  %1730 = vmatprep.subr.bf16.mxu0 %v1127_v4  ;;  %v7361_v4 = vld [vmem:[%s9867_s1 + $0xa8] sm:$0xff]  }
 0x104   : > { %1773 = vmatprep.subr.bf16.mxu1 %v1129_v14  ;;  %1662 = vmatprep.mubr.bf16.mxu0 %v7448_v20  ;;  %v412_v14 = vld [vmem:[%s9869_s3] ss:$8 sm:$0xf0] }
 0x105   : > { %1705 = vmatprep.mubr.bf16.mxu1 %v7448_v20 }
 0x109   : > { %7091 = vmatmul.mubr.msk.bf16.vlgmr.msra.gmra.mxu0 %vm421_vm1, %v7355_v16 }
 0x10a   : > { %1731 = vmatpush1.bf16.msra.mxu0 %v1126_v6  ;;  %7092 = vmatmul.mubr.msk.bf16.vlgmr.msra.gmra.mxu1 %vm421_vm1, %v7355_v16  ;;  %v7362_v6 = vld [vmem:[%s9867_s1 + $0x20] sm:$0xff]  }
 0x10b   : > { %1774 = vmatpush1.bf16.msra.mxu1 %v1128_v9  ;;  %1907 = vmatprep.subr.bf16.mxu0 %v1855_v18 }
 0x10c   : > { %1748 = vmatprep.mubr.bf16.mxu0 %v7448_v20  ;;  %1791 = vmatprep.mubr.bf16.mxu1 %v7448_v20 }
 0x10d   : > { %1950 = vmatprep.subr.bf16.mxu1 %v1857_v31 }
 0x111   : > { %7093 = vmatmul.mubr.msk.bf16.vlgmr.msra.gmra.mxu0 %vm421_vm1, %v7355_v16 }
 0x112   : > { %1908 = vmatpush1.bf16.msra.mxu0 %v1876_v35  ;;  %7094 = vmatmul.mubr.msk.bf16.vlgmr.msra.gmra.mxu1 %vm421_vm1, %v7355_v16 }
 0x113   : > { %1951 = vmatpush1.bf16.msra.mxu1 %v1856_v34  ;;  %1925 = vmatprep.mubr.bf16.mxu0 %v7448_v20 }
 0x114   : > { %1993 = vmatprep.subr.bf16.mxu0 %v1859_v37  ;;  %1968 = vmatprep.mubr.bf16.mxu1 %v7448_v20 }
 0x115   : > { %2036 = vmatprep.subr.bf16.mxu1 %v1861_v38 }
 0x119   : > { %7100 = vmatmul.mubr.msk.bf16.vlgmr.msra.gmra.mxu0 %vm421_vm1, %v7356_v39 }
 0x11a   : > { %1994 = vmatpush1.bf16.msra.mxu0 %v1858_v41  ;;  %7101 = vmatmul.mubr.msk.bf16.vlgmr.msra.gmra.mxu1 %vm421_vm1, %v7356_v39 }
 0x11b   : > { %2037 = vmatpush1.bf16.msra.mxu1 %v1860_v40  ;;  %2163 = vmatprep.subr.bf16.mxu0 %v1856_v34 }
 0x11c   : > { %2206 = vmatprep.subr.bf16.mxu1 %v1858_v41  ;;  %2011 = vmatprep.mubr.bf16.mxu0 %v7448_v20 }
 0x11d   : > { %2054 = vmatprep.mubr.bf16.mxu1 %v7448_v20 }
 0x121   : > { %7102 = vmatmul.mubr.msk.bf16.vlgmr.msra.gmra.mxu0 %vm421_vm1, %v7356_v39 }
 0x122   : > { %2164 = vmatpush1.bf16.msra.mxu0 %v1855_v18  ;;  %7103 = vmatmul.mubr.msk.bf16.vlgmr.msra.gmra.mxu1 %vm421_vm1, %v7356_v39 }
 0x123   : > { %2207 = vmatpush1.bf16.msra.mxu1 %v1857_v31  ;;  %2249 = vmatprep.subr.bf16.mxu0 %v1860_v40 }
 0x124   : > { %2292 = vmatprep.subr.bf16.mxu1 %v1862_v43  ;;  %2181 = vmatprep.mubr.bf16.mxu0 %v7448_v20 }
 0x125   : > { %2224 = vmatprep.mubr.bf16.mxu1 %v7448_v20 }
 0x129   : > { %7107 = vmatmul.mubr.msk.bf16.vlgmr.msra.gmra.mxu0 %vm421_vm1, %v7357_v44 }
 0x12a   : > { %2250 = vmatpush1.bf16.msra.mxu0 %v1859_v37  ;;  %7108 = vmatmul.mubr.msk.bf16.vlgmr.msra.gmra.mxu1 %vm421_vm1, %v7357_v44 }
 0x12b   : > { %2293 = vmatpush1.bf16.msra.mxu1 %v1861_v38  ;;  %2378 = vmatprep.subr.bf16.mxu0 %v1857_v31 }
 0x12c   : > { %2421 = vmatprep.subr.bf16.mxu1 %v1859_v37  ;;  %2267 = vmatprep.mubr.bf16.mxu0 %v7448_v20 }
 0x12d   : > { %2310 = vmatprep.mubr.bf16.mxu1 %v7448_v20 }
 0x131   : > { %7109 = vmatmul.mubr.msk.bf16.vlgmr.msra.gmra.mxu0 %vm421_vm1, %v7357_v44 }
 0x132   : > { %2379 = vmatpush1.bf16.msra.mxu0 %v1856_v34  ;;  %7110 = vmatmul.mubr.msk.bf16.vlgmr.msra.gmra.mxu1 %vm421_vm1, %v7357_v44 }
 0x133   : > { %2422 = vmatpush1.bf16.msra.mxu1 %v1858_v41  ;;  %2464 = vmatprep.subr.bf16.mxu0 %v1861_v38  ;;  %v8001_v41 = vpop.permute.xlu0 %3911 }
 0x134   : > { %2507 = vmatprep.subr.bf16.mxu1 %v1863_v48  ;;  %2396 = vmatprep.mubr.bf16.mxu0 %v7448_v20 }
 0x135   : > { %2439 = vmatprep.mubr.bf16.mxu1 %v7448_v20 }
 0x139   : > { %7114 = vmatmul.mubr.msk.bf16.vlgmr.msra.gmra.mxu0 %vm421_vm1, %v7358_v50 }
 0x13a   : > { %2465 = vmatpush1.bf16.msra.mxu0 %v1860_v40  ;;  %7115 = vmatmul.mubr.msk.bf16.vlgmr.msra.gmra.mxu1 %vm421_vm1, %v7358_v50 }
 0x13b   : > { %2508 = vmatpush1.bf16.msra.mxu1 %v1862_v43  ;;  %2641 = vmatprep.subr.bf16.mxu0 %v2589_v52 }
 0x13c   : > { %2482 = vmatprep.mubr.bf16.mxu0 %v7448_v20  ;;  %2525 = vmatprep.mubr.bf16.mxu1 %v7448_v20 }
 0x13d   : > { %2684 = vmatprep.subr.bf16.mxu1 %v2591_v54 }
 0x141   : > { %7116 = vmatmul.mubr.msk.bf16.vlgmr.msra.gmra.mxu0 %vm421_vm1, %v7358_v50 }
 0x142   : > { %2642 = vmatpush1.bf16.msra.mxu0 %v2610_v58  ;;  %7117 = vmatmul.mubr.msk.bf16.vlgmr.msra.gmra.mxu1 %vm421_vm1, %v7358_v50 }
 0x143   : > { %2685 = vmatpush1.bf16.msra.mxu1 %v2590_v57  ;;  %2659 = vmatprep.mubr.bf16.mxu0 %v7448_v20 }
 0x144   : > { %2727 = vmatprep.subr.bf16.mxu0 %v2593_v60  ;;  %2702 = vmatprep.mubr.bf16.mxu1 %v7448_v20 }
 0x145   : > { %2770 = vmatprep.subr.bf16.mxu1 %v2595_v61 }
 0x149   : > { %7123 = vmatmul.mubr.msk.bf16.vlgmr.msra.gmra.mxu0 %vm421_vm1, %v7359_v62 }
 0x14a   : > { %2728 = vmatpush1.bf16.msra.mxu0 %v2592_v0  ;;  %7124 = vmatmul.mubr.msk.bf16.vlgmr.msra.gmra.mxu1 %vm421_vm1, %v7359_v62 }
 0x14b   : > { %2771 = vmatpush1.bf16.msra.mxu1 %v2594_v63  ;;  %2897 = vmatprep.subr.bf16.mxu0 %v2590_v57 }
 0x14c   : > { %2940 = vmatprep.subr.bf16.mxu1 %v2592_v0  ;;  %2745 = vmatprep.mubr.bf16.mxu0 %v7448_v20 }
 0x14d   : > { %2788 = vmatprep.mubr.bf16.mxu1 %v7448_v20 }
 0x151   : > { %7125 = vmatmul.mubr.msk.bf16.vlgmr.msra.gmra.mxu0 %vm421_vm1, %v7359_v62 }
 0x152   : > { %2898 = vmatpush1.bf16.msra.mxu0 %v2589_v52  ;;  %7126 = vmatmul.mubr.msk.bf16.vlgmr.msra.gmra.mxu1 %vm421_vm1, %v7359_v62 }
 0x153   : > { %2941 = vmatpush1.bf16.msra.mxu1 %v2591_v54  ;;  %2983 = vmatprep.subr.bf16.mxu0 %v2594_v63 }
 0x154   : > { %3026 = vmatprep.subr.bf16.mxu1 %v2596_v26  ;;  %2915 = vmatprep.mubr.bf16.mxu0 %v7448_v20 }
 0x155   : > { %2958 = vmatprep.mubr.bf16.mxu1 %v7448_v20 }
 0x159   : > { %7130 = vmatmul.mubr.msk.bf16.vlgmr.msra.gmra.mxu0 %vm421_vm1, %v7360_v2 }
 0x15a   : > { %2984 = vmatpush1.bf16.msra.mxu0 %v2593_v60  ;;  %7131 = vmatmul.mubr.msk.bf16.vlgmr.msra.gmra.mxu1 %vm421_vm1, %v7360_v2 }
 0x15b   : > { %3027 = vmatpush1.bf16.msra.mxu1 %v2595_v61  ;;  %3112 = vmatprep.subr.bf16.mxu0 %v2591_v54 }
 0x15c   : > { %3155 = vmatprep.subr.bf16.mxu1 %v2593_v60  ;;  %3001 = vmatprep.mubr.bf16.mxu0 %v7448_v20 }
 0x15d   : > { %3044 = vmatprep.mubr.bf16.mxu1 %v7448_v20 }
 0x161   : > { %7132 = vmatmul.mubr.msk.bf16.vlgmr.msra.gmra.mxu0 %vm421_vm1, %v7360_v2 }
 0x162   : > { %3113 = vmatpush1.bf16.msra.mxu0 %v2590_v57  ;;  %7133 = vmatmul.mubr.msk.bf16.vlgmr.msra.gmra.mxu1 %vm421_vm1, %v7360_v2 }
 0x163   : > { %3156 = vmatpush1.bf16.msra.mxu1 %v2592_v0  ;;  %3198 = vmatprep.subr.bf16.mxu0 %v2595_v61 }
 0x164   : > { %3241 = vmatprep.subr.bf16.mxu1 %v2597_v3  ;;  %3130 = vmatprep.mubr.bf16.mxu0 %v7448_v20 }
 0x165   : > { %3173 = vmatprep.mubr.bf16.mxu1 %v7448_v20 }
 0x169   : > { %7137 = vmatmul.mubr.msk.bf16.vlgmr.msra.gmra.mxu0 %vm421_vm1, %v7361_v4 }
 0x16a   : > { %3199 = vmatpush1.bf16.msra.mxu0 %v2594_v63  ;;  %7138 = vmatmul.mubr.msk.bf16.vlgmr.msra.gmra.mxu1 %vm421_vm1, %v7361_v4 }
 0x16b   : > { %3242 = vmatpush1.bf16.msra.mxu1 %v2596_v26  ;;  %3216 = vmatprep.mubr.bf16.mxu0 %v7448_v20 }
 0x16c   : > { %3259 = vmatprep.mubr.bf16.mxu1 %v7448_v20  ;;  %3335 = vmatprep.subr.bf16.mxu0 %v7600_v24 }
 0x16d   : > { %3378 = vmatprep.subr.bf16.mxu1 %v7597_v23 }
 0x171   : > { %7139 = vmatmul.mubr.msk.bf16.vlgmr.msra.gmra.mxu0 %vm421_vm1, %v7361_v4 }
 0x172   : > { %7140 = vmatmul.mubr.msk.bf16.vlgmr.msra.gmra.mxu1 %vm421_vm1, %v7361_v4  ;;  %3336 = vmatpush1.bf16.msra.mxu0 %v7593_v22  ;;  %v598_v22 = vlaneseq }
 0x173   : > { %3379 = vmatpush1.bf16.msra.mxu1 %v7590_v21  ;;  %3353 = vmatprep.mubr.bf16.mxu0 %v7448_v20 }
 0x174   : > { %3396 = vmatprep.mubr.bf16.mxu1 %v7448_v20  ;;  %3421 = vmatprep.subr.bf16.mxu0 %v7617_v28  ;;  %v599_v12 = vshrl.u32 %v598_v22, 7 }
 0x175   : > { %3464 = vmatprep.subr.bf16.mxu1 %v7623_v30 }
 0x176   : > { %v502_v5 = vpop.f32.mrf.mxu1  ;;  %v7955_v19 = vsub.s32 2, %v599_v12  ;;  %v7961_v32 = vsub.s32 1, %v599_v12  ;;  %v7967_v34 = vsub.s32 3, %v599_v12  ;;  %v8004_v43 = vsub.s32 4, %v599_v12 }
 0x177   : > { %v8011_v47 = vsub.s32 6, %v599_v12  ;;  %v8017_v51 = vsub.s32 5, %v599_v12  ;;  %v8026_v57 = vsub.s32 7, %v599_v12 }
 0x178   : > { %v7922_v7 = vpop.f32.mrf.mxu1 }
 0x179   : > { %v459_v8 = vpop.f32.mrf.mxu0  ;;  %7144 = vmatmul.mubr.msk.bf16.vlgmr.msra.gmra.mxu0 %vm421_vm1, %v7362_v6 }
 0x17a   : > { %7145 = vmatmul.mubr.msk.bf16.vlgmr.msra.gmra.mxu1 %vm421_vm1, %v7362_v6  ;;  %3422 = vmatpush1.bf16.msra.mxu0 %v7605_v25  ;;  %v7929_v10 = vpop.f32.mrf.mxu1 }
 0x17b   : > { %v461_v9 = vpop.f32.mrf.mxu0  ;;  %3465 = vmatpush1.bf16.msra.mxu1 %v7612_v27  ;;  %3439 = vmatprep.mubr.bf16.mxu0 %v7448_v20 }
 0x17c   : > { %3482 = vmatprep.mubr.bf16.mxu1 %v7448_v20  ;;  %3535 = vmatprep.subr.bf16.mxu0 %v7590_v21  ;;  %v7942_v16 = vpop.f32.mrf.mxu1  ;;  %v7947_v21 = vor.u32 %v412_v14, %v411_v13 }
 0x17d   : > { %v463_v11 = vpop.f32.mrf.mxu0  ;;  %3578 = vmatprep.subr.bf16.mxu1 %v7605_v25  ;;  %v7949_v25 = vsub.s32 0, %v599_v12 }
 0x17e   : > { %v7991_v38 = vrot.slane %v7947_v21, %v7961_v32  ;;  %v8035_v61 = vrot.slane %v7947_v21, %v8004_v43  ;;  %v8046_v2 = vrot.slane %v7947_v21, %v8011_v47 }
 0x17f   : > { %v7940_v15 = vpop.f32.mrf.mxu0 }
 0x180   : > { %v639_v50 = vmul.f32 %v7991_v38, %v461_v9 }
 0x181   : > { %v7944_v17 = vpop.f32.mrf.mxu0  ;;  %7146 = vmatmul.mubr.msk.bf16.vlgmr.msra.gmra.mxu0 %vm421_vm1, %v7362_v6 }
 0x182   : > { %v7951_v18 = vpop.f32.mrf.mxu1  ;;  %7147 = vmatmul.mubr.msk.bf16.vlgmr.msra.gmra.mxu1 %vm421_vm1, %v7362_v6  ;;  %3536 = vmatpush1.bf16.msra.mxu0 %v7600_v24  ;;  %v7974_v24 = vld [vmem:[%s9867_s1 + $0x68] sm:$0xff]   ;;  %v647_v6 = vmul.f32 %v7991_v38, %v7940_v15  ;;  %v642_v15 = vmul.f32 %v8035_v61, %v7944_v17 }
 0x183   : > { %v7957_v31 = vpop.f32.mrf.mxu0  ;;  %3579 = vmatpush1.bf16.msra.mxu1 %v7597_v23  ;;  %3553 = vmatprep.mubr.bf16.mxu0 %v7448_v20  ;;  %v7979_v23 = vrot.slane %v7947_v21, %v7949_v25  ;;  %v7379_v17 = vld [vmem:[%s7582_s14 + $0x10] ss:$40 sps:$4 sm:$0xff]  }
 0x184   : > { %v7963_v33 = vpop.f32.mrf.mxu1  ;;  %3596 = vmatprep.mubr.bf16.mxu1 %v7448_v20  ;;  %3621 = vmatprep.subr.bf16.mxu0 %v7612_v27  ;;  %v7985_v27 = vrot.slane %v7947_v21, %v7955_v19 }
 0x185   : > { %v7969_v35 = vpop.f32.mrf.mxu0  ;;  %3664 = vmatprep.subr.bf16.mxu1 %v7620_v29  ;;  %v7997_v29 = vrot.slane %v7947_v21, %v7967_v34  ;;  %v638_v42 = vmul.f32 %v7979_v23, %v459_v8  ;;  %v646_v60 = vmul.f32 %v7979_v23, %v463_v11  ;;  %v8066_v11 = vrot.slane %v7947_v21, %v8026_v57 }
 0x186   : > { %v7981_v36 = vpop.f32.mrf.mxu1  ;;  %v640_v46 = vmul.f32 %v7985_v27, %v502_v5  ;;  %v648_v26 = vmul.f32 %v7985_v27, %v7929_v10  ;;  %v8051_v5 = vpop.permute.xlu0 %3915 }
 0x187   : > { %v7987_v37 = vpop.f32.mrf.mxu0  ;;  %v641_v56 = vmul.f32 %v7997_v29, %v7922_v7  ;;  %v8057_v7 = vrot.slane %v7947_v21, %v8017_v51  ;;  %v649_v10 = vmul.f32 %v7997_v29, %v7942_v16  ;;  %v7378_v21 = vld [vmem:[%s7582_s14 + $0x8] ss:$40 sps:$4 sm:$0xff]  }
 0x188   : > { %v7993_v39 = vpop.f32.mrf.mxu1 }
 0x189   : > { %v715_v40 = vpop.f32.mrf.mxu0  ;;  %7151 = vmatmul.mubr.msk.bf16.vlgmr.msra.gmra.mxu0 %vm421_vm1, %v7974_v24 }
 0x18a   : > { %v853_v44 = vmul.f32 %v715_v40, %v7979_v23  ;;  %v758_v45 = vpop.f32.mrf.mxu1  ;;  %7152 = vmatmul.mubr.msk.bf16.vlgmr.msra.gmra.mxu1 %vm421_vm1, %v7974_v24  ;;  %3622 = vmatpush1.bf16.msra.mxu0 %v7617_v28 }
 0x18b   : > { %v855_v48 = vmul.f32 %v758_v45, %v7985_v27  ;;  %v717_v49 = vpop.f32.mrf.mxu0  ;;  %3665 = vmatpush1.bf16.msra.mxu1 %v7623_v30  ;;  %3639 = vmatprep.mubr.bf16.mxu0 %v7448_v20 }
 0x18c   : > { %v8019_v52 = vadd.f32 %v853_v44, %v638_v42  ;;  %v854_v53 = vmul.f32 %v717_v49, %v7991_v38  ;;  %v760_v54 = vpop.f32.mrf.mxu1  ;;  %3682 = vmatprep.mubr.bf16.mxu1 %v7448_v20  ;;  %3735 = vmatprep.subr.bf16.mxu0 %v7377_v55  ;;  %v644_v44 = vmul.f32 %v8046_v2, %v7951_v18  ;;  %v7380_v18 = vld [vmem:[%s7582_s14 + $0x1c] ss:$40 sps:$4 sm:$0xff]  }
 0x18d   : > { %v8028_v30 = vadd.f32 %v855_v48, %v640_v46  ;;  %v856_v58 = vmul.f32 %v760_v54, %v7997_v29  ;;  %v719_v59 = vpop.f32.mrf.mxu0  ;;  %3778 = vmatprep.subr.bf16.mxu1 %v7617_v28  ;;  %v643_v49 = vmul.f32 %v8057_v7, %v7957_v31  ;;  %v8093_v54 = vpop.permute.xlu1 %3917  ;;  %v645_v55 = vmul.f32 %v8066_v11, %v7963_v33  ;;  %v8105_v31 = vld [vmem:[%s9867_s1 + $0xb0] sm:$0xff]  }
 0x18e   : > { %v8037_v62 = vadd.f32 %v854_v53, %v639_v50  ;;  %v861_v63 = vmul.f32 %v719_v59, %v7979_v23  ;;  %v762_v0 = vpop.f32.mrf.mxu1 }
 0x18f   : > { %v8048_v28 = vadd.f32 %v856_v58, %v641_v56  ;;  %v863_v3 = vmul.f32 %v762_v0, %v7985_v27  ;;  %v721_v4 = vpop.f32.mrf.mxu0  ;;  %v650_v0 = vmul.f32 %v8035_v61, %v7969_v35 }
 0x190   : > { %v8059_v8 = vadd.f32 %v861_v63, %v646_v60  ;;  %v862_v22 = vmul.f32 %v721_v4, %v7991_v38  ;;  %v764_v9 = vpop.f32.mrf.mxu1  ;;  %v8107_v60 = vpop.permute.xlu0 %3909  ;;  %v7381_v63 = vld [vmem:[%s7582_s14 + $0x24] ss:$40 sps:$4 sm:$0xff]   ;;  %v652_v4 = vmul.f32 %v8046_v2, %v7981_v36  ;;  %v653_v36 = vmul.f32 %v8066_v11, %v7993_v39  ;;  %v7382_v39 = vld [vmem:[%s7582_s14 + $0x18] ss:$40 sps:$4 sm:$0xff]  }
 0x191   : > { %v8068_v12 = vadd.f32 %v863_v3, %v648_v26  ;;  %v864_v13 = vmul.f32 %v764_v9, %v7997_v29  ;;  %v801_v14 = vpop.f32.mrf.mxu0  ;;  %7153 = vmatmul.mubr.msk.bf16.vlgmr.msra.gmra.mxu0 %vm421_vm1, %v7974_v24 }
 0x192   : > { %v8075_v40 = vadd.f32 %v862_v22, %v647_v6  ;;  %v857_v16 = vmul.f32 %v801_v14, %v8035_v61  ;;  %v844_v42 = vpop.f32.mrf.mxu1  ;;  %7154 = vmatmul.mubr.msk.bf16.vlgmr.msra.gmra.mxu1 %vm421_vm1, %v7974_v24  ;;  %3736 = vmatpush1.bf16.msra.mxu0 %v7378_v21 }
 0x193   : > { %v8083_v45 = vadd.f32 %v864_v13, %v649_v10  ;;  %v859_v46 = vmul.f32 %v844_v42, %v8046_v2  ;;  %v803_v48 = vpop.f32.mrf.mxu0  ;;  %3779 = vmatpush1.bf16.msra.mxu1 %v7379_v17  ;;  %3753 = vmatprep.mubr.bf16.mxu0 %v7448_v20  ;;  %v651_v10 = vmul.f32 %v8057_v7, %v7987_v37 }
 0x194   : > { %v8090_v24 = vadd.f32 %v857_v16, %v642_v15  ;;  %v858_v50 = vmul.f32 %v803_v48, %v8057_v7  ;;  %v846_v53 = vpop.f32.mrf.mxu1  ;;  %3796 = vmatprep.mubr.bf16.mxu1 %v7448_v20  ;;  %3821 = vmatprep.subr.bf16.mxu0 %v7380_v18  ;;  %v8128_v15 = vsel %vm3929_vm5, %v8001_v41, %v8040_v1  ;;  %v8137_v37 = vpop.permute.xlu0 %3921 }
 0x195   : > { %v8099_v56 = vadd.f32 %v859_v46, %v644_v44  ;;  %v860_v58 = vmul.f32 %v846_v53, %v8066_v11  ;;  %v805_v59 = vpop.f32.mrf.mxu0  ;;  %3864 = vmatprep.subr.bf16.mxu1 %v7381_v63  ;;  %v8148_v17 = vsel %vm3929_vm5, %v8051_v5, %v8093_v54  ;;  %v8153_v18 = vpop.permute.xlu1 %3919 }
 0x196   : > { %v8112_v26 = vadd.f32 %v858_v50, %v643_v49  ;;  %v865_v33 = vmul.f32 %v805_v59, %v8035_v61  ;;  %v848_v3 = vpop.f32.mrf.mxu1 }
 0x197   : > { %v8117_v6 = vadd.f32 %v860_v58, %v645_v55  ;;  %v867_v22 = vmul.f32 %v848_v3, %v8046_v2  ;;  %v807_v9 = vpop.f32.mrf.mxu0  ;;  %v7383_v55 = vld [vmem:[%s7582_s14 + $0x20] ss:$40 sps:$4 sm:$0xff]   ;;  %s9818_s14 = scalar_lea.hbm %s9870_s4, %s7281_s11 }
 0x198   : > { %v8122_v13 = vadd.f32 %v865_v33, %v650_v0  ;;  %v866_v35 = vmul.f32 %v807_v9, %v8057_v7  ;;  %v850_v14 = vpop.f32.mrf.mxu1  ;;  %v7072_v9 = vld [vmem:[%s9869_s3 + $0x1] ss:$8 sm:$0xf] }
 0x199   : > { %v8132_v16 = vadd.f32 %v867_v22, %v652_v4  ;;  %v868_v42 = vmul.f32 %v850_v14, %v8066_v11  ;;  %v930_v21 = vpop.f32.mrf.mxu0  ;;  %7158 = vmatmul.mubr.msk.bf16.vlgmr.msra.gmra.mxu0 %vm421_vm1, %v8105_v31 }
 0x19a   : > { %v8139_v44 = vadd.f32 %v866_v35, %v651_v10  ;;  %v1068_v46 = vmul.f32 %v930_v21, %v7979_v23  ;;  %v973_v48 = vpop.f32.mrf.mxu1  ;;  %7159 = vmatmul.mubr.msk.bf16.vlgmr.msra.gmra.mxu1 %vm421_vm1, %v8105_v31  ;;  %3822 = vmatpush1.bf16.msra.mxu0 %v7382_v39 }
 0x19b   : > { %v8150_v49 = vadd.f32 %v868_v42, %v653_v36  ;;  %v1070_v50 = vmul.f32 %v973_v48, %v7985_v27  ;;  %v932_v53 = vpop.f32.mrf.mxu0  ;;  %3865 = vmatpush1.bf16.msra.mxu1 %v7383_v55  ;;  %3982 = vmatprep.subr.bf16.mxu0 %v8128_v15  ;;  %v8182_v36 = vpop.permute.xlu0 %3925 }
 0x19c   : > { %v8158_v58 = vadd.f32 %v1068_v46, %v8019_v52  ;;  %v1069_v59 = vmul.f32 %v932_v53, %v7991_v38  ;;  %v975_v63 = vpop.f32.mrf.mxu1  ;;  %3839 = vmatprep.mubr.bf16.mxu0 %v7448_v20  ;;  %3882 = vmatprep.mubr.bf16.mxu1 %v7448_v20  ;;  %v3924_v46 = vpop.permute.xlu1 %3923 }
 0x19d   : > { %v8164_v0 = vadd.f32 %v1070_v50, %v8028_v30  ;;  %v1071_v33 = vmul.f32 %v975_v63, %v7997_v29  ;;  %v934_v3 = vpop.f32.mrf.mxu0  ;;  %4025 = vmatprep.subr.bf16.mxu1 %v8148_v17  ;;  %v7073_v30 = vld [vmem:[%s9869_s3 + $0x1] ss:$8 sm:$0xf0] }
 0x19e   : > { %v8169_v4 = vadd.f32 %v1069_v59, %v8037_v62  ;;  %v1076_v52 = vmul.f32 %v934_v3, %v7979_v23  ;;  %v977_v22 = vpop.f32.mrf.mxu1  ;;  %v8187_v23 = vsel %vm3929_vm5, %v8040_v1, %v8051_v5  ;;  %v3930_v62 = vsel %vm3929_vm5, %v8107_v60, %v8001_v41 }
 0x19f   : > { %v8179_v10 = vadd.f32 %v1071_v33, %v8048_v28  ;;  %v1078_v35 = vmul.f32 %v977_v22, %v7985_v27  ;;  %v936_v14 = vpop.f32.mrf.mxu0  ;;  %v8205_v41 = vsel %vm3929_vm5, %v8153_v18, %v8137_v37  ;;  %v8207_v1 = vor.u32 %v7073_v30, %v7072_v9  ;;  %v7365_v33 = vld [vmem:[%s9867_s1 + $0x28] sm:$0xff]  }
 0x1a0   : > { %v8193_v42 = vadd.f32 %v1076_v52, %v8059_v8  ;;  %v1077_v28 = vmul.f32 %v936_v14, %v7991_v38  ;;  %v979_v21 = vpop.f32.mrf.mxu1 }
 0x1a1   : > { %v8197_v27 = vadd.f32 %v1078_v35, %v8068_v12  ;;  %v1079_v48 = vmul.f32 %v979_v21, %v7997_v29  ;;  %v1016_v39 = vpop.f32.mrf.mxu0  ;;  %7160 = vmatmul.mubr.msk.bf16.vlgmr.msra.gmra.mxu0 %vm421_vm1, %v8105_v31  ;;  %v8217_v29 = vsel %vm3929_vm5, %v3924_v46, %v8182_v36  ;;  %v8245_v22 = vrot.slane %v8207_v1, %v7949_v25 }
 0x1a2   : > { %v8210_v38 = vadd.f32 %v1077_v28, %v8075_v40  ;;  %v1072_v5 = vmul.f32 %v1016_v39, %v8035_v61  ;;  %3983 = vmatpush1.bf16.msra.mxu0 %v3930_v62  ;;  %v1059_v8 = vpop.f32.mrf.mxu1  ;;  %7161 = vmatmul.mubr.msk.bf16.vlgmr.msra.gmra.mxu1 %vm421_vm1, %v8105_v31  ;;  %v8253_v35 = vrot.slane %v8207_v1, %v7955_v19 }
 0x1a3   : > { %v8220_v12 = vadd.f32 %v1079_v48, %v8083_v45  ;;  %v1074_v50 = vmul.f32 %v1059_v8, %v8046_v2  ;;  %4026 = vmatpush1.bf16.msra.mxu1 %v8187_v23  ;;  %v1018_v40 = vpop.f32.mrf.mxu0  ;;  %4000 = vmatprep.mubr.bf16.mxu0 %v7448_v20 }
 0x1a4   : > { %v8226_v53 = vadd.f32 %v1072_v5, %v8090_v24  ;;  %v1073_v55 = vmul.f32 %v1018_v40, %v8057_v7  ;;  %v1061_v31 = vpop.f32.mrf.mxu1  ;;  %4068 = vmatprep.subr.bf16.mxu0 %v8205_v41  ;;  %4043 = vmatprep.mubr.bf16.mxu1 %v7448_v20 }
 0x1a5   : > { %v8232_v45 = vadd.f32 %v1074_v50, %v8099_v56  ;;  %v1075_v59 = vmul.f32 %v1061_v31, %v8066_v11  ;;  %v1020_v63 = vpop.f32.mrf.mxu0  ;;  %4111 = vmatprep.subr.bf16.mxu1 %v8217_v29 }
 0x1a6   : > { %v8240_v24 = vadd.f32 %v1073_v55, %v8112_v26  ;;  %v1080_v3 = vmul.f32 %v1020_v63, %v8035_v61  ;;  %v1063_v52 = vpop.f32.mrf.mxu1  ;;  %v8257_v26 = vsel %vm3929_vm5, %v8137_v37, %v3924_v46  ;;  %v8310_v55 = vrot.slane %v8207_v1, %v8004_v43 }
 0x1a7   : > { %v8248_v56 = vadd.f32 %v1075_v59, %v8117_v6  ;;  %v1082_v9 = vmul.f32 %v1063_v52, %v8046_v2  ;;  %v1022_v30 = vpop.f32.mrf.mxu0  ;;  %v8265_v6 = vrot.slane %v8207_v1, %v7961_v32  ;;  %v8270_v2 = vsel %vm3929_vm5, %v8093_v54, %v8153_v18 }
 0x1a8   : > { %v8260_v61 = vadd.f32 %v1080_v3, %v8122_v13  ;;  %v1081_v14 = vmul.f32 %v1022_v30, %v8057_v7  ;;  %v1065_v62 = vpop.f32.mrf.mxu1  ;;  %v8279_v7 = vrot.slane %v8207_v1, %v7967_v34  ;;  %v8318_v63 = vrot.slane %v8207_v1, %v8011_v47 }
 0x1a9   : > { %v8273_v28 = vadd.f32 %v1082_v9, %v8132_v16  ;;  %v1083_v37 = vmul.f32 %v1065_v62, %v8066_v11  ;;  %v1193_v21 = vpop.f32.mrf.mxu0  ;;  %7167 = vmatmul.mubr.msk.bf16.vlgmr.msra.gmra.mxu0 %vm421_vm1, %v7365_v33  ;;  %v8326_v9 = vrot.slane %v8207_v1, %v8017_v51  ;;  %v8335_v62 = vrot.slane %v8207_v1, %v8026_v57 }
 0x1aa   : > { %v8282_v13 = vadd.f32 %v1081_v14, %v8139_v44  ;;  %v1372_v46 = vmul.f32 %v8245_v22, %v1193_v21  ;;  %4069 = vmatpush1.bf16.msra.mxu0 %v8270_v2  ;;  %v1236_v54 = vpop.f32.mrf.mxu1  ;;  %7168 = vmatmul.mubr.msk.bf16.vlgmr.msra.gmra.mxu1 %vm421_vm1, %v7365_v33 }
 0x1ab   : > { %v8288_v16 = vadd.f32 %v1083_v37, %v8150_v49  ;;  %v1374_v11 = vmul.f32 %v8253_v35, %v1236_v54  ;;  %4112 = vmatpush1.bf16.msra.mxu1 %v8257_v26  ;;  %4238 = vmatprep.subr.bf16.mxu0 %v8187_v23  ;;  %v1195_v18 = vpop.f32.mrf.mxu0 }
 0x1ac   : > { %v8294_v44 = vadd.f32 %v1372_v46, %v8158_v58  ;;  %v1373_v48 = vmul.f32 %v8265_v6, %v1195_v18  ;;  %4281 = vmatprep.subr.bf16.mxu1 %v8270_v2  ;;  %v1238_v39 = vpop.f32.mrf.mxu1  ;;  %4086 = vmatprep.mubr.bf16.mxu0 %v7448_v20 }
 0x1ad   : > { %v8300_v49 = vadd.f32 %v1374_v11, %v8164_v0  ;;  %v1375_v5 = vmul.f32 %v8279_v7, %v1238_v39  ;;  %v1197_v8 = vpop.f32.mrf.mxu0  ;;  %4129 = vmatprep.mubr.bf16.mxu1 %v7448_v20 }
 0x1ae   : > { %v8305_v50 = vadd.f32 %v1373_v48, %v8169_v4  ;;  %v1380_v58 = vmul.f32 %v8245_v22, %v1197_v8  ;;  %v1240_v40 = vpop.f32.mrf.mxu1 }
 0x1af   : > { %v8313_v31 = vadd.f32 %v1375_v5, %v8179_v10  ;;  %v1382_v0 = vmul.f32 %v8253_v35, %v1240_v40  ;;  %v1199_v59 = vpop.f32.mrf.mxu0 }
 0x1b0   : > { %v8321_v4 = vadd.f32 %v1380_v58, %v8193_v42  ;;  %v1381_v3 = vmul.f32 %v8265_v6, %v1199_v59  ;;  %v1242_v52 = vpop.f32.mrf.mxu1  ;;  %v8337_v42 = vpop.permute.xlu1 %3927 }
 0x1b1   : > { %v8329_v10 = vadd.f32 %v1382_v0, %v8197_v27  ;;  %v1383_v30 = vmul.f32 %v8279_v7, %v1242_v52  ;;  %v1279_v14 = vpop.f32.mrf.mxu0  ;;  %7169 = vmatmul.mubr.msk.bf16.vlgmr.msra.gmra.mxu0 %vm421_vm1, %v7365_v33 }
 0x1b2   : > { %v8340_v37 = vadd.f32 %v1381_v3, %v8210_v38  ;;  %v1376_v21 = vmul.f32 %v8310_v55, %v1279_v14  ;;  %4239 = vmatpush1.bf16.msra.mxu0 %v8128_v15  ;;  %v1322_v27 = vpop.f32.mrf.mxu1  ;;  %7170 = vmatmul.mubr.msk.bf16.vlgmr.msra.gmra.mxu1 %vm421_vm1, %v7365_v33  ;;  %v8354_v38 = vsel %vm3929_vm5, %v8182_v36, %v8337_v42  ;;  %v7366_v36 = vld [vmem:[%s9867_s1 + $0x70] sm:$0xff]  }
 0x1b3   : > { %v8346_v46 = vadd.f32 %v1383_v30, %v8220_v12  ;;  %v1378_v54 = vmul.f32 %v8318_v63, %v1322_v27  ;;  %4282 = vmatpush1.bf16.msra.mxu1 %v8148_v17  ;;  %4324 = vmatprep.subr.bf16.mxu0 %v8257_v26  ;;  %v1281_v1 = vpop.f32.mrf.mxu0  ;;  %v8387_v30 = vpop.permute.xlu0 %4645 }
 0x1b4   : > { %v8357_v15 = vadd.f32 %v1376_v21, %v8226_v53  ;;  %v1377_v33 = vmul.f32 %v8326_v9, %v1281_v1  ;;  %4367 = vmatprep.subr.bf16.mxu1 %v8354_v38  ;;  %v1324_v12 = vpop.f32.mrf.mxu1  ;;  %4256 = vmatprep.mubr.bf16.mxu0 %v7448_v20 }
 0x1b5   : > { %v8363_v11 = vadd.f32 %v1378_v54, %v8232_v45  ;;  %v1379_v18 = vmul.f32 %v8335_v62, %v1324_v12  ;;  %v1283_v48 = vpop.f32.mrf.mxu0  ;;  %4299 = vmatprep.mubr.bf16.mxu1 %v7448_v20 }
 0x1b6   : > { %v8371_v53 = vadd.f32 %v1377_v33, %v8240_v24  ;;  %v1384_v39 = vmul.f32 %v8310_v55, %v1283_v48  ;;  %v1326_v5 = vpop.f32.mrf.mxu1  ;;  %v8416_v48 = vpop.permute.xlu1 %4647 }
 0x1b7   : > { %v8375_v8 = vadd.f32 %v1379_v18, %v8248_v56  ;;  %v1386_v45 = vmul.f32 %v8318_v63, %v1326_v5  ;;  %v1285_v58 = vpop.f32.mrf.mxu0  ;;  %v8422_v5 = vpop.permute.xlu0 %4649 }
 0x1b8   : > { %v8379_v40 = vadd.f32 %v1384_v39, %v8260_v61  ;;  %v1385_v0 = vmul.f32 %v8326_v9, %v1285_v58  ;;  %v1328_v59 = vpop.f32.mrf.mxu1 }
 0x1b9   : > { %v8383_v3 = vadd.f32 %v1386_v45, %v8273_v28  ;;  %v1387_v24 = vmul.f32 %v8335_v62, %v1328_v59  ;;  %v1449_v52 = vpop.f32.mrf.mxu0  ;;  %7174 = vmatmul.mubr.msk.bf16.vlgmr.msra.gmra.mxu0 %vm421_vm1, %v7366_v36 }
 0x1ba   : > { %v8390_v56 = vadd.f32 %v1385_v0, %v8282_v13  ;;  %v1587_v14 = vmul.f32 %v1449_v52, %v8245_v22  ;;  %4325 = vmatpush1.bf16.msra.mxu0 %v8205_v41  ;;  %v1492_v61 = vpop.f32.mrf.mxu1  ;;  %7175 = vmatmul.mubr.msk.bf16.vlgmr.msra.gmra.mxu1 %vm421_vm1, %v7366_v36 }
 0x1bb   : > { %v8396_v28 = vadd.f32 %v1387_v24, %v8288_v16  ;;  %v1589_v21 = vmul.f32 %v1492_v61, %v8253_v35  ;;  %4368 = vmatpush1.bf16.msra.mxu1 %v8217_v29  ;;  %4453 = vmatprep.subr.bf16.mxu0 %v8148_v17  ;;  %v1451_v27 = vpop.f32.mrf.mxu0 }
 0x1bc   : > { %v8402_v13 = vadd.f32 %v1587_v14, %v8294_v44  ;;  %v1588_v54 = vmul.f32 %v1451_v27, %v8265_v6  ;;  %4496 = vmatprep.subr.bf16.mxu1 %v8205_v41  ;;  %v1494_v1 = vpop.f32.mrf.mxu1  ;;  %4342 = vmatprep.mubr.bf16.mxu0 %v7448_v20 }
 0x1bd   : > { %v8408_v16 = vadd.f32 %v1589_v21, %v8300_v49  ;;  %v1590_v33 = vmul.f32 %v1494_v1, %v8279_v7  ;;  %v1453_v12 = vpop.f32.mrf.mxu0  ;;  %4385 = vmatprep.mubr.bf16.mxu1 %v7448_v20 }
 0x1be   : > { %v8413_v17 = vadd.f32 %v1588_v54, %v8305_v50  ;;  %v1595_v44 = vmul.f32 %v1453_v12, %v8245_v22  ;;  %v1496_v18 = vpop.f32.mrf.mxu1 }
 0x1bf   : > { %v8419_v41 = vadd.f32 %v1590_v33, %v8313_v31  ;;  %v1597_v39 = vmul.f32 %v1496_v18, %v8253_v35  ;;  %v1455_v49 = vpop.f32.mrf.mxu0 }
 0x1c0   : > { %v8425_v45 = vadd.f32 %v1595_v44, %v8321_v4  ;;  %v1596_v58 = vmul.f32 %v1455_v49, %v8265_v6  ;;  %v1498_v50 = vpop.f32.mrf.mxu1 }
 0x1c1   : > { %v8429_v0 = vadd.f32 %v1597_v39, %v8329_v10  ;;  %v1598_v59 = vmul.f32 %v1498_v50, %v8279_v7  ;;  %v1535_v24 = vpop.f32.mrf.mxu0  ;;  %7176 = vmatmul.mubr.msk.bf16.vlgmr.msra.gmra.mxu0 %vm421_vm1, %v7366_v36 }
 0x1c2   : > { %v8434_v31 = vadd.f32 %v1596_v58, %v8340_v37  ;;  %v1591_v52 = vmul.f32 %v1535_v24, %v8310_v55  ;;  %4454 = vmatpush1.bf16.msra.mxu0 %v8187_v23  ;;  %v1578_v4 = vpop.f32.mrf.mxu1  ;;  %7177 = vmatmul.mubr.msk.bf16.vlgmr.msra.gmra.mxu1 %vm421_vm1, %v7366_v36  ;;  %v3951_v37 = vsel %vm3929_vm5, %v8337_v42, %v8107_v60  ;;  %v8462_v60 = vld [vmem:[%s9867_s1 + $0xb8] sm:$0xff]   ;;  %v8465_v42 = vpop.permute.xlu0 %4643 }
 0x1c3   : > { %v8440_v14 = vadd.f32 %v1598_v59, %v8346_v46  ;;  %v1593_v10 = vmul.f32 %v1578_v4, %v8318_v63  ;;  %4497 = vmatpush1.bf16.msra.mxu1 %v8270_v2  ;;  %4539 = vmatprep.subr.bf16.mxu0 %v8217_v29  ;;  %v1537_v61 = vpop.f32.mrf.mxu0  ;;  %v8452_v46 = vpop.permute.xlu1 %4651 }
 0x1c4   : > { %v8449_v21 = vadd.f32 %v1591_v52, %v8357_v15  ;;  %v1592_v23 = vmul.f32 %v1537_v61, %v8326_v9  ;;  %4582 = vmatprep.subr.bf16.mxu1 %v3951_v37  ;;  %v1580_v36 = vpop.f32.mrf.mxu1  ;;  %4471 = vmatprep.mubr.bf16.mxu0 %v7448_v20 }
 0x1c5   : > { %v8456_v2 = vadd.f32 %v1593_v10, %v8363_v11  ;;  %v1594_v29 = vmul.f32 %v1580_v36, %v8335_v62  ;;  %v1539_v27 = vpop.f32.mrf.mxu0  ;;  %4514 = vmatprep.mubr.bf16.mxu1 %v7448_v20 }
 0x1c6   : > { %v8468_v15 = vadd.f32 %v1592_v23, %v8371_v53  ;;  %v1599_v54 = vmul.f32 %v1539_v27, %v8310_v55  ;;  %v1582_v11 = vpop.f32.mrf.mxu1  ;;  %v8482_v53 = vsel %vm4663_vm6, %v8387_v30, %v8416_v48  ;;  %v8490_v50 = vpop.permute.xlu0 %4655  ;;  %v7095_v27 = vld [vmem:[%s9869_s3 + $0x2] ss:$8 sm:$0xf] }
 0x1c7   : > { %v8472_v1 = vadd.f32 %v1594_v29, %v8375_v8  ;;  %v1601_v33 = vmul.f32 %v1582_v11, %v8318_v63  ;;  %v1541_v12 = vpop.f32.mrf.mxu0  ;;  %v8509_v10 = vpop.permute.xlu1 %4653 }
 0x1c8   : > { %v8476_v44 = vadd.f32 %v1599_v54, %v8379_v40  ;;  %v1600_v18 = vmul.f32 %v1541_v12, %v8326_v9  ;;  %v1584_v39 = vpop.f32.mrf.mxu1 }
 0x1c9   : > { %v8485_v49 = vadd.f32 %v1601_v33, %v8383_v3  ;;  %v1602_v8 = vmul.f32 %v1584_v39, %v8335_v62  ;;  %v1664_v58 = vpop.f32.mrf.mxu0  ;;  %7181 = vmatmul.mubr.msk.bf16.vlgmr.msra.gmra.mxu0 %vm421_vm1, %v8462_v60  ;;  %v8502_v3 = vsel %vm4663_vm6, %v8422_v5, %v8452_v46 }
 0x1ca   : > { %v8493_v40 = vadd.f32 %v1600_v18, %v8390_v56  ;;  %v1802_v59 = vmul.f32 %v1664_v58, %v8245_v22  ;;  %4540 = vmatpush1.bf16.msra.mxu0 %v8257_v26  ;;  %v1707_v24 = vpop.f32.mrf.mxu1  ;;  %7182 = vmatmul.mubr.msk.bf16.vlgmr.msra.gmra.mxu1 %vm421_vm1, %v8462_v60  ;;  %v8537_v12 = vpop.permute.xlu0 %4659 }
 0x1cb   : > { %v8505_v52 = vadd.f32 %v1602_v8, %v8396_v28  ;;  %v1804_v4 = vmul.f32 %v1707_v24, %v8253_v35  ;;  %4583 = vmatpush1.bf16.msra.mxu1 %v8354_v38  ;;  %v1666_v56 = vpop.f32.mrf.mxu0  ;;  %4716 = vmatprep.subr.bf16.mxu0 %v8482_v53  ;;  %v4658_v8 = vpop.permute.xlu1 %4657 }
 0x1cc   : > { %v8513_v26 = vadd.f32 %v1802_v59, %v8402_v13  ;;  %v1803_v61 = vmul.f32 %v1666_v56, %v8265_v6  ;;  %v1709_v37 = vpop.f32.mrf.mxu1  ;;  %4557 = vmatprep.mubr.bf16.mxu0 %v7448_v20  ;;  %4600 = vmatprep.mubr.bf16.mxu1 %v7448_v20 }
 0x1cd   : > { %v8519_v28 = vadd.f32 %v1804_v4, %v8408_v16  ;;  %v1805_v38 = vmul.f32 %v1709_v37, %v8279_v7  ;;  %v1668_v23 = vpop.f32.mrf.mxu0  ;;  %4759 = vmatprep.subr.bf16.mxu1 %v8502_v3  ;;  %v7096_v16 = vld [vmem:[%s9869_s3 + $0x2] ss:$8 sm:$0xf0] }
 0x1ce   : > { %v8524_v36 = vadd.f32 %v1803_v61, %v8413_v17  ;;  %v1810_v13 = vmul.f32 %v1668_v23, %v8245_v22  ;;  %v1711_v29 = vpop.f32.mrf.mxu1  ;;  %v8542_v22 = vsel %vm4663_vm6, %v8416_v48, %v8422_v5  ;;  %v4664_v17 = vsel %vm4663_vm6, %v8465_v42, %v8387_v30 }
 0x1cf   : > { %v8534_v54 = vadd.f32 %v1805_v38, %v8419_v41  ;;  %v1812_v11 = vmul.f32 %v1711_v29, %v8253_v35  ;;  %v1670_v33 = vpop.f32.mrf.mxu0  ;;  %v8560_v30 = vsel %vm4663_vm6, %v8509_v10, %v8490_v50  ;;  %v8562_v48 = vor.u32 %v7096_v16, %v7095_v27  ;;  %v7368_v38 = vld [vmem:[%s9867_s1 + $0x30] sm:$0xff]  }
 0x1d0   : > { %v8548_v18 = vadd.f32 %v1810_v13, %v8425_v45  ;;  %v1811_v41 = vmul.f32 %v1670_v33, %v8265_v6  ;;  %v1713_v39 = vpop.f32.mrf.mxu1 }
 0x1d1   : > { %v8552_v35 = vadd.f32 %v1812_v11, %v8429_v0  ;;  %v1813_v58 = vmul.f32 %v1713_v39, %v8279_v7  ;;  %v1750_v59 = vpop.f32.mrf.mxu0  ;;  %7183 = vmatmul.mubr.msk.bf16.vlgmr.msra.gmra.mxu0 %vm421_vm1, %v8462_v60  ;;  %v8572_v7 = vsel %vm4663_vm6, %v4658_v8, %v8537_v12  ;;  %v8600_v29 = vrot.slane %v8562_v48, %v7949_v25 }
 0x1d2   : > { %v8565_v6 = vadd.f32 %v1811_v41, %v8434_v31  ;;  %v1806_v5 = vmul.f32 %v1750_v59, %v8310_v55  ;;  %4717 = vmatpush1.bf16.msra.mxu0 %v4664_v17  ;;  %v1793_v45 = vpop.f32.mrf.mxu1  ;;  %7184 = vmatmul.mubr.msk.bf16.vlgmr.msra.gmra.mxu1 %vm421_vm1, %v8462_v60  ;;  %v8608_v11 = vrot.slane %v8562_v48, %v7955_v19 }
 0x1d3   : > { %v8575_v0 = vadd.f32 %v1813_v58, %v8440_v14  ;;  %v1808_v24 = vmul.f32 %v1793_v45, %v8318_v63  ;;  %4760 = vmatpush1.bf16.msra.mxu1 %v8542_v22  ;;  %v1752_v31 = vpop.f32.mrf.mxu0  ;;  %4734 = vmatprep.mubr.bf16.mxu0 %v7448_v20 }
 0x1d4   : > { %v8581_v4 = vadd.f32 %v1806_v5, %v8449_v21  ;;  %v1807_v56 = vmul.f32 %v1752_v31, %v8326_v9  ;;  %v1795_v60 = vpop.f32.mrf.mxu1  ;;  %4802 = vmatprep.subr.bf16.mxu0 %v8560_v30  ;;  %4777 = vmatprep.mubr.bf16.mxu1 %v7448_v20 }
 0x1d5   : > { %v8587_v14 = vadd.f32 %v1808_v24, %v8456_v2  ;;  %v1809_v61 = vmul.f32 %v1795_v60, %v8335_v62  ;;  %v1754_v37 = vpop.f32.mrf.mxu0  ;;  %4845 = vmatprep.subr.bf16.mxu1 %v8572_v7 }
 0x1d6   : > { %v8595_v21 = vadd.f32 %v1807_v56, %v8468_v15  ;;  %v1814_v23 = vmul.f32 %v1754_v37, %v8310_v55  ;;  %v1797_v13 = vpop.f32.mrf.mxu1  ;;  %v8612_v15 = vsel %vm4663_vm6, %v8490_v50, %v4658_v8  ;;  %v8665_v56 = vrot.slane %v8562_v48, %v8004_v43 }
 0x1d7   : > { %v8603_v2 = vadd.f32 %v1809_v61, %v8472_v1  ;;  %v1816_v27 = vmul.f32 %v1797_v13, %v8318_v63  ;;  %v1756_v16 = vpop.f32.mrf.mxu0  ;;  %v8620_v1 = vrot.slane %v8562_v48, %v7961_v32  ;;  %v8625_v63 = vsel %vm4663_vm6, %v8452_v46, %v8509_v10 }
 0x1d8   : > { %v8615_v55 = vadd.f32 %v1814_v23, %v8476_v44  ;;  %v1815_v33 = vmul.f32 %v1756_v16, %v8326_v9  ;;  %v1799_v17 = vpop.f32.mrf.mxu1  ;;  %v8634_v9 = vrot.slane %v8562_v48, %v7967_v34  ;;  %v8673_v37 = vrot.slane %v8562_v48, %v8011_v47 }
 0x1d9   : > { %v8628_v41 = vadd.f32 %v1816_v27, %v8485_v49  ;;  %v1817_v50 = vmul.f32 %v1799_v17, %v8335_v62  ;;  %v1927_v39 = vpop.f32.mrf.mxu0  ;;  %7190 = vmatmul.mubr.msk.bf16.vlgmr.msra.gmra.mxu0 %vm421_vm1, %v7368_v38  ;;  %v8681_v27 = vrot.slane %v8562_v48, %v8017_v51  ;;  %v8690_v17 = vrot.slane %v8562_v48, %v8026_v57 }
 0x1da   : > { %v8637_v44 = vadd.f32 %v1815_v33, %v8493_v40  ;;  %v2106_v8 = vmul.f32 %v8600_v29, %v1927_v39  ;;  %4803 = vmatpush1.bf16.msra.mxu0 %v8625_v63  ;;  %v1970_v46 = vpop.f32.mrf.mxu1  ;;  %7191 = vmatmul.mubr.msk.bf16.vlgmr.msra.gmra.mxu1 %vm421_vm1, %v7368_v38 }
 0x1db   : > { %v8643_v49 = vadd.f32 %v1817_v50, %v8505_v52  ;;  %v2108_v62 = vmul.f32 %v8608_v11, %v1970_v46  ;;  %4846 = vmatpush1.bf16.msra.mxu1 %v8612_v15  ;;  %4972 = vmatprep.subr.bf16.mxu0 %v8542_v22  ;;  %v1929_v10 = vpop.f32.mrf.mxu0 }
 0x1dc   : > { %v8649_v40 = vadd.f32 %v2106_v8, %v8513_v26  ;;  %v2107_v58 = vmul.f32 %v8620_v1, %v1929_v10  ;;  %5015 = vmatprep.subr.bf16.mxu1 %v8625_v63  ;;  %v1972_v59 = vpop.f32.mrf.mxu1  ;;  %4820 = vmatprep.mubr.bf16.mxu0 %v7448_v20 }
 0x1dd   : > { %v8655_v52 = vadd.f32 %v2108_v62, %v8519_v28  ;;  %v2109_v5 = vmul.f32 %v8634_v9, %v1972_v59  ;;  %v1931_v45 = vpop.f32.mrf.mxu0  ;;  %4863 = vmatprep.mubr.bf16.mxu1 %v7448_v20 }
 0x1de   : > { %v8660_v24 = vadd.f32 %v2107_v58, %v8524_v36  ;;  %v2114_v26 = vmul.f32 %v8600_v29, %v1931_v45  ;;  %v1974_v31 = vpop.f32.mrf.mxu1 }
 0x1df   : > { %v8668_v60 = vadd.f32 %v2109_v5, %v8534_v54  ;;  %v2116_v28 = vmul.f32 %v8608_v11, %v1974_v31  ;;  %v1933_v61 = vpop.f32.mrf.mxu0 }
 0x1e0   : > { %v8676_v36 = vadd.f32 %v2114_v26, %v8548_v18  ;;  %v2115_v23 = vmul.f32 %v8620_v1, %v1933_v61  ;;  %v1976_v13 = vpop.f32.mrf.mxu1  ;;  %v8692_v18 = vpop.permute.xlu1 %4661 }
 0x1e1   : > { %v8684_v54 = vadd.f32 %v2116_v28, %v8552_v35  ;;  %v2117_v16 = vmul.f32 %v8634_v9, %v1976_v13  ;;  %v2013_v33 = vpop.f32.mrf.mxu0  ;;  %7192 = vmatmul.mubr.msk.bf16.vlgmr.msra.gmra.mxu0 %vm421_vm1, %v7368_v38 }
 0x1e2   : > { %v8695_v50 = vadd.f32 %v2115_v23, %v8565_v6  ;;  %v2110_v39 = vmul.f32 %v8665_v56, %v2013_v33  ;;  %4973 = vmatpush1.bf16.msra.mxu0 %v8482_v53  ;;  %v2056_v35 = vpop.f32.mrf.mxu1  ;;  %7193 = vmatmul.mubr.msk.bf16.vlgmr.msra.gmra.mxu1 %vm421_vm1, %v7368_v38  ;;  %v8709_v6 = vsel %vm4663_vm6, %v8537_v12, %v8692_v18  ;;  %v7369_v12 = vld [vmem:[%s9867_s1 + $0x78] sm:$0xff]  }
 0x1e3   : > { %v8701_v8 = vadd.f32 %v2117_v16, %v8575_v0  ;;  %v2112_v46 = vmul.f32 %v8673_v37, %v2056_v35  ;;  %5016 = vmatpush1.bf16.msra.mxu1 %v8502_v3  ;;  %5058 = vmatprep.subr.bf16.mxu0 %v8612_v15  ;;  %v2015_v48 = vpop.f32.mrf.mxu0  ;;  %v8742_v16 = vpop.permute.xlu0 %5379 }
 0x1e4   : > { %v8712_v53 = vadd.f32 %v2110_v39, %v8581_v4  ;;  %v2111_v38 = vmul.f32 %v8681_v27, %v2015_v48  ;;  %5101 = vmatprep.subr.bf16.mxu1 %v8709_v6  ;;  %v2058_v0 = vpop.f32.mrf.mxu1  ;;  %4990 = vmatprep.mubr.bf16.mxu0 %v7448_v20 }
 0x1e5   : > { %v8718_v62 = vadd.f32 %v2112_v46, %v8587_v14  ;;  %v2113_v10 = vmul.f32 %v8690_v17, %v2058_v0  ;;  %v2017_v58 = vpop.f32.mrf.mxu0  ;;  %5033 = vmatprep.mubr.bf16.mxu1 %v7448_v20 }
 0x1e6   : > { %v8726_v4 = vadd.f32 %v2111_v38, %v8595_v21  ;;  %v2118_v59 = vmul.f32 %v8665_v56, %v2017_v58  ;;  %v2060_v5 = vpop.f32.mrf.mxu1  ;;  %v8771_v58 = vpop.permute.xlu1 %5381 }
 0x1e7   : > { %v8730_v45 = vadd.f32 %v2113_v10, %v8603_v2  ;;  %v2120_v14 = vmul.f32 %v8673_v37, %v2060_v5  ;;  %v2019_v26 = vpop.f32.mrf.mxu0  ;;  %v8777_v5 = vpop.permute.xlu0 %5383 }
 0x1e8   : > { %v8734_v31 = vadd.f32 %v2118_v59, %v8615_v55  ;;  %v2119_v28 = vmul.f32 %v8681_v27, %v2019_v26  ;;  %v2062_v61 = vpop.f32.mrf.mxu1 }
 0x1e9   : > { %v8738_v23 = vadd.f32 %v2120_v14, %v8628_v41  ;;  %v2121_v21 = vmul.f32 %v8690_v17, %v2062_v61  ;;  %v2183_v13 = vpop.f32.mrf.mxu0  ;;  %7197 = vmatmul.mubr.msk.bf16.vlgmr.msra.gmra.mxu0 %vm421_vm1, %v7369_v12 }
 0x1ea   : > { %v8745_v2 = vadd.f32 %v2119_v28, %v8637_v44  ;;  %v2321_v33 = vmul.f32 %v2183_v13, %v8600_v29  ;;  %5059 = vmatpush1.bf16.msra.mxu0 %v8560_v30  ;;  %v2226_v55 = vpop.f32.mrf.mxu1  ;;  %7198 = vmatmul.mubr.msk.bf16.vlgmr.msra.gmra.mxu1 %vm421_vm1, %v7369_v12 }
 0x1eb   : > { %v8751_v41 = vadd.f32 %v2121_v21, %v8643_v49  ;;  %v2323_v39 = vmul.f32 %v2226_v55, %v8608_v11  ;;  %5102 = vmatpush1.bf16.msra.mxu1 %v8572_v7  ;;  %5187 = vmatprep.subr.bf16.mxu0 %v8502_v3  ;;  %v2185_v35 = vpop.f32.mrf.mxu0 }
 0x1ec   : > { %v8757_v44 = vadd.f32 %v2321_v33, %v8649_v40  ;;  %v2322_v46 = vmul.f32 %v2185_v35, %v8620_v1  ;;  %5230 = vmatprep.subr.bf16.mxu1 %v8560_v30  ;;  %v2228_v48 = vpop.f32.mrf.mxu1  ;;  %5076 = vmatprep.mubr.bf16.mxu0 %v7448_v20 }
 0x1ed   : > { %v8763_v49 = vadd.f32 %v2323_v39, %v8655_v52  ;;  %v2324_v38 = vmul.f32 %v2228_v48, %v8634_v9  ;;  %v2187_v0 = vpop.f32.mrf.mxu0  ;;  %5119 = vmatprep.mubr.bf16.mxu1 %v7448_v20 }
 0x1ee   : > { %v8768_v3 = vadd.f32 %v2322_v46, %v8660_v24  ;;  %v2329_v40 = vmul.f32 %v2187_v0, %v8600_v29  ;;  %v2230_v10 = vpop.f32.mrf.mxu1 }
 0x1ef   : > { %v8774_v30 = vadd.f32 %v2324_v38, %v8668_v60  ;;  %v2331_v59 = vmul.f32 %v2230_v10, %v8608_v11  ;;  %v2189_v52 = vpop.f32.mrf.mxu0 }
 0x1f0   : > { %v8780_v14 = vadd.f32 %v2329_v40, %v8676_v36  ;;  %v2330_v26 = vmul.f32 %v2189_v52, %v8620_v1  ;;  %v2232_v24 = vpop.f32.mrf.mxu1 }
 0x1f1   : > { %v8784_v28 = vadd.f32 %v2331_v59, %v8684_v54  ;;  %v2332_v61 = vmul.f32 %v2232_v24, %v8634_v9  ;;  %v2269_v21 = vpop.f32.mrf.mxu0  ;;  %7199 = vmatmul.mubr.msk.bf16.vlgmr.msra.gmra.mxu0 %vm421_vm1, %v7369_v12 }
 0x1f2   : > { %v8789_v60 = vadd.f32 %v2330_v26, %v8695_v50  ;;  %v2325_v13 = vmul.f32 %v2269_v21, %v8665_v56  ;;  %5188 = vmatpush1.bf16.msra.mxu0 %v8542_v22  ;;  %v2312_v36 = vpop.f32.mrf.mxu1  ;;  %7200 = vmatmul.mubr.msk.bf16.vlgmr.msra.gmra.mxu1 %vm421_vm1, %v7369_v12  ;;  %v4685_v50 = vsel %vm4663_vm6, %v8692_v18, %v8465_v42  ;;  %v8817_v42 = vld [vmem:[%s9867_s1 + $0xc0] sm:$0xff]   ;;  %v8820_v18 = vpop.permute.xlu0 %5377 }
 0x1f3   : > { %v8795_v33 = vadd.f32 %v2332_v61, %v8701_v8  ;;  %v2327_v54 = vmul.f32 %v2312_v36, %v8673_v37  ;;  %5231 = vmatpush1.bf16.msra.mxu1 %v8625_v63  ;;  %5273 = vmatprep.subr.bf16.mxu0 %v8572_v7  ;;  %v2271_v55 = vpop.f32.mrf.mxu0  ;;  %v8807_v8 = vpop.permute.xlu1 %5385 }
 0x1f4   : > { %v8804_v39 = vadd.f32 %v2325_v13, %v8712_v53  ;;  %v2326_v22 = vmul.f32 %v2271_v55, %v8681_v27  ;;  %5316 = vmatprep.subr.bf16.mxu1 %v4685_v50  ;;  %v2314_v12 = vpop.f32.mrf.mxu1  ;;  %5205 = vmatprep.mubr.bf16.mxu0 %v7448_v20 }
 0x1f5   : > { %v8811_v63 = vadd.f32 %v2327_v54, %v8718_v62  ;;  %v2328_v7 = vmul.f32 %v2314_v12, %v8690_v17  ;;  %v2273_v35 = vpop.f32.mrf.mxu0  ;;  %5248 = vmatprep.mubr.bf16.mxu1 %v7448_v20 }
 0x1f6   : > { %v8823_v53 = vadd.f32 %v2326_v22, %v8726_v4  ;;  %v2333_v46 = vmul.f32 %v2273_v35, %v8665_v56  ;;  %v2316_v62 = vpop.f32.mrf.mxu1  ;;  %v8837_v4 = vsel %vm5397_vm7, %v8742_v16, %v8771_v58  ;;  %v8845_v24 = vpop.permute.xlu0 %5389  ;;  %v7118_v35 = vld [vmem:[%s9869_s3 + $0x3] ss:$8 sm:$0xf] }
 0x1f7   : > { %v8827_v48 = vadd.f32 %v2328_v7, %v8730_v45  ;;  %v2335_v38 = vmul.f32 %v2316_v62, %v8673_v37  ;;  %v2275_v0 = vpop.f32.mrf.mxu0  ;;  %v8864_v54 = vpop.permute.xlu1 %5387 }
 0x1f8   : > { %v8831_v40 = vadd.f32 %v2333_v46, %v8734_v31  ;;  %v2334_v10 = vmul.f32 %v2275_v0, %v8681_v27  ;;  %v2318_v59 = vpop.f32.mrf.mxu1 }
 0x1f9   : > { %v8840_v52 = vadd.f32 %v2335_v38, %v8738_v23  ;;  %v2336_v45 = vmul.f32 %v2318_v59, %v8690_v17  ;;  %v2398_v26 = vpop.f32.mrf.mxu0  ;;  %7204 = vmatmul.mubr.msk.bf16.vlgmr.msra.gmra.mxu0 %vm421_vm1, %v8817_v42  ;;  %v8857_v23 = vsel %vm5397_vm7, %v8777_v5, %v8807_v8 }
 0x1fa   : > { %v8848_v31 = vadd.f32 %v2334_v10, %v8745_v2  ;;  %v2536_v61 = vmul.f32 %v2398_v26, %v8600_v29  ;;  %5274 = vmatpush1.bf16.msra.mxu0 %v8612_v15  ;;  %v2441_v21 = vpop.f32.mrf.mxu1  ;;  %7205 = vmatmul.mubr.msk.bf16.vlgmr.msra.gmra.mxu1 %vm421_vm1, %v8817_v42  ;;  %v8892_v0 = vpop.permute.xlu0 %5393 }
 0x1fb   : > { %v8860_v13 = vadd.f32 %v2336_v45, %v8751_v41  ;;  %v2538_v36 = vmul.f32 %v2441_v21, %v8608_v11  ;;  %5317 = vmatpush1.bf16.msra.mxu1 %v8709_v6  ;;  %v2400_v2 = vpop.f32.mrf.mxu0  ;;  %5450 = vmatprep.subr.bf16.mxu0 %v8837_v4  ;;  %v5392_v45 = vpop.permute.xlu1 %5391 }
 0x1fc   : > { %v8868_v15 = vadd.f32 %v2536_v61, %v8757_v44  ;;  %v2537_v55 = vmul.f32 %v2400_v2, %v8620_v1  ;;  %v2443_v50 = vpop.f32.mrf.mxu1  ;;  %5291 = vmatprep.mubr.bf16.mxu0 %v7448_v20  ;;  %5334 = vmatprep.mubr.bf16.mxu1 %v7448_v20 }
 0x1fd   : > { %v8874_v41 = vadd.f32 %v2538_v36, %v8763_v49  ;;  %v2539_v6 = vmul.f32 %v2443_v50, %v8634_v9  ;;  %v2402_v22 = vpop.f32.mrf.mxu0  ;;  %5493 = vmatprep.subr.bf16.mxu1 %v8857_v23  ;;  %v7119_v49 = vld [vmem:[%s9869_s3 + $0x3] ss:$8 sm:$0xf0] }
 0x1fe   : > { %v8879_v12 = vadd.f32 %v2537_v55, %v8768_v3  ;;  %v2544_v44 = vmul.f32 %v2402_v22, %v8600_v29  ;;  %v2445_v7 = vpop.f32.mrf.mxu1  ;;  %v8897_v29 = vsel %vm5397_vm7, %v8771_v58, %v8777_v5  ;;  %v5398_v3 = vsel %vm5397_vm7, %v8820_v18, %v8742_v16 }
 0x1ff   : > { %v8889_v46 = vadd.f32 %v2539_v6, %v8774_v30  ;;  %v2546_v62 = vmul.f32 %v2445_v7, %v8608_v11  ;;  %v2404_v38 = vpop.f32.mrf.mxu0  ;;  %v8915_v16 = vsel %vm5397_vm7, %v8864_v54, %v8845_v24  ;;  %v8917_v58 = vor.u32 %v7119_v49, %v7118_v35  ;;  %v7371_v6 = vld [vmem:[%s9867_s1 + $0x38] sm:$0xff]  }
 0x200   : > { %v8903_v10 = vadd.f32 %v2544_v44, %v8780_v14  ;;  %v2545_v30 = vmul.f32 %v2404_v38, %v8620_v1  ;;  %v2447_v59 = vpop.f32.mrf.mxu1 }
 0x201   : > { %v8907_v11 = vadd.f32 %v2546_v62, %v8784_v28  ;;  %v2547_v26 = vmul.f32 %v2447_v59, %v8634_v9  ;;  %v2484_v61 = vpop.f32.mrf.mxu0  ;;  %7206 = vmatmul.mubr.msk.bf16.vlgmr.msra.gmra.mxu0 %vm421_vm1, %v8817_v42  ;;  %v8927_v9 = vsel %vm5397_vm7, %v5392_v45, %v8892_v0  ;;  %v8955_v7 = vrot.slane %v8917_v58, %v7949_v25 }
 0x202   : > { %v8920_v1 = vadd.f32 %v2545_v30, %v8789_v60  ;;  %v2540_v5 = vmul.f32 %v2484_v61, %v8665_v56  ;;  %5451 = vmatpush1.bf16.msra.mxu0 %v5398_v3  ;;  %v2527_v14 = vpop.f32.mrf.mxu1  ;;  %7207 = vmatmul.mubr.msk.bf16.vlgmr.msra.gmra.mxu1 %vm421_vm1, %v8817_v42  ;;  %v8963_v62 = vrot.slane %v8917_v58, %v7955_v19 }
 0x203   : > { %v8930_v28 = vadd.f32 %v2547_v26, %v8795_v33  ;;  %v2542_v21 = vmul.f32 %v2527_v14, %v8673_v37  ;;  %5494 = vmatpush1.bf16.msra.mxu1 %v8897_v29  ;;  %v2486_v60 = vpop.f32.mrf.mxu0  ;;  %5468 = vmatprep.mubr.bf16.mxu0 %v7448_v20 }
 0x204   : > { %v8936_v36 = vadd.f32 %v2540_v5, %v8804_v39  ;;  %v2541_v2 = vmul.f32 %v2486_v60, %v8681_v27  ;;  %v2529_v42 = vpop.f32.mrf.mxu1  ;;  %5536 = vmatprep.subr.bf16.mxu0 %v8915_v16  ;;  %5511 = vmatprep.mubr.bf16.mxu1 %v7448_v20 }
 0x205   : > { %v8942_v33 = vadd.f32 %v2542_v21, %v8811_v63  ;;  %v2543_v55 = vmul.f32 %v2529_v42, %v8690_v17  ;;  %v2488_v50 = vpop.f32.mrf.mxu0  ;;  %5579 = vmatprep.subr.bf16.mxu1 %v8927_v9 }
 0x206   : > { %v8950_v39 = vadd.f32 %v2541_v2, %v8823_v53  ;;  %v2548_v22 = vmul.f32 %v2488_v50, %v8665_v56  ;;  %v2531_v44 = vpop.f32.mrf.mxu1  ;;  %v8967_v53 = vsel %vm5397_vm7, %v8845_v24, %v5392_v45  ;;  %v9020_v2 = vrot.slane %v8917_v58, %v8004_v43 }
 0x207   : > { %v8958_v63 = vadd.f32 %v2543_v55, %v8827_v48  ;;  %v2550_v35 = vmul.f32 %v2531_v44, %v8673_v37  ;;  %v2490_v49 = vpop.f32.mrf.mxu0  ;;  %v8975_v48 = vrot.slane %v8917_v58, %v7961_v32  ;;  %v8980_v37 = vsel %vm5397_vm7, %v8807_v8, %v8864_v54 }
 0x208   : > { %v8970_v56 = vadd.f32 %v2548_v22, %v8831_v40  ;;  %v2549_v38 = vmul.f32 %v2490_v49, %v8681_v27  ;;  %v2533_v3 = vpop.f32.mrf.mxu1  ;;  %v8989_v27 = vrot.slane %v8917_v58, %v7967_v34  ;;  %v9028_v50 = vrot.slane %v8917_v58, %v8011_v47 }
 0x209   : > { %v8983_v30 = vadd.f32 %v2550_v35, %v8840_v52  ;;  %v2551_v24 = vmul.f32 %v2533_v3, %v8690_v17  ;;  %v2661_v59 = vpop.f32.mrf.mxu0  ;;  %7213 = vmatmul.mubr.msk.bf16.vlgmr.msra.gmra.mxu0 %vm421_vm1, %v7371_v6  ;;  %v9036_v35 = vrot.slane %v8917_v58, %v8017_v51  ;;  %v9045_v3 = vrot.slane %v8917_v58, %v8026_v57 }
 0x20a   : > { %v8992_v40 = vadd.f32 %v2549_v38, %v8848_v31  ;;  %v2840_v45 = vmul.f32 %v8955_v7, %v2661_v59  ;;  %5537 = vmatpush1.bf16.msra.mxu0 %v8980_v37  ;;  %v2704_v8 = vpop.f32.mrf.mxu1  ;;  %7214 = vmatmul.mubr.msk.bf16.vlgmr.msra.gmra.mxu1 %vm421_vm1, %v7371_v6 }
 0x20b   : > { %v8998_v52 = vadd.f32 %v2551_v24, %v8860_v13  ;;  %v2842_v17 = vmul.f32 %v8963_v62, %v2704_v8  ;;  %5580 = vmatpush1.bf16.msra.mxu1 %v8967_v53  ;;  %5706 = vmatprep.subr.bf16.mxu0 %v8897_v29  ;;  %v2663_v54 = vpop.f32.mrf.mxu0 }
 0x20c   : > { %v9004_v31 = vadd.f32 %v2840_v45, %v8868_v15  ;;  %v2841_v26 = vmul.f32 %v8975_v48, %v2663_v54  ;;  %5749 = vmatprep.subr.bf16.mxu1 %v8980_v37  ;;  %v2706_v61 = vpop.f32.mrf.mxu1  ;;  %5554 = vmatprep.mubr.bf16.mxu0 %v7448_v20 }
 0x20d   : > { %v9010_v13 = vadd.f32 %v2842_v17, %v8874_v41  ;;  %v2843_v5 = vmul.f32 %v8989_v27, %v2706_v61  ;;  %v2665_v14 = vpop.f32.mrf.mxu0  ;;  %5597 = vmatprep.mubr.bf16.mxu1 %v7448_v20 }
 0x20e   : > { %v9015_v21 = vadd.f32 %v2841_v26, %v8879_v12  ;;  %v2848_v15 = vmul.f32 %v8955_v7, %v2665_v14  ;;  %v2708_v60 = vpop.f32.mrf.mxu1 }
 0x20f   : > { %v9023_v42 = vadd.f32 %v2843_v5, %v8889_v46  ;;  %v2850_v41 = vmul.f32 %v8963_v62, %v2708_v60  ;;  %v2667_v55 = vpop.f32.mrf.mxu0 }
 0x210   : > { %v9031_v12 = vadd.f32 %v2848_v15, %v8903_v10  ;;  %v2849_v22 = vmul.f32 %v8975_v48, %v2667_v55  ;;  %v2710_v44 = vpop.f32.mrf.mxu1  ;;  %v9047_v10 = vpop.permute.xlu1 %5395 }
 0x211   : > { %v9039_v46 = vadd.f32 %v2850_v41, %v8907_v11  ;;  %v2851_v49 = vmul.f32 %v8989_v27, %v2710_v44  ;;  %v2747_v38 = vpop.f32.mrf.mxu0  ;;  %7215 = vmatmul.mubr.msk.bf16.vlgmr.msra.gmra.mxu0 %vm421_vm1, %v7371_v6 }
 0x212   : > { %v9050_v24 = vadd.f32 %v2849_v22, %v8920_v1  ;;  %v2844_v59 = vmul.f32 %v9020_v2, %v2747_v38  ;;  %5707 = vmatpush1.bf16.msra.mxu0 %v8837_v4  ;;  %v2790_v11 = vpop.f32.mrf.mxu1  ;;  %7216 = vmatmul.mubr.msk.bf16.vlgmr.msra.gmra.mxu1 %vm421_vm1, %v7371_v6  ;;  %v9064_v1 = vsel %vm5397_vm7, %v8892_v0, %v9047_v10  ;;  %v7372_v0 = vld [vmem:[%s9867_s1 + $0x80] sm:$0xff]  }
 0x213   : > { %v9056_v45 = vadd.f32 %v2851_v49, %v8930_v28  ;;  %v2846_v8 = vmul.f32 %v9028_v50, %v2790_v11  ;;  %5750 = vmatpush1.bf16.msra.mxu1 %v8857_v23  ;;  %5792 = vmatprep.subr.bf16.mxu0 %v8967_v53  ;;  %v2749_v58 = vpop.f32.mrf.mxu0  ;;  %v9097_v49 = vpop.permute.xlu0 %6113 }
 0x214   : > { %v9067_v4 = vadd.f32 %v2844_v59, %v8936_v36  ;;  %v2845_v6 = vmul.f32 %v9036_v35, %v2749_v58  ;;  %5835 = vmatprep.subr.bf16.mxu1 %v9064_v1  ;;  %v2792_v28 = vpop.f32.mrf.mxu1  ;;  %5724 = vmatprep.mubr.bf16.mxu0 %v7448_v20 }
 0x215   : > { %v9073_v17 = vadd.f32 %v2846_v8, %v8942_v33  ;;  %v2847_v54 = vmul.f32 %v9045_v3, %v2792_v28  ;;  %v2751_v26 = vpop.f32.mrf.mxu0  ;;  %5767 = vmatprep.mubr.bf16.mxu1 %v7448_v20 }
 0x216   : > { %v9081_v36 = vadd.f32 %v2845_v6, %v8950_v39  ;;  %v2852_v61 = vmul.f32 %v9020_v2, %v2751_v26  ;;  %v2794_v5 = vpop.f32.mrf.mxu1  ;;  %v9126_v26 = vpop.permute.xlu1 %6115 }
 0x217   : > { %v9085_v14 = vadd.f32 %v2847_v54, %v8958_v63  ;;  %v2854_v33 = vmul.f32 %v9028_v50, %v2794_v5  ;;  %v2753_v15 = vpop.f32.mrf.mxu0  ;;  %v9132_v5 = vpop.permute.xlu0 %6117 }
 0x218   : > { %v9089_v60 = vadd.f32 %v2852_v61, %v8970_v56  ;;  %v2853_v41 = vmul.f32 %v9036_v35, %v2753_v15  ;;  %v2796_v55 = vpop.f32.mrf.mxu1 }
 0x219   : > { %v9093_v22 = vadd.f32 %v2854_v33, %v8983_v30  ;;  %v2855_v39 = vmul.f32 %v9045_v3, %v2796_v55  ;;  %v2917_v44 = vpop.f32.mrf.mxu0  ;;  %7220 = vmatmul.mubr.msk.bf16.vlgmr.msra.gmra.mxu0 %vm421_vm1, %v7372_v0 }
 0x21a   : > { %v9100_v63 = vadd.f32 %v2853_v41, %v8992_v40  ;;  %v3055_v38 = vmul.f32 %v2917_v44, %v8955_v7  ;;  %5793 = vmatpush1.bf16.msra.mxu0 %v8915_v16  ;;  %v2960_v56 = vpop.f32.mrf.mxu1  ;;  %7221 = vmatmul.mubr.msk.bf16.vlgmr.msra.gmra.mxu1 %vm421_vm1, %v7372_v0 }
 0x21b   : > { %v9106_v30 = vadd.f32 %v2855_v39, %v8998_v52  ;;  %v3057_v59 = vmul.f32 %v2960_v56, %v8963_v62  ;;  %5836 = vmatpush1.bf16.msra.mxu1 %v8927_v9  ;;  %5921 = vmatprep.subr.bf16.mxu0 %v8857_v23  ;;  %v2919_v11 = vpop.f32.mrf.mxu0 }
 0x21c   : > { %v9112_v40 = vadd.f32 %v3055_v38, %v9004_v31  ;;  %v3056_v8 = vmul.f32 %v2919_v11, %v8975_v48  ;;  %5964 = vmatprep.subr.bf16.mxu1 %v8915_v16  ;;  %v2962_v58 = vpop.f32.mrf.mxu1  ;;  %5810 = vmatprep.mubr.bf16.mxu0 %v7448_v20 }
 0x21d   : > { %v9118_v52 = vadd.f32 %v3057_v59, %v9010_v13  ;;  %v3058_v6 = vmul.f32 %v2962_v58, %v8989_v27  ;;  %v2921_v28 = vpop.f32.mrf.mxu0  ;;  %5853 = vmatprep.mubr.bf16.mxu1 %v7448_v20 }
 0x21e   : > { %v9123_v23 = vadd.f32 %v3056_v8, %v9015_v21  ;;  %v3063_v31 = vmul.f32 %v2921_v28, %v8955_v7  ;;  %v2964_v54 = vpop.f32.mrf.mxu1 }
 0x21f   : > { %v9129_v16 = vadd.f32 %v3058_v6, %v9023_v42  ;;  %v3065_v61 = vmul.f32 %v2964_v54, %v8963_v62  ;;  %v2923_v13 = vpop.f32.mrf.mxu0  ;;  %v6846_v6 = vld [vmem:[%s9868_s2 + $0x8] sm:$0xff] }
 0x220   : > { %v9135_v33 = vadd.f32 %v3063_v31, %v9031_v12  ;;  %v3064_v15 = vmul.f32 %v2923_v13, %v8975_v48  ;;  %v2966_v21 = vpop.f32.mrf.mxu1  ;;  %6854 = vperm.xlu1 %7334, %v6846_v6  }
 0x221   : > { %v9139_v41 = vadd.f32 %v3065_v61, %v9039_v46  ;;  %v3066_v55 = vmul.f32 %v2966_v21, %v8989_v27  ;;  %v3003_v39 = vpop.f32.mrf.mxu0  ;;  %7222 = vmatmul.mubr.msk.bf16.vlgmr.msra.gmra.mxu0 %vm421_vm1, %v7372_v0  ;;  %v6845_v46 = vld [vmem:[%s9868_s2] sm:$0xff] }
 0x222   : > { %v9144_v42 = vadd.f32 %v3064_v15, %v9050_v24  ;;  %v3059_v44 = vmul.f32 %v3003_v39, %v9020_v2  ;;  %5922 = vmatpush1.bf16.msra.mxu0 %v8897_v29  ;;  %v3046_v12 = vpop.f32.mrf.mxu1  ;;  %7223 = vmatmul.mubr.msk.bf16.vlgmr.msra.gmra.mxu1 %vm421_vm1, %v7372_v0  ;;  %v5419_v29 = vsel %vm5397_vm7, %v9047_v10, %v8820_v18  ;;  %v9175_v18 = vld [vmem:[%s9867_s1 + $0xc8] sm:$0xff]   ;;  %v9178_v10 = vpop.permute.xlu0 %6111 }
 0x223   : > { %v9153_v38 = vadd.f32 %v3066_v55, %v9056_v45  ;;  %v3061_v56 = vmul.f32 %v3046_v12, %v9028_v50  ;;  %5965 = vmatpush1.bf16.msra.mxu1 %v8980_v37  ;;  %6007 = vmatprep.subr.bf16.mxu0 %v8927_v9  ;;  %v3005_v24 = vpop.f32.mrf.mxu0  ;;  %v9165_v45 = vpop.permute.xlu1 %6119  ;;  %v9198_v15 = vsel %vm6131_vm8, %v9097_v49, %v9126_v26 }
 0x224   : > { %v9162_v0 = vadd.f32 %v3059_v44, %v9067_v4  ;;  %v3060_v59 = vmul.f32 %v3005_v24, %v9036_v35  ;;  %6050 = vmatprep.subr.bf16.mxu1 %v5419_v29  ;;  %v3048_v11 = vpop.f32.mrf.mxu1  ;;  %5939 = vmatprep.mubr.bf16.mxu0 %v7448_v20 }
 0x225   : > { %v9169_v37 = vadd.f32 %v3061_v56, %v9073_v17  ;;  %v3062_v9 = vmul.f32 %v3048_v11, %v9045_v3  ;;  %v3007_v8 = vpop.f32.mrf.mxu0  ;;  %5982 = vmatprep.mubr.bf16.mxu1 %v7448_v20  ;;  %6849 = vperm.xlu0 %7333, %v6845_v46  }
 0x226   : > { %v9181_v4 = vadd.f32 %v3060_v59, %v9081_v36  ;;  %v3067_v17 = vmul.f32 %v3007_v8, %v9020_v2  ;;  %v3050_v58 = vpop.f32.mrf.mxu1  ;;  %v9206_v39 = vpop.permute.xlu0 %6123 }
 0x227   : > { %v9188_v28 = vadd.f32 %v3062_v9, %v9085_v14  ;;  %v3069_v31 = vmul.f32 %v3050_v58, %v9028_v50  ;;  %v3009_v54 = vpop.f32.mrf.mxu0  ;;  %v6122_v24 = vpop.permute.xlu1 %6121 }
 0x228   : > { %v9192_v61 = vadd.f32 %v3067_v17, %v9089_v60  ;;  %v3068_v36 = vmul.f32 %v3009_v54, %v9036_v35  ;;  %v3052_v13 = vpop.f32.mrf.mxu1 }
 0x229   : > { %v9201_v21 = vadd.f32 %v3069_v31, %v9093_v22  ;;  %v3070_v14 = vmul.f32 %v3052_v13, %v9045_v3  ;;  %v3132_v55 = vpop.f32.mrf.mxu0  ;;  %7227 = vmatmul.mubr.msk.bf16.vlgmr.msra.gmra.mxu0 %vm421_vm1, %v9175_v18  ;;  %v9218_v22 = vsel %vm6131_vm8, %v9132_v5, %v9165_v45 }
 0x22a   : > { %v9209_v60 = vadd.f32 %v3068_v36, %v9100_v63  ;;  %v3270_v44 = vmul.f32 %v3132_v55, %v8955_v7  ;;  %6008 = vmatpush1.bf16.msra.mxu0 %v8967_v53  ;;  %v3175_v12 = vpop.f32.mrf.mxu1  ;;  %7228 = vmatmul.mubr.msk.bf16.vlgmr.msra.gmra.mxu1 %vm421_vm1, %v9175_v18  ;;  %v9236_v31 = vpop.permute.xlu0 %6127 }
 0x22b   : > { %v9221_v46 = vadd.f32 %v3070_v14, %v9106_v30  ;;  %v3272_v56 = vmul.f32 %v3175_v12, %v8963_v62  ;;  %6051 = vmatpush1.bf16.msra.mxu1 %v9064_v1  ;;  %v3134_v63 = vpop.f32.mrf.mxu0  ;;  %6184 = vmatprep.subr.bf16.mxu0 %v9198_v15 }
 0x22c   : > { %v3271_v53 = vmul.f32 %v3134_v63, %v8975_v48  ;;  %v3177_v29 = vpop.f32.mrf.mxu1  ;;  %6025 = vmatprep.mubr.bf16.mxu0 %v7448_v20  ;;  %6068 = vmatprep.mubr.bf16.mxu1 %v7448_v20  ;;  %v3286_v59 = vadd.f32 %v3270_v44, %v9112_v40  ;;  %v9242_v40 = vsel %vm6131_vm8, %v9126_v26, %v9132_v5  ;;  %v7374_v63 = vld [vmem:[%s9867_s1 + $0x40] sm:$0xff]  }
 0x22d   : > { %v3273_v30 = vmul.f32 %v3177_v29, %v8989_v27  ;;  %v3136_v11 = vpop.f32.mrf.mxu0  ;;  %6227 = vmatprep.subr.bf16.mxu1 %v9218_v22  ;;  %v3288_v1 = vadd.f32 %v3272_v56, %v9118_v52  ;;  %v9254_v26 = vsel %vm6131_vm8, %v6122_v24, %v9206_v39 }
 0x22e   : > { %v3278_v9 = vmul.f32 %v3136_v11, %v8955_v7  ;;  %v3179_v8 = vpop.f32.mrf.mxu1  ;;  %v3287_v17 = vadd.f32 %v3271_v53, %v9123_v23  ;;  %v6132_v23 = vsel %vm6131_vm8, %v9178_v10, %v9097_v49 }
 0x22f   : > { %v3280_v58 = vmul.f32 %v3179_v8, %v8963_v62  ;;  %v3138_v6 = vpop.f32.mrf.mxu0  ;;  %v3289_v54 = vadd.f32 %v3273_v30, %v9129_v16  ;;  %v6126_v62 = vpop.permute.xlu1 %6125 }
 0x230   : > { %v3279_v36 = vmul.f32 %v3138_v6, %v8975_v48  ;;  %v3181_v52 = vpop.f32.mrf.mxu1  ;;  %v3294_v7 = vadd.f32 %v3278_v9, %v9135_v33  ;;  %v9285_v8 = vsel %vm6131_vm8, %v9206_v39, %v6126_v62 }
 0x231   : > { %v3281_v13 = vmul.f32 %v3181_v52, %v8989_v27  ;;  %v3218_v14 = vpop.f32.mrf.mxu0  ;;  %7229 = vmatmul.mubr.msk.bf16.vlgmr.msra.gmra.mxu0 %vm421_vm1, %v9175_v18  ;;  %v3296_v48 = vadd.f32 %v3280_v58, %v9139_v41  ;;  %v9262_v27 = vsel %vm6131_vm8, %v6126_v62, %v9236_v31 }
 0x232   : > { %v3274_v16 = vmul.f32 %v3218_v14, %v9020_v2  ;;  %6185 = vmatpush1.bf16.msra.mxu0 %v6132_v23  ;;  %v3261_v5 = vpop.f32.mrf.mxu1  ;;  %7230 = vmatmul.mubr.msk.bf16.vlgmr.msra.gmra.mxu1 %vm421_vm1, %v9175_v18  ;;  %v3295_v49 = vadd.f32 %v3279_v36, %v9144_v42 }
 0x233   : > { %v3276_v33 = vmul.f32 %v3261_v5, %v9028_v50  ;;  %6228 = vmatpush1.bf16.msra.mxu1 %v9242_v40  ;;  %v3220_v55 = vpop.f32.mrf.mxu0  ;;  %6202 = vmatprep.mubr.bf16.mxu0 %v7448_v20  ;;  %v3297_v41 = vadd.f32 %v3281_v13, %v9153_v38 }
 0x234   : > { %v3275_v44 = vmul.f32 %v3220_v55, %v9036_v35  ;;  %v3263_v12 = vpop.f32.mrf.mxu1  ;;  %6270 = vmatprep.subr.bf16.mxu0 %v9254_v26  ;;  %6245 = vmatprep.mubr.bf16.mxu1 %v7448_v20  ;;  %v3290_v18 = vadd.f32 %v3274_v16, %v9162_v0 }
 0x235   : > { %v3277_v42 = vmul.f32 %v3263_v12, %v9045_v3  ;;  %v3222_v56 = vpop.f32.mrf.mxu0  ;;  %6313 = vmatprep.subr.bf16.mxu1 %v9262_v27  ;;  %v3292_v38 = vadd.f32 %v3276_v33, %v9169_v37 }
 0x236   : > { %v3282_v53 = vmul.f32 %v3222_v56, %v9020_v2  ;;  %v3265_v29 = vpop.f32.mrf.mxu1  ;;  %v3291_v30 = vadd.f32 %v3275_v44, %v9181_v4  ;;  %v9291_v2 = vsel %vm6131_vm8, %v9165_v45, %v6122_v24  ;;  %v7375_v44 = vld [vmem:[%s9867_s1 + $0x88] sm:$0xff]  }
 0x237   : > { %v3284_v11 = vmul.f32 %v3265_v29, %v9028_v50  ;;  %v3224_v9 = vpop.f32.mrf.mxu0  ;;  %v3293_v0 = vadd.f32 %v3277_v42, %v9188_v28 }
 0x238   : > { %v3283_v58 = vmul.f32 %v3224_v9, %v9036_v35  ;;  %v3267_v6 = vpop.f32.mrf.mxu1  ;;  %v3298_v36 = vadd.f32 %v3282_v53, %v9192_v61 }
 0x239   : > { %v3285_v37 = vmul.f32 %v3267_v6, %v9045_v3  ;;  %v3355_v4 = vpop.f32.mrf.mxu0  ;;  %7236 = vmatmul.mubr.msk.bf16.vlgmr.msra.gmra.mxu0 %vm421_vm1, %v7374_v63  ;;  %v3300_v50 = vadd.f32 %v3284_v11, %v9201_v21 }
 0x23a   : > { %v3493_v28 = vadd.f32 %v3355_v4, %v3286_v59  ;;  %6271 = vmatpush1.bf16.msra.mxu0 %v9291_v2  ;;  %v3398_v39 = vpop.f32.mrf.mxu1  ;;  %7237 = vmatmul.mubr.msk.bf16.vlgmr.msra.gmra.mxu1 %vm421_vm1, %v7374_v63  ;;  %v3299_v35 = vadd.f32 %v3283_v58, %v9209_v60 }
 0x23b   : > { %v3495_v61 = vadd.f32 %v3398_v39, %v3288_v1  ;;  %6314 = vmatpush1.bf16.msra.mxu1 %v9285_v8  ;;  %6440 = vmatprep.subr.bf16.mxu0 %v9242_v40  ;;  %v3357_v45 = vpop.f32.mrf.mxu0  ;;  %v3301_v3 = vadd.f32 %v3285_v37, %v9221_v46  ;;  %v6130_v46 = vpop.permute.xlu1 %6129 }
 0x23c   : > { %v3494_v24 = vadd.f32 %v3357_v45, %v3287_v17  ;;  %6483 = vmatprep.subr.bf16.mxu1 %v9291_v2  ;;  %v3400_v21 = vpop.f32.mrf.mxu1  ;;  %6288 = vmatprep.mubr.bf16.mxu0 %v7448_v20 }
 0x23d   : > { %v3496_v59 = vadd.f32 %v3400_v21, %v3289_v54  ;;  %v3359_v52 = vpop.f32.mrf.mxu0  ;;  %6331 = vmatprep.mubr.bf16.mxu1 %v7448_v20  ;;  %v6153_v21 = vsel %vm6131_vm8, %v6130_v46, %v9178_v10 }
 0x23e   : > { %v3501_v23 = vadd.f32 %v3359_v52, %v3294_v7  ;;  %v3402_v60 = vpop.f32.mrf.mxu1 }
 0x23f   : > { %v3503_v1 = vadd.f32 %v3402_v60, %v3296_v48  ;;  %v3361_v62 = vpop.f32.mrf.mxu0  ;;  %v9312_v48 = vsel %vm6131_vm8, %v9236_v31, %v6130_v46 }
 0x240   : > { %v3502_v13 = vadd.f32 %v3361_v62, %v3295_v49  ;;  %v3404_v14 = vpop.f32.mrf.mxu1 }
 0x241   : > { %v3504_v16 = vadd.f32 %v3404_v14, %v3297_v41  ;;  %v3441_v5 = vpop.f32.mrf.mxu0  ;;  %7238 = vmatmul.mubr.msk.bf16.vlgmr.msra.gmra.mxu0 %vm421_vm1, %v7374_v63 }
 0x242   : > { %v3497_v17 = vadd.f32 %v3441_v5, %v3290_v18  ;;  %6441 = vmatpush1.bf16.msra.mxu0 %v9198_v15  ;;  %v3484_v33 = vpop.f32.mrf.mxu1  ;;  %7239 = vmatmul.mubr.msk.bf16.vlgmr.msra.gmra.mxu1 %vm421_vm1, %v7374_v63 }
 0x243   : > { %v3499_v54 = vadd.f32 %v3484_v33, %v3292_v38  ;;  %6484 = vmatpush1.bf16.msra.mxu1 %v9218_v22  ;;  %6526 = vmatprep.subr.bf16.mxu0 %v9285_v8  ;;  %v3443_v7 = vpop.f32.mrf.mxu0 }
 0x244   : > { %v3498_v49 = vadd.f32 %v3443_v7, %v3291_v30  ;;  %6569 = vmatprep.subr.bf16.mxu1 %v9312_v48  ;;  %v3486_v55 = vpop.f32.mrf.mxu1  ;;  %6458 = vmatprep.mubr.bf16.mxu0 %v7448_v20 }
 0x245   : > { %v3500_v15 = vadd.f32 %v3486_v55, %v3293_v0  ;;  %v3445_v41 = vpop.f32.mrf.mxu0  ;;  %6501 = vmatprep.mubr.bf16.mxu1 %v7448_v20 }
 0x246   : > { %v3505_v12 = vadd.f32 %v3445_v41, %v3298_v36  ;;  %v3488_v18 = vpop.f32.mrf.mxu1 }
 0x247   : > { %v3507_v42 = vadd.f32 %v3488_v18, %v3300_v50  ;;  %v3447_v56 = vpop.f32.mrf.mxu0 }
 0x248   : > { %v3506_v31 = vadd.f32 %v3447_v56, %v3299_v35  ;;  %v3490_v63 = vpop.f32.mrf.mxu1 }
 0x249   : > { %v3508_v38 = vadd.f32 %v3490_v63, %v3301_v3  ;;  %v3555_v53 = vpop.f32.mrf.mxu0  ;;  %7243 = vmatmul.mubr.msk.bf16.vlgmr.msra.gmra.mxu0 %vm421_vm1, %v7375_v44 }
 0x24a   : > { %v3693_v29 = vadd.f32 %v3555_v53, %v3493_v28  ;;  %6527 = vmatpush1.bf16.msra.mxu0 %v9254_v26  ;;  %v3598_v30 = vpop.f32.mrf.mxu1  ;;  %7244 = vmatmul.mubr.msk.bf16.vlgmr.msra.gmra.mxu1 %vm421_vm1, %v7375_v44 }
 0x24b   : > { %v3695_v11 = vadd.f32 %v3598_v30, %v3495_v61  ;;  %6570 = vmatpush1.bf16.msra.mxu1 %v9262_v27  ;;  %6655 = vmatprep.subr.bf16.mxu0 %v9218_v22  ;;  %v3557_v9 = vpop.f32.mrf.mxu0 }
 0x24c   : > { %v3694_v0 = vadd.f32 %v3557_v9, %v3494_v24  ;;  %6698 = vmatprep.subr.bf16.mxu1 %v9254_v26  ;;  %v3600_v58 = vpop.f32.mrf.mxu1  ;;  %6544 = vmatprep.mubr.bf16.mxu0 %v7448_v20 }
 0x24d   : > { %v3696_v6 = vadd.f32 %v3600_v58, %v3496_v59  ;;  %v3559_v36 = vpop.f32.mrf.mxu0  ;;  %6587 = vmatprep.mubr.bf16.mxu1 %v7448_v20 }
 0x24e   : > { %v3701_v37 = vadd.f32 %v3559_v36, %v3501_v23  ;;  %v3602_v4 = vpop.f32.mrf.mxu1 }
 0x24f   : > { %v3703_v50 = vadd.f32 %v3602_v4, %v3503_v1  ;;  %v3561_v28 = vpop.f32.mrf.mxu0 }
 0x250   : > { %v3702_v39 = vadd.f32 %v3561_v28, %v3502_v13  ;;  %v3604_v35 = vpop.f32.mrf.mxu1 }
 0x251   : > { %v3704_v61 = vadd.f32 %v3604_v35, %v3504_v16  ;;  %v3641_v45 = vpop.f32.mrf.mxu0  ;;  %7245 = vmatmul.mubr.msk.bf16.vlgmr.msra.gmra.mxu0 %vm421_vm1, %v7375_v44 }
 0x252   : > { %v3697_v22 = vadd.f32 %v3641_v45, %v3497_v17  ;;  %6656 = vmatpush1.bf16.msra.mxu0 %v9242_v40  ;;  %v3684_v26 = vpop.f32.mrf.mxu1  ;;  %7246 = vmatmul.mubr.msk.bf16.vlgmr.msra.gmra.mxu1 %vm421_vm1, %v7375_v44  ;;  %v7376_v40 = vld [vmem:[%s9867_s1 + $0xd0] sm:$0xff]  }
 0x253   : > { %v3699_v3 = vadd.f32 %v3684_v26, %v3499_v54  ;;  %6699 = vmatpush1.bf16.msra.mxu1 %v9291_v2  ;;  %6741 = vmatprep.subr.bf16.mxu0 %v9262_v27  ;;  %v3643_v24 = vpop.f32.mrf.mxu0 }
 0x254   : > { %v3698_v59 = vadd.f32 %v3643_v24, %v3498_v49  ;;  %6784 = vmatprep.subr.bf16.mxu1 %v6153_v21  ;;  %v3686_v52 = vpop.f32.mrf.mxu1  ;;  %6673 = vmatprep.mubr.bf16.mxu0 %v7448_v20 }
 0x255   : > { %v3700_v23 = vadd.f32 %v3686_v52, %v3500_v15  ;;  %v3645_v60 = vpop.f32.mrf.mxu0  ;;  %6716 = vmatprep.mubr.bf16.mxu1 %v7448_v20 }
 0x256   : > { %v3705_v2 = vadd.f32 %v3645_v60, %v3505_v12  ;;  %v3688_v1 = vpop.f32.mrf.mxu1 }
 0x257   : > { %v3707_v27 = vadd.f32 %v3688_v1, %v3507_v42  ;;  %v3647_v62 = vpop.f32.mrf.mxu0 }
 0x258   : > { %v3706_v13 = vadd.f32 %v3647_v62, %v3506_v31  ;;  %v3690_v14 = vpop.f32.mrf.mxu1 }
 0x259   : > { %v3708_v10 = vadd.f32 %v3690_v14, %v3508_v38  ;;  %v3755_v16 = vpop.f32.mrf.mxu0  ;;  %7250 = vmatmul.mubr.msk.bf16.vlgmr.msra.gmra.mxu0 %vm421_vm1, %v7376_v40 }
 0x25a   : > { %v3893_v5 = vadd.f32 %v3755_v16, %v3693_v29  ;;  %6742 = vmatpush1.bf16.msra.mxu0 %v9285_v8  ;;  %v3798_v46 = vpop.f32.mrf.mxu1  ;;  %7251 = vmatmul.mubr.msk.bf16.vlgmr.msra.gmra.mxu1 %vm421_vm1, %v7376_v40  ;;  %v7162_v8 = vld [vmem:[%s9869_s3 + $0x5] ss:$8 sm:$0xf] }
 0x25b   : > { %v3895_v17 = vadd.f32 %v3798_v46, %v3695_v11  ;;  %6785 = vmatpush1.bf16.msra.mxu1 %v9312_v48  ;;  %v3757_v33 = vpop.f32.mrf.mxu0  ;;  %6759 = vmatprep.mubr.bf16.mxu0 %v7448_v20  ;;  %v7163_v48 = vld [vmem:[%s9869_s3 + $0x5] ss:$8 sm:$0xf0] }
 0x25c   : > { %v3894_v54 = vadd.f32 %v3757_v33, %v3694_v0  ;;  %v3800_v7 = vpop.f32.mrf.mxu1  ;;  %6802 = vmatprep.mubr.bf16.mxu1 %v7448_v20  ;;  %v3956_v38 = vor.u32 %v7163_v48, %v7162_v8 }
 0x25d   : > { %v3896_v49 = vadd.f32 %v3800_v7, %v3696_v6  ;;  %v3759_v55 = vpop.f32.mrf.mxu0 }
 0x25e   : > { %v3901_v15 = vadd.f32 %v3759_v55, %v3701_v37  ;;  %v3802_v41 = vpop.f32.mrf.mxu1  ;;  %v9355_v36 = vrot.slane %v3956_v38, %v7949_v25  ;;  %v9361_v35 = vrot.slane %v3956_v38, %v7961_v32  ;;  %v9380_v7 = vrot.slane %v3956_v38, %v8017_v51 }
 0x25f   : > { %v3903_v44 = vadd.f32 %v3802_v41, %v3703_v50  ;;  %v3761_v12 = vpop.f32.mrf.mxu0  ;;  %v9358_v50 = vrot.slane %v3956_v38, %v7955_v19 }
 0x260   : > { %v3902_v18 = vadd.f32 %v3761_v12, %v3702_v39  ;;  %v3804_v42 = vpop.f32.mrf.mxu1  ;;  %v9384_v12 = vrot.slane %v3956_v38, %v8026_v57 }
 0x261   : > { %v3904_v56 = vadd.f32 %v3804_v42, %v3704_v61  ;;  %v3841_v31 = vpop.f32.mrf.mxu0  ;;  %7252 = vmatmul.mubr.msk.bf16.vlgmr.msra.gmra.mxu0 %vm421_vm1, %v7376_v40 }
 0x262   : > { %v3897_v20 = vadd.f32 %v3841_v31, %v3697_v22  ;;  %v3884_v63 = vpop.f32.mrf.mxu1  ;;  %7253 = vmatmul.mubr.msk.bf16.vlgmr.msra.gmra.mxu1 %vm421_vm1, %v7376_v40  ;;  %v9364_v22 = vrot.slane %v3956_v38, %v7967_v34 }
 0x263   : > { %v3899_v53 = vadd.f32 %v3884_v63, %v3699_v3  ;;  %v3843_v29 = vpop.f32.mrf.mxu0 }
 0x264   : > { %v3898_v30 = vadd.f32 %v3843_v29, %v3698_v59  ;;  %v3886_v11 = vpop.f32.mrf.mxu1 }
 0x265   : > { %v3900_v9 = vadd.f32 %v3886_v11, %v3700_v23  ;;  %v3845_v0 = vpop.f32.mrf.mxu0 }
 0x266   : > { %v3905_v58 = vadd.f32 %v3845_v0, %v3705_v2  ;;  %v3888_v6 = vpop.f32.mrf.mxu1 }
 0x267   : > { %v3907_v37 = vadd.f32 %v3888_v6, %v3707_v27  ;;  %v3847_v4 = vpop.f32.mrf.mxu0 }
 0x268   : > { %v3906_v28 = vadd.f32 %v3847_v4, %v3706_v13  ;;  %v3890_v39 = vpop.f32.mrf.mxu1  ;;  %v9372_v13 = vrot.slane %v3956_v38, %v8004_v43 }
 0x269   : > { %v3908_v61 = vadd.f32 %v3890_v39, %v3708_v10  ;;  %v4002_v45 = vpop.f32.mrf.mxu0 }
 0x26a   : > { %v4181_v26 = vmul.f32 %v9355_v36, %v4002_v45  ;;  %v4045_v3 = vpop.f32.mrf.mxu1 }
 0x26b   : > { %v4183_v24 = vmul.f32 %v9358_v50, %v4045_v3  ;;  %v4004_v21 = vpop.f32.mrf.mxu0 }
 0x26c   : > { %v4197_v59 = vadd.f32 %v4181_v26, %v3893_v5  ;;  %v4182_v52 = vmul.f32 %v9361_v35, %v4004_v21  ;;  %v4047_v23 = vpop.f32.mrf.mxu1  ;;  %v9376_v5 = vrot.slane %v3956_v38, %v8011_v47 }
 0x26d   : > { %v4199_v60 = vadd.f32 %v4183_v24, %v3895_v17  ;;  %v4184_v40 = vmul.f32 %v9364_v22, %v4047_v23  ;;  %v4006_v2 = vpop.f32.mrf.mxu0 }
 0x26e   : > { %v4198_v1 = vadd.f32 %v4182_v52, %v3894_v54  ;;  %v4189_v27 = vmul.f32 %v9355_v36, %v4006_v2  ;;  %v4049_v62 = vpop.f32.mrf.mxu1 }
 0x26f   : > { %v4200_v14 = vadd.f32 %v4184_v40, %v3896_v49  ;;  %v4191_v10 = vmul.f32 %v9358_v50, %v4049_v62  ;;  %v4008_v16 = vpop.f32.mrf.mxu0 }
 0x270   : > { %v4205_v46 = vadd.f32 %v4189_v27, %v3901_v15  ;;  %v4190_v17 = vmul.f32 %v9361_v35, %v4008_v16  ;;  %v4051_v33 = vpop.f32.mrf.mxu1 }
 0x271   : > { %v4207_v54 = vadd.f32 %v4191_v10, %v3903_v44  ;;  %v4192_v55 = vmul.f32 %v9364_v22, %v4051_v33  ;;  %v4088_v41 = vpop.f32.mrf.mxu0 }
 0x272   : > { %v4206_v49 = vadd.f32 %v4190_v17, %v3902_v18  ;;  %v4185_v8 = vmul.f32 %v9372_v13, %v4088_v41  ;;  %v4131_v48 = vpop.f32.mrf.mxu1 }
 0x273   : > { %v4208_v42 = vadd.f32 %v4192_v55, %v3904_v56  ;;  %v4187_v15 = vmul.f32 %v9376_v5, %v4131_v48  ;;  %v4090_v31 = vpop.f32.mrf.mxu0 }
 0x274   : > { %v4201_v63 = vadd.f32 %v4185_v8, %v3897_v20  ;;  %v4186_v29 = vmul.f32 %v9380_v7, %v4090_v31  ;;  %v4133_v11 = vpop.f32.mrf.mxu1 }
 0x275   : > { %v4203_v0 = vadd.f32 %v4187_v15, %v3899_v53  ;;  %v4188_v44 = vmul.f32 %v9384_v12, %v4133_v11  ;;  %v4092_v6 = vpop.f32.mrf.mxu0 }
 0x276   : > { %v4202_v4 = vadd.f32 %v4186_v29, %v3898_v30  ;;  %v4193_v38 = vmul.f32 %v9372_v13, %v4092_v6  ;;  %v4135_v39 = vpop.f32.mrf.mxu1 }
 0x277   : > { %v4204_v18 = vadd.f32 %v4188_v44, %v3900_v9  ;;  %v4195_v45 = vmul.f32 %v9376_v5, %v4135_v39  ;;  %v4094_v26 = vpop.f32.mrf.mxu0 }
 0x278   : > { %v4209_v56 = vadd.f32 %v4193_v38, %v3905_v58  ;;  %v4194_v3 = vmul.f32 %v9380_v7, %v4094_v26  ;;  %v4137_v24 = vpop.f32.mrf.mxu1 }
 0x279   : > { %v4211_v20 = vadd.f32 %v4195_v45, %v3907_v37  ;;  %v4196_v21 = vmul.f32 %v9384_v12, %v4137_v24  ;;  %v4258_v52 = vpop.f32.mrf.mxu0 }
 0x27a   : > { %v4210_v53 = vadd.f32 %v4194_v3, %v3906_v28  ;;  %v4396_v23 = vmul.f32 %v4258_v52, %v9355_v36  ;;  %v4301_v40 = vpop.f32.mrf.mxu1 }
 0x27b   : > { %v4212_v30 = vadd.f32 %v4196_v21, %v3908_v61  ;;  %v4398_v2 = vmul.f32 %v4301_v40, %v9358_v50  ;;  %v4260_v27 = vpop.f32.mrf.mxu0 }
 0x27c   : > { %v4412_v9 = vadd.f32 %v4396_v23, %v4197_v59  ;;  %v4397_v62 = vmul.f32 %v4260_v27, %v9361_v35  ;;  %v4303_v10 = vpop.f32.mrf.mxu1 }
 0x27d   : > { %v4414_v58 = vadd.f32 %v4398_v2, %v4199_v60  ;;  %v4399_v16 = vmul.f32 %v4303_v10, %v9364_v22  ;;  %v4262_v17 = vpop.f32.mrf.mxu0 }
 0x27e   : > { %v4413_v37 = vadd.f32 %v4397_v62, %v4198_v1  ;;  %v4404_v33 = vmul.f32 %v4262_v17, %v9355_v36  ;;  %v4305_v55 = vpop.f32.mrf.mxu1 }
 0x27f   : > { %v4415_v28 = vadd.f32 %v4399_v16, %v4200_v14  ;;  %v4406_v41 = vmul.f32 %v4305_v55, %v9358_v50  ;;  %v4264_v8 = vpop.f32.mrf.mxu0 }
 0x280   : > { %v4420_v61 = vadd.f32 %v4404_v33, %v4205_v46  ;;  %v4405_v48 = vmul.f32 %v4264_v8, %v9361_v35  ;;  %v4307_v15 = vpop.f32.mrf.mxu1 }
 0x281   : > { %v4422_v59 = vadd.f32 %v4406_v41, %v4207_v54  ;;  %v4407_v31 = vmul.f32 %v4307_v15, %v9364_v22  ;;  %v4344_v29 = vpop.f32.mrf.mxu0 }
 0x282   : > { %v4421_v60 = vadd.f32 %v4405_v48, %v4206_v49  ;;  %v4400_v11 = vmul.f32 %v4344_v29, %v9372_v13  ;;  %v4387_v44 = vpop.f32.mrf.mxu1 }
 0x283   : > { %v4423_v1 = vadd.f32 %v4407_v31, %v4208_v42  ;;  %v4402_v6 = vmul.f32 %v4387_v44, %v9376_v5  ;;  %v4346_v38 = vpop.f32.mrf.mxu0 }
 0x284   : > { %v4416_v14 = vadd.f32 %v4400_v11, %v4201_v63  ;;  %v4401_v39 = vmul.f32 %v4346_v38, %v9380_v7  ;;  %v4389_v45 = vpop.f32.mrf.mxu1 }
 0x285   : > { %v4418_v46 = vadd.f32 %v4402_v6, %v4203_v0  ;;  %v4403_v26 = vmul.f32 %v4389_v45, %v9384_v12  ;;  %v4348_v3 = vpop.f32.mrf.mxu0 }
 0x286   : > { %v4417_v54 = vadd.f32 %v4401_v39, %v4202_v4  ;;  %v4408_v24 = vmul.f32 %v4348_v3, %v9372_v13  ;;  %v4391_v21 = vpop.f32.mrf.mxu1 }
 0x287   : > { %v4419_v49 = vadd.f32 %v4403_v26, %v4204_v18  ;;  %v4410_v52 = vmul.f32 %v4391_v21, %v9376_v5  ;;  %v4350_v23 = vpop.f32.mrf.mxu0 }
 0x288   : > { %v4424_v42 = vadd.f32 %v4408_v24, %v4209_v56  ;;  %v4409_v40 = vmul.f32 %v4350_v23, %v9380_v7  ;;  %v4393_v2 = vpop.f32.mrf.mxu1 }
 0x289   : > { %v4426_v63 = vadd.f32 %v4410_v52, %v4211_v20  ;;  %v4411_v27 = vmul.f32 %v4393_v2, %v9384_v12  ;;  %v4473_v62 = vpop.f32.mrf.mxu0 }
 0x28a   : > { %v4425_v0 = vadd.f32 %v4409_v40, %v4210_v53  ;;  %v4611_v10 = vmul.f32 %v4473_v62, %v9355_v36  ;;  %v4516_v16 = vpop.f32.mrf.mxu1 }
 0x28b   : > { %v4427_v4 = vadd.f32 %v4411_v27, %v4212_v30  ;;  %v4613_v17 = vmul.f32 %v4516_v16, %v9358_v50  ;;  %v4475_v33 = vpop.f32.mrf.mxu0  ;;  %v7185_v30 = vld [vmem:[%s9869_s3 + $0x6] ss:$8 sm:$0xf] }
 0x28c   : > { %v4627_v18 = vadd.f32 %v4611_v10, %v4412_v9  ;;  %v4612_v55 = vmul.f32 %v4475_v33, %v9361_v35  ;;  %v4518_v41 = vpop.f32.mrf.mxu1  ;;  %v7186_v9 = vld [vmem:[%s9869_s3 + $0x6] ss:$8 sm:$0xf0] }
 0x28d   : > { %v4629_v56 = vadd.f32 %v4613_v17, %v4414_v58  ;;  %v4614_v8 = vmul.f32 %v4518_v41, %v9364_v22  ;;  %v4477_v48 = vpop.f32.mrf.mxu0  ;;  %v4690_v45 = vor.u32 %v7186_v9, %v7185_v30 }
 0x28e   : > { %v4628_v20 = vadd.f32 %v4612_v55, %v4413_v37  ;;  %v4619_v15 = vmul.f32 %v4477_v48, %v9355_v36  ;;  %v4520_v31 = vpop.f32.mrf.mxu1 }
 0x28f   : > { %v4630_v53 = vadd.f32 %v4614_v8, %v4415_v28  ;;  %v4621_v29 = vmul.f32 %v4520_v31, %v9358_v50  ;;  %v4479_v11 = vpop.f32.mrf.mxu0  ;;  %v9430_v2 = vrot.slane %v4690_v45, %v7949_v25  ;;  %v9438_v17 = vrot.slane %v4690_v45, %v7961_v32 }
 0x290   : > { %v4635_v58 = vadd.f32 %v4619_v15, %v4420_v61  ;;  %v4620_v44 = vmul.f32 %v4479_v11, %v9361_v35  ;;  %v4522_v6 = vpop.f32.mrf.mxu1  ;;  %v9442_v55 = vrot.slane %v4690_v45, %v7967_v34 }
 0x291   : > { %v4637_v37 = vadd.f32 %v4621_v29, %v4422_v59  ;;  %v4622_v36 = vmul.f32 %v4522_v6, %v9364_v22  ;;  %v4559_v38 = vpop.f32.mrf.mxu0 }
 0x292   : > { %v4636_v28 = vadd.f32 %v4620_v44, %v4421_v60  ;;  %v4615_v50 = vmul.f32 %v4559_v38, %v9372_v13  ;;  %v4602_v39 = vpop.f32.mrf.mxu1 }
 0x293   : > { %v4638_v26 = vadd.f32 %v4622_v36, %v4423_v1  ;;  %v4617_v3 = vmul.f32 %v4602_v39, %v9376_v5  ;;  %v4561_v24 = vpop.f32.mrf.mxu0 }
 0x294   : > { %v4631_v21 = vadd.f32 %v4615_v50, %v4416_v14  ;;  %v4616_v52 = vmul.f32 %v4561_v24, %v9380_v7  ;;  %v4604_v61 = vpop.f32.mrf.mxu1  ;;  %v9434_v14 = vrot.slane %v4690_v45, %v7955_v19  ;;  %v9458_v50 = vrot.slane %v4690_v45, %v8017_v51 }
 0x295   : > { %v4633_v23 = vadd.f32 %v4617_v3, %v4418_v46  ;;  %v4618_v35 = vmul.f32 %v4604_v61, %v9384_v12  ;;  %v4563_v59 = vpop.f32.mrf.mxu0  ;;  %v9462_v24 = vrot.slane %v4690_v45, %v8026_v57 }
 0x296   : > { %v4632_v40 = vadd.f32 %v4616_v52, %v4417_v54  ;;  %v4623_v22 = vmul.f32 %v4563_v59, %v9372_v13  ;;  %v4606_v60 = vpop.f32.mrf.mxu1 }
 0x297   : > { %v4634_v27 = vadd.f32 %v4618_v35, %v4419_v49  ;;  %v4625_v1 = vmul.f32 %v4606_v60, %v9376_v5  ;;  %v4565_v62 = vpop.f32.mrf.mxu0 }
 0x298   : > { %v4639_v10 = vadd.f32 %v4623_v22, %v4424_v42  ;;  %v4624_v46 = vmul.f32 %v4565_v62, %v9380_v7  ;;  %v4608_v16 = vpop.f32.mrf.mxu1 }
 0x299   : > { %v4641_v54 = vadd.f32 %v4625_v1, %v4426_v63  ;;  %v4626_v13 = vmul.f32 %v4608_v16, %v9384_v12  ;;  %v4736_v33 = vpop.f32.mrf.mxu0 }
 0x29a   : > { %v4640_v49 = vadd.f32 %v4624_v46, %v4425_v0  ;;  %v4915_v5 = vmul.f32 %v9430_v2, %v4736_v33  ;;  %v4779_v41 = vpop.f32.mrf.mxu1  ;;  %v9450_v0 = vrot.slane %v4690_v45, %v8004_v43 }
 0x29b   : > { %v4642_v8 = vadd.f32 %v4626_v13, %v4427_v4  ;;  %v4917_v42 = vmul.f32 %v9434_v14, %v4779_v41  ;;  %v4738_v48 = vpop.f32.mrf.mxu0 }
 0x29c   : > { %v4931_v7 = vadd.f32 %v4915_v5, %v4627_v18  ;;  %v4916_v15 = vmul.f32 %v9438_v17, %v4738_v48  ;;  %v4781_v31 = vpop.f32.mrf.mxu1  ;;  %v9454_v18 = vrot.slane %v4690_v45, %v8011_v47 }
 0x29d   : > { %v4933_v29 = vadd.f32 %v4917_v42, %v4629_v56  ;;  %v4918_v63 = vmul.f32 %v9442_v55, %v4781_v31  ;;  %v4740_v12 = vpop.f32.mrf.mxu0 }
 0x29e   : > { %v4932_v11 = vadd.f32 %v4916_v15, %v4628_v20  ;;  %v4923_v30 = vmul.f32 %v9430_v2, %v4740_v12  ;;  %v4783_v9 = vpop.f32.mrf.mxu1 }
 0x29f   : > { %v4934_v44 = vadd.f32 %v4918_v63, %v4630_v53  ;;  %v4925_v4 = vmul.f32 %v9434_v14, %v4783_v9  ;;  %v4742_v6 = vpop.f32.mrf.mxu0 }
 0x2a0   : > { %v4939_v36 = vadd.f32 %v4923_v30, %v4635_v58  ;;  %v4924_v56 = vmul.f32 %v9438_v17, %v4742_v6  ;;  %v4785_v38 = vpop.f32.mrf.mxu1 }
 0x2a1   : > { %v4941_v20 = vadd.f32 %v4925_v4, %v4637_v37  ;;  %v4926_v39 = vmul.f32 %v9442_v55, %v4785_v38  ;;  %v4822_v3 = vpop.f32.mrf.mxu0 }
 0x2a2   : > { %v4940_v53 = vadd.f32 %v4924_v56, %v4636_v28  ;;  %v4919_v52 = vmul.f32 %v9450_v0, %v4822_v3  ;;  %v4865_v61 = vpop.f32.mrf.mxu1 }
 0x2a3   : > { %v4942_v35 = vadd.f32 %v4926_v39, %v4638_v26  ;;  %v4921_v58 = vmul.f32 %v9454_v18, %v4865_v61  ;;  %v4824_v59 = vpop.f32.mrf.mxu0 }
 0x2a4   : > { %v4935_v22 = vadd.f32 %v4919_v52, %v4631_v21  ;;  %v4920_v60 = vmul.f32 %v9458_v50, %v4824_v59  ;;  %v4867_v1 = vpop.f32.mrf.mxu1 }
 0x2a5   : > { %v4937_v62 = vadd.f32 %v4921_v58, %v4633_v23  ;;  %v4922_v37 = vmul.f32 %v9462_v24, %v4867_v1  ;;  %v4826_v46 = vpop.f32.mrf.mxu0 }
 0x2a6   : > { %v4936_v16 = vadd.f32 %v4920_v60, %v4632_v40  ;;  %v4927_v45 = vmul.f32 %v9450_v0, %v4826_v46  ;;  %v4869_v13 = vpop.f32.mrf.mxu1 }
 0x2a7   : > { %v4938_v28 = vadd.f32 %v4922_v37, %v4634_v27  ;;  %v4929_v33 = vmul.f32 %v9454_v18, %v4869_v13  ;;  %v4828_v5 = vpop.f32.mrf.mxu0 }
 0x2a8   : > { %v4943_v26 = vadd.f32 %v4927_v45, %v4639_v10  ;;  %v4928_v41 = vmul.f32 %v9458_v50, %v4828_v5  ;;  %v4871_v42 = vpop.f32.mrf.mxu1 }
 0x2a9   : > { %v4945_v21 = vadd.f32 %v4929_v33, %v4641_v54  ;;  %v4930_v48 = vmul.f32 %v9462_v24, %v4871_v42  ;;  %v4992_v15 = vpop.f32.mrf.mxu0 }
 0x2aa   : > { %v4944_v23 = vadd.f32 %v4928_v41, %v4640_v49  ;;  %v5130_v31 = vmul.f32 %v4992_v15, %v9430_v2  ;;  %v5035_v63 = vpop.f32.mrf.mxu1 }
 0x2ab   : > { %v4946_v40 = vadd.f32 %v4930_v48, %v4642_v8  ;;  %v5132_v12 = vmul.f32 %v5035_v63, %v9434_v14  ;;  %v4994_v30 = vpop.f32.mrf.mxu0 }
 0x2ac   : > { %v5146_v27 = vadd.f32 %v5130_v31, %v4931_v7  ;;  %v5131_v9 = vmul.f32 %v4994_v30, %v9438_v17  ;;  %v5037_v4 = vpop.f32.mrf.mxu1 }
 0x2ad   : > { %v5148_v10 = vadd.f32 %v5132_v12, %v4933_v29  ;;  %v5133_v6 = vmul.f32 %v5037_v4, %v9442_v55  ;;  %v4996_v56 = vpop.f32.mrf.mxu0 }
 0x2ae   : > { %v5147_v54 = vadd.f32 %v5131_v9, %v4932_v11  ;;  %v5138_v38 = vmul.f32 %v4996_v56, %v9430_v2  ;;  %v5039_v39 = vpop.f32.mrf.mxu1 }
 0x2af   : > { %v5149_v49 = vadd.f32 %v5133_v6, %v4934_v44  ;;  %v5140_v3 = vmul.f32 %v5039_v39, %v9434_v14  ;;  %v4998_v52 = vpop.f32.mrf.mxu0 }
 0x2b0   : > { %v5154_v8 = vadd.f32 %v5138_v38, %v4939_v36  ;;  %v5139_v61 = vmul.f32 %v4998_v52, %v9438_v17  ;;  %v5041_v58 = vpop.f32.mrf.mxu1 }
 0x2b1   : > { %v5156_v7 = vadd.f32 %v5140_v3, %v4941_v20  ;;  %v5141_v59 = vmul.f32 %v5041_v58, %v9442_v55  ;;  %v5078_v60 = vpop.f32.mrf.mxu0 }
 0x2b2   : > { %v5155_v29 = vadd.f32 %v5139_v61, %v4940_v53  ;;  %v5134_v1 = vmul.f32 %v5078_v60, %v9450_v0  ;;  %v5121_v37 = vpop.f32.mrf.mxu1 }
 0x2b3   : > { %v5157_v11 = vadd.f32 %v5141_v59, %v4942_v35  ;;  %v5136_v46 = vmul.f32 %v5121_v37, %v9454_v18  ;;  %v5080_v45 = vpop.f32.mrf.mxu0 }
 0x2b4   : > { %v5150_v44 = vadd.f32 %v5134_v1, %v4935_v22  ;;  %v5135_v13 = vmul.f32 %v5080_v45, %v9458_v50  ;;  %v5123_v33 = vpop.f32.mrf.mxu1 }
 0x2b5   : > { %v5152_v36 = vadd.f32 %v5136_v46, %v4937_v62  ;;  %v5137_v5 = vmul.f32 %v5123_v33, %v9462_v24  ;;  %v5082_v41 = vpop.f32.mrf.mxu0 }
 0x2b6   : > { %v5151_v20 = vadd.f32 %v5135_v13, %v4936_v16  ;;  %v5142_v42 = vmul.f32 %v5082_v41, %v9450_v0  ;;  %v5125_v48 = vpop.f32.mrf.mxu1 }
 0x2b7   : > { %v5153_v53 = vadd.f32 %v5137_v5, %v4938_v28  ;;  %v5144_v15 = vmul.f32 %v5125_v48, %v9454_v18  ;;  %v5084_v31 = vpop.f32.mrf.mxu0 }
 0x2b8   : > { %v5158_v35 = vadd.f32 %v5142_v42, %v4943_v26  ;;  %v5143_v63 = vmul.f32 %v5084_v31, %v9458_v50  ;;  %v5127_v12 = vpop.f32.mrf.mxu1 }
 0x2b9   : > { %v5160_v22 = vadd.f32 %v5144_v15, %v4945_v21  ;;  %v5145_v30 = vmul.f32 %v5127_v12, %v9462_v24  ;;  %v5207_v9 = vpop.f32.mrf.mxu0 }
 0x2ba   : > { %v5159_v62 = vadd.f32 %v5143_v63, %v4944_v23  ;;  %v5345_v4 = vmul.f32 %v5207_v9, %v9430_v2  ;;  %v5250_v6 = vpop.f32.mrf.mxu1 }
 0x2bb   : > { %v5161_v16 = vadd.f32 %v5145_v30, %v4946_v40  ;;  %v5347_v56 = vmul.f32 %v5250_v6, %v9434_v14  ;;  %v5209_v38 = vpop.f32.mrf.mxu0  ;;  %v7208_v40 = vld [vmem:[%s9869_s3 + $0x7] ss:$8 sm:$0xf] }
 0x2bc   : > { %v5361_v28 = vadd.f32 %v5345_v4, %v5146_v27  ;;  %v5346_v39 = vmul.f32 %v5209_v38, %v9438_v17  ;;  %v5252_v3 = vpop.f32.mrf.mxu1  ;;  %v7209_v27 = vld [vmem:[%s9869_s3 + $0x7] ss:$8 sm:$0xf0] }
 0x2bd   : > { %v5363_v26 = vadd.f32 %v5347_v56, %v5148_v10  ;;  %v5348_v52 = vmul.f32 %v5252_v3, %v9442_v55  ;;  %v5211_v61 = vpop.f32.mrf.mxu0  ;;  %v5424_v33 = vor.u32 %v7209_v27, %v7208_v40 }
 0x2be   : > { %v5362_v21 = vadd.f32 %v5346_v39, %v5147_v54  ;;  %v5353_v58 = vmul.f32 %v5211_v61, %v9430_v2  ;;  %v5254_v59 = vpop.f32.mrf.mxu1 }
 0x2bf   : > { %v5364_v23 = vadd.f32 %v5348_v52, %v5149_v49  ;;  %v5355_v60 = vmul.f32 %v5254_v59, %v9434_v14  ;;  %v5213_v1 = vpop.f32.mrf.mxu0  ;;  %v9508_v12 = vrot.slane %v5424_v33, %v7949_v25  ;;  %v9516_v56 = vrot.slane %v5424_v33, %v7961_v32 }
 0x2c0   : > { %v5369_v10 = vadd.f32 %v5353_v58, %v5154_v8  ;;  %v5354_v37 = vmul.f32 %v5213_v1, %v9438_v17  ;;  %v5256_v46 = vpop.f32.mrf.mxu1  ;;  %v9520_v39 = vrot.slane %v5424_v33, %v7967_v34 }
 0x2c1   : > { %v5371_v54 = vadd.f32 %v5355_v60, %v5156_v7  ;;  %v5356_v2 = vmul.f32 %v5256_v46, %v9442_v55  ;;  %v5293_v45 = vpop.f32.mrf.mxu0  ;;  %v9540_v46 = vrot.slane %v5424_v33, %v8011_v47 }
 0x2c2   : > { %v5370_v49 = vadd.f32 %v5354_v37, %v5155_v29  ;;  %v5349_v14 = vmul.f32 %v5293_v45, %v9450_v0  ;;  %v5336_v13 = vpop.f32.mrf.mxu1  ;;  %v9546_v45 = vrot.slane %v5424_v33, %v8017_v51 }
 0x2c3   : > { %v5372_v5 = vadd.f32 %v5356_v2, %v5157_v11  ;;  %v5351_v41 = vmul.f32 %v5336_v13, %v9454_v18  ;;  %v5295_v42 = vpop.f32.mrf.mxu0 }
 0x2c4   : > { %v5365_v48 = vadd.f32 %v5349_v14, %v5150_v44  ;;  %v5350_v15 = vmul.f32 %v5295_v42, %v9458_v50  ;;  %v5338_v8 = vpop.f32.mrf.mxu1  ;;  %v9512_v44 = vrot.slane %v5424_v33, %v7955_v19 }
 0x2c5   : > { %v5367_v31 = vadd.f32 %v5351_v41, %v5152_v36  ;;  %v5352_v17 = vmul.f32 %v5338_v8, %v9462_v24  ;;  %v5297_v7 = vpop.f32.mrf.mxu0  ;;  %v9552_v41 = vrot.slane %v5424_v33, %v8026_v57 }
 0x2c6   : > { %v5366_v63 = vadd.f32 %v5350_v15, %v5151_v20  ;;  %v5357_v55 = vmul.f32 %v5297_v7, %v9450_v0  ;;  %v5340_v29 = vpop.f32.mrf.mxu1 }
 0x2c7   : > { %v5368_v30 = vadd.f32 %v5352_v17, %v5153_v53  ;;  %v5359_v11 = vmul.f32 %v5340_v29, %v9454_v18  ;;  %v5299_v9 = vpop.f32.mrf.mxu0 }
 0x2c8   : > { %v5373_v4 = vadd.f32 %v5357_v55, %v5158_v35  ;;  %v5358_v36 = vmul.f32 %v5299_v9, %v9458_v50  ;;  %v5342_v6 = vpop.f32.mrf.mxu1 }
 0x2c9   : > { %v5375_v20 = vadd.f32 %v5359_v11, %v5160_v22  ;;  %v5360_v0 = vmul.f32 %v5342_v6, %v9462_v24  ;;  %v5470_v38 = vpop.f32.mrf.mxu0 }
 0x2ca   : > { %v5374_v53 = vadd.f32 %v5358_v36, %v5159_v62  ;;  %v5649_v18 = vmul.f32 %v9508_v12, %v5470_v38  ;;  %v5513_v3 = vpop.f32.mrf.mxu1 }
 0x2cb   : > { %v5376_v52 = vadd.f32 %v5360_v0, %v5161_v16  ;;  %v5651_v35 = vmul.f32 %v9512_v44, %v5513_v3  ;;  %v5472_v61 = vpop.f32.mrf.mxu0  ;;  %v9534_v16 = vrot.slane %v5424_v33, %v8004_v43 }
 0x2cc   : > { %v9524_v50 = vadd.f32 %v5649_v18, %v5361_v28  ;;  %v5650_v58 = vmul.f32 %v9516_v56, %v5472_v61  ;;  %v5515_v59 = vpop.f32.mrf.mxu1 }
 0x2cd   : > { %v9527_v22 = vadd.f32 %v5651_v35, %v5363_v26  ;;  %v5652_v24 = vmul.f32 %v9520_v39, %v5515_v59  ;;  %v5474_v60 = vpop.f32.mrf.mxu0 }
 0x2ce   : > { %v9530_v1 = vadd.f32 %v5650_v58, %v5362_v21  ;;  %v5657_v62 = vmul.f32 %v9508_v12, %v5474_v60  ;;  %v5517_v40 = vpop.f32.mrf.mxu1 }
 0x2cf   : > { %v9536_v27 = vadd.f32 %v5652_v24, %v5364_v23  ;;  %v5659_v28 = vmul.f32 %v9512_v44, %v5517_v40  ;;  %v5476_v37 = vpop.f32.mrf.mxu0 }
 0x2d0   : > { %v9542_v26 = vadd.f32 %v5657_v62, %v5369_v10  ;;  %v5658_v2 = vmul.f32 %v9516_v56, %v5476_v37  ;;  %v5519_v21 = vpop.f32.mrf.mxu1 }
 0x2d1   : > { %v9548_v14 = vadd.f32 %v5659_v28, %v5371_v54  ;;  %v5660_v13 = vmul.f32 %v9520_v39, %v5519_v21  ;;  %v5556_v23 = vpop.f32.mrf.mxu0 }
 0x2d2   : > { %v9554_v42 = vadd.f32 %v5658_v2, %v5370_v49  ;;  %v5653_v15 = vmul.f32 %v9534_v16, %v5556_v23  ;;  %v5599_v10 = vpop.f32.mrf.mxu1 }
 0x2d3   : > { %v9557_v8 = vadd.f32 %v5660_v13, %v5372_v5  ;;  %v5655_v17 = vmul.f32 %v9540_v46, %v5599_v10  ;;  %v5558_v7 = vpop.f32.mrf.mxu0 }
 0x2d4   : > { %v9560_v55 = vadd.f32 %v5653_v15, %v5365_v48  ;;  %v5654_v54 = vmul.f32 %v9546_v45, %v5558_v7  ;;  %v5601_v29 = vpop.f32.mrf.mxu1 }
 0x2d5   : > { %v9563_v11 = vadd.f32 %v5655_v17, %v5367_v31  ;;  %v5656_v33 = vmul.f32 %v9552_v41, %v5601_v29  ;;  %v5560_v9 = vpop.f32.mrf.mxu0 }
 0x2d6   : > { %v9566_v49 = vadd.f32 %v5654_v54, %v5366_v63  ;;  %v5661_v36 = vmul.f32 %v9534_v16, %v5560_v9  ;;  %v5603_v6 = vpop.f32.mrf.mxu1 }
 0x2d7   : > { %v9569_v5 = vadd.f32 %v5656_v33, %v5368_v30  ;;  %v5663_v0 = vmul.f32 %v9540_v46, %v5603_v6  ;;  %v5562_v38 = vpop.f32.mrf.mxu0 }
 0x2d8   : > { %v9572_v48 = vadd.f32 %v5661_v36, %v5373_v4  ;;  %v5662_v18 = vmul.f32 %v9546_v45, %v5562_v38  ;;  %v5605_v3 = vpop.f32.mrf.mxu1 }
 0x2d9   : > { %v9575_v31 = vadd.f32 %v5663_v0, %v5375_v20  ;;  %v5664_v35 = vmul.f32 %v9552_v41, %v5605_v3  ;;  %v5726_v61 = vpop.f32.mrf.mxu0  ;;  %v7232_v3 = vld [vmem:[%s9869_s3 + $0x40] ss:$8 sm:$0xf0] }
 0x2da   : > { %v9578_v63 = vadd.f32 %v5662_v18, %v5374_v53  ;;  %v5769_v58 = vpop.f32.mrf.mxu1  ;;  %v7231_v18 = vld [vmem:[%s9869_s3 + $0x40] ss:$8 sm:$0xf] }
 0x2db   : > { %v9580_v59 = vadd.f32 %v5664_v35, %v5376_v52  ;;  %v5728_v30 = vpop.f32.mrf.mxu0 }
 0x2dc   : > { %v5771_v24 = vpop.f32.mrf.mxu1 }
 0x2dd   : > { %9875 = vst [vmem:[#allocation10_spill] sm:$0xff] %v9580_v59  ;;  %v5730_v60 = vpop.f32.mrf.mxu0  ;;  %v5864_v59 = vmul.f32 %v5726_v61, %v9508_v12 }
 0x2de   : > { %v5773_v62 = vpop.f32.mrf.mxu1  ;;  %v5872_v61 = vmul.f32 %v5730_v60, %v9508_v12 }
 0x2df   : > { %v5732_v40 = vpop.f32.mrf.mxu0 }
 0x2e0   : > { %v5775_v4 = vpop.f32.mrf.mxu1 }
 0x2e1   : > { %v5812_v28 = vpop.f32.mrf.mxu0  ;;  %v5875_v60 = vmul.f32 %v5775_v4, %v9520_v39 }
 0x2e2   : > { %v5855_v37 = vpop.f32.mrf.mxu1 }
 0x2e3   : > { %v5814_v2 = vpop.f32.mrf.mxu0 }
 0x2e4   : > { %v5857_v21 = vpop.f32.mrf.mxu1 }
 0x2e5   : > { %v5816_v20 = vpop.f32.mrf.mxu0  ;;  %v5871_v4 = vmul.f32 %v5857_v21, %v9552_v41 }
 0x2e6   : > { %v5859_v13 = vpop.f32.mrf.mxu1 }
 0x2e7   : > { %v5818_v23 = vpop.f32.mrf.mxu0 }
 0x2e8   : > { %v9582_v15 = vpop.f32.mrf.mxu1 }
 0x2e9   : > { %v9584_v53 = vpop.f32.mrf.mxu0  ;;  %v5879_v21 = vmul.f32 %v9582_v15, %v9552_v41 }
 0x2ea   : > { %v9586_v10 = vpop.f32.mrf.mxu1 }
 0x2eb   : > { %v9588_v52 = vpop.f32.mrf.mxu0 }
 0x2ec   : > { %v9590_v17 = vpop.f32.mrf.mxu1 }
 0x2ed   : > { %v9592_v7 = vpop.f32.mrf.mxu0 }
 0x2ee   : > { %v9594_v54 = vpop.f32.mrf.mxu1 }
 0x2ef   : > { %9876 = vst [vmem:[#allocation11_spill] sm:$0xff] %v9594_v54  ;;  %v9596_v29 = vpop.f32.mrf.mxu0 }
 0x2f0   : > { %9877 = vst [vmem:[#allocation12_spill] sm:$0xff] %v9596_v29  ;;  %v9598_v33 = vpop.f32.mrf.mxu1 }
 0x2f1   : > { %9878 = vst [vmem:[#allocation13_spill] sm:$0xff] %v9598_v33  ;;  %v9600_v9 = vpop.f32.mrf.mxu0 }
 0x2f2   : > { %9879 = vst [vmem:[#allocation14_spill] sm:$0xff] %v9600_v9  ;;  %v9602_v36 = vpop.f32.mrf.mxu1 }
 0x2f3   : > { %9880 = vst [vmem:[#allocation15_spill] sm:$0xff] %v9602_v36  ;;  %v9604_v6 = vpop.f32.mrf.mxu0  ;;  %v6158_v36 = vor.u32 %v7232_v3, %v7231_v18 }
 0x2f4   : > { %9881 = vst [vmem:[#allocation16_spill] sm:$0xff] %v9604_v6  ;;  %v9606_v0 = vpop.f32.mrf.mxu1 }
 0x2f5   : > { %9882 = vst [vmem:[#allocation17_spill] sm:$0xff] %v9606_v0  ;;  %v9608_v38 = vpop.f32.mrf.mxu0  ;;  %v9630_v29 = vrot.slane %v6158_v36, %v7949_v25  ;;  %v9640_v18 = vrot.slane %v6158_v36, %v7961_v32  ;;  %v9647_v25 = vrot.slane %v6158_v36, %v7967_v34  ;;  %v5880_v34 = vadd.f32 %v5864_v59, %v9524_v50 }
 0x2f6   : > { %9883 = vst [vmem:[#allocation18_spill] sm:$0xff] %v9608_v38  ;;  %v9616_v35 = vpop.f32.mrf.mxu1  ;;  %v5888_v59 = vadd.f32 %v5872_v61, %v9542_v26 }
 0x2f7   : > { %9884 = vst [vmem:[#allocation19_spill] sm:$0xff] %v9616_v35  ;;  %v9618_v33 = vpop.f32.mrf.mxu0  ;;  %v5866_v35 = vmul.f32 %v5769_v58, %v9512_v44  ;;  %v9652_v58 = vrot.slane %v6158_v36, %v8004_v43 }
 0x2f8   : > { %9885 = vst [vmem:[#allocation20_spill] sm:$0xff] %v9618_v33  ;;  %v9620_v9 = vpop.f32.mrf.mxu1  ;;  %v5865_v33 = vmul.f32 %v5728_v30, %v9516_v56  ;;  %v5873_v30 = vmul.f32 %v5732_v40, %v9516_v56 }
 0x2f9   : > { %9886 = vst [vmem:[#allocation21_spill] sm:$0xff] %v9620_v9  ;;  %v9622_v6 = vpop.f32.mrf.mxu0  ;;  %v9637_v9 = vrot.slane %v6158_v36, %v7955_v19  ;;  %9891 = vst [vmem:[#allocation26_spill] sm:$0xff] %v9652_v58  ;;  %v5874_v19 = vmul.f32 %v5773_v62, %v9512_v44  ;;  %v9670_v62 = vrot.slane %v6158_v36, %v8026_v57 }
 0x2fa   : > { %v9624_v0 = vpop.f32.mrf.mxu1  ;;  %v5882_v40 = vadd.f32 %v5866_v35, %v9527_v22  ;;  %v5881_v58 = vadd.f32 %v5865_v33, %v9530_v1  ;;  %v5889_v1 = vadd.f32 %v5873_v30, %v9554_v42  ;;  %v9894_v35 = vld [vmem:[#allocation12_spill] sm:$0xff] }
 0x2fb   : > { %v9626_v38 = vpop.f32.mrf.mxu0  ;;  %v5890_v22 = vadd.f32 %v5874_v19, %v9548_v14 }
 0x2fc   : > { %9887 = vst [vmem:[#allocation22_spill] sm:$0xff] %v9626_v38  ;;  %v9632_v54 = vpop.f32.mrf.mxu1  ;;  %v5867_v38 = vmul.f32 %v5771_v24, %v9520_v39  ;;  %v9662_v24 = vrot.slane %v6158_v36, %v8017_v51  ;;  %v5869_v51 = vmul.f32 %v5814_v2, %v9546_v45  ;;  %v5877_v2 = vmul.f32 %v5818_v23, %v9546_v45 }
 0x2fd   : > { %9888 = vst [vmem:[#allocation23_spill] sm:$0xff] %v9632_v54  ;;  %v9642_v3 = vpop.f32.mrf.mxu0 }
 0x2fe   : > { %9889 = vst [vmem:[#allocation24_spill] sm:$0xff] %v9642_v3  ;;  %v9649_v54 = vpop.f32.mrf.mxu1  ;;  %v9659_v3 = vrot.slane %v6158_v36, %v8011_v47  ;;  %9892 = vst [vmem:[#allocation27_spill] sm:$0xff] %v9662_v24  ;;  %v5870_v47 = vmul.f32 %v5855_v37, %v9540_v46  ;;  %v5883_v50 = vadd.f32 %v5867_v38, %v9536_v27 }
 0x2ff   : > { %9890 = vst [vmem:[#allocation25_spill] sm:$0xff] %v9649_v54  ;;  %v9656_v32 = vpop.f32.mrf.mxu0  ;;  %v5868_v54 = vmul.f32 %v5812_v28, %v9534_v16  ;;  %v5876_v28 = vmul.f32 %v5816_v20, %v9534_v16  ;;  %v5878_v37 = vmul.f32 %v5859_v13, %v9540_v46  ;;  %v5891_v27 = vadd.f32 %v5875_v60, %v9557_v8 }
 0x300   : > { %v9667_v43 = vpop.f32.mrf.mxu1  ;;  %v6079_v20 = vmul.f32 %v9584_v53, %v9508_v12  ;;  %v5886_v14 = vadd.f32 %v5870_v47, %v9563_v11  ;;  %v5885_v42 = vadd.f32 %v5869_v51, %v9566_v49  ;;  %v6081_v13 = vmul.f32 %v9586_v10, %v9512_v44 }
 0x301   : > { %v9676_v24 = vpop.f32.mrf.mxu0  ;;  %v5884_v26 = vadd.f32 %v5868_v54, %v9560_v55  ;;  %v6080_v8 = vmul.f32 %v9588_v52, %v9516_v56  ;;  %v5887_v55 = vadd.f32 %v5871_v4, %v9569_v5  ;;  %v5892_v15 = vadd.f32 %v5876_v28, %v9572_v48  ;;  %v9893_v52 = vld [vmem:[#allocation11_spill] sm:$0xff]  ;;  %v9895_v48 = vld [vmem:[#allocation10_spill] sm:$0xff] }
 0x302   : > { %v9682_v57 = vpop.f32.mrf.mxu1  ;;  %v6082_v53 = vmul.f32 %v9590_v17, %v9520_v39  ;;  %v6087_v11 = vmul.f32 %v9592_v7, %v9508_v12  ;;  %v5894_v49 = vadd.f32 %v5878_v37, %v9575_v31  ;;  %v5893_v10 = vadd.f32 %v5877_v2, %v9578_v63  ;;  %v9896_v17 = vld [vmem:[#allocation13_spill] sm:$0xff]  ;;  %v9897_v12 = vld [vmem:[#allocation14_spill] sm:$0xff]  ;;  %v9898_v63 = vld [vmem:[#allocation15_spill] sm:$0xff] }
 0x303   : > { %v9688_v33 = vpop.f32.mrf.mxu0  ;;  %v6089_v38 = vmul.f32 %v9893_v52, %v9512_v44  ;;  %v6088_v5 = vmul.f32 %v9894_v35, %v9516_v56  ;;  %v5895_v19 = vadd.f32 %v5879_v21, %v9895_v48  ;;  %v6095_v30 = vadd.f32 %v6079_v20, %v5880_v34  ;;  %v9899_v44 = vld [vmem:[#allocation16_spill] sm:$0xff]  ;;  %v9900_v34 = vld [vmem:[#allocation17_spill] sm:$0xff] }
 0x304   : > { %v9696_v36 = vpop.f32.mrf.mxu1  ;;  %v6090_v60 = vmul.f32 %v9896_v17, %v9520_v39  ;;  %v6083_v7 = vmul.f32 %v9897_v12, %v9534_v16  ;;  %v6097_v31 = vadd.f32 %v6081_v13, %v5882_v40  ;;  %v6096_v51 = vadd.f32 %v6080_v8, %v5881_v58  ;;  %v9901_v39 = vld [vmem:[#allocation18_spill] sm:$0xff]  ;;  %v9902_v58 = vld [vmem:[#allocation19_spill] sm:$0xff]  ;;  %v9903_v13 = vld [vmem:[#allocation20_spill] sm:$0xff] }
 0x305   : > { %v9704_v23 = vpop.f32.mrf.mxu0  ;;  %v6085_v4 = vmul.f32 %v9898_v63, %v9540_v46  ;;  %v6084_v28 = vmul.f32 %v9899_v44, %v9546_v45  ;;  %v6098_v37 = vadd.f32 %v6082_v53, %v5883_v50  ;;  %v6103_v2 = vadd.f32 %v6087_v11, %v5888_v59  ;;  %v9904_v50 = vld [vmem:[#allocation21_spill] sm:$0xff] }
 0x306   : > { %v9712_v54 = vpop.f32.mrf.mxu1  ;;  %v6086_v21 = vmul.f32 %v9900_v34, %v9552_v41  ;;  %v6091_v20 = vmul.f32 %v9901_v39, %v9534_v16  ;;  %v6105_v35 = vadd.f32 %v6089_v38, %v5890_v22  ;;  %v6104_v48 = vadd.f32 %v6088_v5, %v5889_v1  ;;  %v9905_v1 = vld [vmem:[#allocation22_spill] sm:$0xff] }
 0x307   : > { %v6296_v61 = vpop.f32.mrf.mxu0  ;;  %v6093_v40 = vmul.f32 %v9902_v58, %v9540_v46  ;;  %v6092_v8 = vmul.f32 %v9903_v13, %v9546_v45  ;;  %v6106_v12 = vadd.f32 %v6090_v60, %v5891_v27  ;;  %v6099_v63 = vadd.f32 %v6083_v7, %v5884_v26  ;;  %v9906_v27 = vld [vmem:[#allocation23_spill] sm:$0xff]  ;;  %v9907_v60 = vld [vmem:[#allocation24_spill] sm:$0xff] }
 0x308   : > { %v6339_v47 = vpop.f32.mrf.mxu1  ;;  %v6094_v59 = vmul.f32 %v9904_v50, %v9552_v41  ;;  %v6383_v53 = vmul.f32 %v9630_v29, %v9622_v6  ;;  %v6101_v16 = vadd.f32 %v6085_v4, %v5886_v14  ;;  %v6100_v44 = vadd.f32 %v6084_v28, %v5885_v42  ;;  %v9908_v14 = vld [vmem:[#allocation25_spill] sm:$0xff] }
 0x309   : > { %v6460_v56 = vpop.f32.mrf.mxu0  ;;  %v6385_v22 = vmul.f32 %v9637_v9, %v9624_v0  ;;  %v6384_v46 = vmul.f32 %v9640_v18, %v9905_v1  ;;  %v6102_v45 = vadd.f32 %v6086_v21, %v5887_v55  ;;  %v6107_v5 = vadd.f32 %v6091_v20, %v5892_v15  ;;  %v9909_v15 = vld [vmem:[#allocation26_spill] sm:$0xff] }
 0x30a   : > { %v6503_v52 = vpop.f32.mrf.mxu1  ;;  %v6386_v26 = vmul.f32 %v9647_v25, %v9906_v27  ;;  %v6391_v41 = vmul.f32 %v9630_v29, %v9907_v60  ;;  %v6109_v6 = vadd.f32 %v6093_v40, %v5894_v49  ;;  %v6108_v34 = vadd.f32 %v6092_v8, %v5893_v10  ;;  %v9910_v10 = vld [vmem:[#allocation27_spill] sm:$0xff] }
 0x30b   : > { %v6462_v17 = vpop.f32.mrf.mxu0  ;;  %v6393_v42 = vmul.f32 %v9637_v9, %v9908_v14  ;;  %v6392_v0 = vmul.f32 %v9640_v18, %v9656_v32  ;;  %v6110_v28 = vadd.f32 %v6094_v59, %v5895_v19  ;;  %v6399_v39 = vadd.f32 %v6383_v53, %v6095_v30 }
 0x30c   : > { %v6505_v11 = vpop.f32.mrf.mxu1  ;;  %v6394_v55 = vmul.f32 %v9647_v25, %v9667_v43  ;;  %v6387_v21 = vmul.f32 %v9909_v15, %v9676_v24  ;;  %v6401_v58 = vadd.f32 %v6385_v22, %v6097_v31  ;;  %v6400_v13 = vadd.f32 %v6384_v46, %v6096_v51 }
 0x30d   : > { %v6464_v38 = vpop.f32.mrf.mxu0  ;;  %v6389_v49 = vmul.f32 %v9659_v3, %v9682_v57  ;;  %v6388_v40 = vmul.f32 %v9910_v10, %v9688_v33  ;;  %v6402_v32 = vadd.f32 %v6386_v26, %v6098_v37  ;;  %v6407_v50 = vadd.f32 %v6391_v41, %v6103_v2 }
 0x30e   : > { %v6507_v7 = vpop.f32.mrf.mxu1  ;;  %v6390_v19 = vmul.f32 %v9670_v62, %v9696_v36  ;;  %v6395_v43 = vmul.f32 %v9909_v15, %v9704_v23  ;;  %v6409_v24 = vadd.f32 %v6393_v42, %v6105_v35  ;;  %v6408_v59 = vadd.f32 %v6392_v0, %v6104_v48 }
 0x30f   : > { %v6466_v4 = vpop.f32.mrf.mxu0  ;;  %v6397_v31 = vmul.f32 %v9659_v3, %v9712_v54  ;;  %v6396_v57 = vmul.f32 %v9910_v10, %v6296_v61  ;;  %v6410_v53 = vadd.f32 %v6394_v55, %v6106_v12  ;;  %v6403_v33 = vadd.f32 %v6387_v21, %v6099_v63 }
 0x310   : > { %v6509_v20 = vpop.f32.mrf.mxu1  ;;  %v6398_v37 = vmul.f32 %v9670_v62, %v6339_v47  ;;  %v6598_v2 = vmul.f32 %v6460_v56, %v9630_v29  ;;  %v6405_v36 = vadd.f32 %v6389_v49, %v6101_v16  ;;  %v6404_v1 = vadd.f32 %v6388_v40, %v6100_v44 }
 0x311   : > { %v6546_v8 = vpop.f32.mrf.mxu0  ;;  %v6600_v23 = vmul.f32 %v6503_v52, %v9637_v9  ;;  %v6599_v35 = vmul.f32 %v6462_v17, %v9640_v18  ;;  %v6406_v46 = vadd.f32 %v6390_v19, %v6102_v45  ;;  %v6411_v27 = vadd.f32 %v6395_v43, %v6107_v5 }
 0x312   : > { %v6589_v30 = vpop.f32.mrf.mxu1  ;;  %v6601_v54 = vmul.f32 %v6505_v11, %v9647_v25  ;;  %v6606_v61 = vmul.f32 %v6464_v38, %v9630_v29  ;;  %v6413_v63 = vadd.f32 %v6397_v31, %v6109_v6  ;;  %v9774_v26 = vadd.f32 %v6396_v57, %v6108_v34 }
 0x313   : > { %v6548_v51 = vpop.f32.mrf.mxu0  ;;  %v6608_v47 = vmul.f32 %v6507_v7, %v9637_v9  ;;  %v6607_v56 = vmul.f32 %v6466_v4, %v9640_v18  ;;  %v9778_v44 = vadd.f32 %v6398_v37, %v6110_v28  ;;  %v6614_v52 = vadd.f32 %v6598_v2, %v6399_v39 }
 0x314   : > { %v6591_v22 = vpop.f32.mrf.mxu1  ;;  %v6609_v17 = vmul.f32 %v6509_v20, %v9647_v25  ;;  %v6602_v45 = vmul.f32 %v6546_v8, %v9909_v15  ;;  %v6616_v11 = vadd.f32 %v6600_v23, %v6401_v58  ;;  %v6615_v60 = vadd.f32 %v6599_v35, %v6400_v13 }
 0x315   : > { %v6550_v48 = vpop.f32.mrf.mxu0  ;;  %v6604_v38 = vmul.f32 %v6589_v30, %v9659_v3  ;;  %v6603_v41 = vmul.f32 %v6548_v51, %v9910_v10  ;;  %v6617_v34 = vadd.f32 %v6601_v54, %v6402_v32  ;;  %v6622_v7 = vadd.f32 %v6606_v61, %v6407_v50  ;;  %v6850_v30 = vpop.permute.xlu0 %6849 }
 0x316   : > { %v6593_v12 = vpop.f32.mrf.mxu1  ;;  %v6605_v14 = vmul.f32 %v6591_v22, %v9670_v62  ;;  %v6624_v4 = vadd.f32 %v6608_v47, %v6409_v24  ;;  %v6623_v28 = vadd.f32 %v6607_v56, %v6408_v59  ;;  %v6610_v39 = vmul.f32 %v6550_v48, %v9909_v15 }
 0x317   : > { %v6552_v16 = vpop.f32.mrf.mxu0  ;;  %v6625_v20 = vadd.f32 %v6609_v17, %v6410_v53  ;;  %v6618_v58 = vadd.f32 %v6602_v45, %v6403_v33  ;;  %v6620_v8 = vadd.f32 %v6604_v38, %v6405_v36  ;;  %v6619_v32 = vadd.f32 %v6603_v41, %v6404_v1 }
 0x318   : > { %v6595_v5 = vpop.f32.mrf.mxu1  ;;  %v6621_v24 = vadd.f32 %v6605_v14, %v6406_v46  ;;  %v6612_v59 = vmul.f32 %v6593_v12, %v9659_v3  ;;  %v6626_v53 = vadd.f32 %v6610_v39, %v6411_v27  ;;  %v6611_v33 = vmul.f32 %v6552_v16, %v9910_v10  ;;  %v6855_v12 = vpop.permute.xlu1 %6854 }
 0x319   : > { %v6675_v6 = vpop.f32.mrf.mxu0  ;;  %v6613_v17 = vmul.f32 %v6595_v5, %v9670_v62 }
 0x31a   : > { %v6813_v42 = vmul.f32 %v6675_v6, %v9630_v29  ;;  %v6718_v0 = vpop.f32.mrf.mxu1  ;;  %v6628_v47 = vadd.f32 %v6612_v59, %v6413_v63 }
 0x31b   : > { %v6815_v55 = vmul.f32 %v6718_v0, %v9637_v9  ;;  %v6677_v21 = vpop.f32.mrf.mxu0  ;;  %v6627_v0 = vadd.f32 %v6611_v33, %v9774_v26 }
 0x31c   : > { %v6829_v13 = vadd.f32 %v6813_v42, %v6614_v52  ;;  %v6814_v49 = vmul.f32 %v6677_v21, %v9640_v18  ;;  %v6720_v40 = vpop.f32.mrf.mxu1  ;;  %v6629_v21 = vadd.f32 %v6613_v17, %v9778_v44 }
 0x31d   : > { %v6831_v50 = vadd.f32 %v6815_v55, %v6616_v11  ;;  %v6816_v19 = vmul.f32 %v6720_v40, %v9647_v25  ;;  %v6679_v43 = vpop.f32.mrf.mxu0 }
 0x31e   : > { %v6830_v31 = vadd.f32 %v6814_v49, %v6615_v60  ;;  %v6821_v57 = vmul.f32 %v6679_v43, %v9630_v29  ;;  %v6722_v51 = vpop.f32.mrf.mxu1  ;;  %v6857_v1 = vadd.f32 %v6850_v30, %v6829_v13 }
 0x31f   : > { %v6832_v37 = vadd.f32 %v6816_v19, %v6617_v34  ;;  %v6823_v2 = vmul.f32 %v6722_v51, %v9637_v9  ;;  %v6681_v22 = vpop.f32.mrf.mxu0  ;;  %v6859_v46 = vadd.f32 %v6850_v30, %v6831_v50 }
 0x320   : > { %v6837_v36 = vadd.f32 %v6821_v57, %v6622_v7  ;;  %v6858_v23 = vadd.f32 %v6850_v30, %v6830_v31  ;;  %v6822_v35 = vmul.f32 %v6681_v22, %v9640_v18  ;;  %v6724_v48 = vpop.f32.mrf.mxu1 }
 0x321   : > { %v6860_v54 = vadd.f32 %v6850_v30, %v6832_v37  ;;  %v6839_v61 = vadd.f32 %v6823_v2, %v6624_v4  ;;  %v6824_v29 = vmul.f32 %v6724_v48, %v9647_v25  ;;  %v6761_v27 = vpop.f32.mrf.mxu0 }
 0x322   : > { %v7273_v56 = vpack.c.bf16 %v6858_v23, %v6857_v1  ;;  %v6838_v16 = vadd.f32 %v6822_v35, %v6623_v28  ;;  %v6817_v9 = vmul.f32 %v6761_v27, %v9909_v15  ;;  %v6804_v52 = vpop.f32.mrf.mxu1  ;;  %v6865_v38 = vadd.f32 %v6855_v12, %v6837_v36 }
 0x323   : > { %v7274_v45 = vpack.c.bf16 %v6860_v54, %v6859_v46  ;;  %v6840_v18 = vadd.f32 %v6824_v29, %v6625_v20  ;;  %v6819_v11 = vmul.f32 %v6804_v52, %v9659_v3  ;;  %v6763_v60 = vpop.f32.mrf.mxu0  ;;  %v6867_v34 = vadd.f32 %v6855_v12, %v6839_v61 }
 0x324   : > { %6921 = vst [vmem:[%s7542_s8] sm:$0xff] %v7273_v56  ;;  %v6866_v41 = vadd.f32 %v6855_v12, %v6838_v16  ;;  %v6833_v25 = vadd.f32 %v6817_v9, %v6618_v58  ;;  %v6818_v6 = vmul.f32 %v6763_v60, %v9910_v10  ;;  %v6806_v63 = vpop.f32.mrf.mxu1 }
 0x325   : > { %6922 = vst [vmem:[%s7542_s8 + $0x8] sm:$0xff] %v7274_v45  ;;  %v6868_v7 = vadd.f32 %v6855_v12, %v6840_v18  ;;  %v6835_v14 = vadd.f32 %v6819_v11, %v6620_v8  ;;  %v6820_v42 = vmul.f32 %v6806_v63, %v9670_v62  ;;  %v6765_v5 = vpop.f32.mrf.mxu0 }
 0x326   : > { %v7277_v4 = vpack.c.bf16 %v6866_v41, %v6865_v38  ;;  %v6834_v28 = vadd.f32 %v6818_v6, %v6619_v32  ;;  %v6825_v39 = vmul.f32 %v6765_v5, %v9909_v15  ;;  %v6808_v55 = vpop.f32.mrf.mxu1  ;;  %v6861_v40 = vadd.f32 %v6850_v30, %v6833_v25 }
 0x327   : > { %v7278_v20 = vpack.c.bf16 %v6868_v7, %v6867_v34  ;;  %v6836_v58 = vadd.f32 %v6820_v42, %v6621_v24  ;;  %v6827_v13 = vmul.f32 %v6808_v55, %v9659_v3  ;;  %v6767_v49 = vpop.f32.mrf.mxu0  ;;  %v6863_v15 = vadd.f32 %v6850_v30, %v6835_v14 }
 0x328   : > { %6925 = vst [vmem:[%s7542_s8 + $0x20] sm:$0xff] %v7277_v4  ;;  %v6862_v8 = vadd.f32 %v6850_v30, %v6834_v28  ;;  %v6841_v26 = vadd.f32 %v6825_v39, %v6626_v53  ;;  %v6826_v50 = vmul.f32 %v6767_v49, %v9910_v10  ;;  %v6810_v32 = vpop.f32.mrf.mxu1 }
 0x329   : > { %6926 = vst [vmem:[%s7542_s8 + $0x28] sm:$0xff] %v7278_v20  ;;  %v6864_v19 = vadd.f32 %v6850_v30, %v6836_v58  ;;  %v6843_v44 = vadd.f32 %v6827_v13, %v6628_v47  ;;  %v6828_v43 = vmul.f32 %v6810_v32, %v9670_v62 }
 0x32a   : > { %v7275_v24 = vpack.c.bf16 %v6862_v8, %v6861_v40  ;;  %v6842_v3 = vadd.f32 %v6826_v50, %v6627_v0  ;;  %v6869_v10 = vadd.f32 %v6855_v12, %v6841_v26 }
 0x32b   : > { %v7276_v59 = vpack.c.bf16 %v6864_v19, %v6863_v15  ;;  %v6844_v31 = vadd.f32 %v6828_v43, %v6629_v21  ;;  %v6871_v51 = vadd.f32 %v6855_v12, %v6843_v44 }
 0x32c   : > { %6923 = vst [vmem:[%s7542_s8 + $0x10] sm:$0xff] %v7275_v24  ;;  %v6870_v57 = vadd.f32 %v6855_v12, %v6842_v3 }
 0x32d   : > { %6924 = vst [vmem:[%s7542_s8 + $0x18] sm:$0xff] %v7276_v59  ;;  %v6872_v53 = vadd.f32 %v6855_v12, %v6844_v31 }
 0x32e   : > { %v7279_v62 = vpack.c.bf16 %v6870_v57, %v6869_v10 }
 0x32f   : > { %v7280_v30 = vpack.c.bf16 %v6872_v53, %v6871_v51 }
 0x330   : > { %6927 = vst [vmem:[%s7542_s8 + $0x30] sm:$0xff] %v7279_v62 }
 0x331   : > { %6928 = vst [vmem:[%s7542_s8 + $0x38] sm:$0xff] %v7280_v30 }
 0x332   : > { %7397 = shalt.err (!%p7394_p8)
}
 0x333   : > { %s7398_s27 = scalar_lea.hbm %s9818_s14, 1024  ;;  %s7402_s30 = scalar_lea.hbm %s9870_s4, 2048 }
 0x334   : > { %p7399_p9 = scmp.ne.s32.totalorder %s9818_s14, %s7398_s27  ;;  %p7403_p12 = scmp.lt.s32.totalorder %s9818_s14, %s9870_s4 }
 0x335   : > { %p7404_p13 = scmp.lt.s32.totalorder %s7402_s30, %s7398_s27 }
 0x336   : > { %p7400_p10 = pnand %p7399_p9, %p7524_p5 }
 0x337   : > { %p7405_p0 = por %p7404_p13, %p7403_p12 }
 0x338   : > { %p7401_p11 = pneg %p7400_p10 }
 0x33a   : > { %p7406_p1 = pnand %p7405_p0, %p7401_p11 }
 0x33c   : > { %7409 = shalt.err (!%p7406_p1)
}
 0x33d   : > { %s7458_s9 = smov 512   ;;  %s7459_s10 = smov 1024  }
 0x33e   : > { %s7460_s11 = smov 32  }
 0x33f   : > { %7282 = dma.vmem_to_hbm [thread:$0]  (%p7524_p5), %s9820_s12, 1024, %s9818_s14, %s9826_s19, %s7458_s9, %s7459_s10, %s7460_s11  }
 0x340 PF: > { %p7288_p2 = scmp.ge.s32.totalorder %s7446_s18, 2  ;;  %s6958_s13 = sand.u32 1, %s7434_s15  }
 0x341   : > { %s6959_s20 = scalar_lea.sflag [#allocation5], %s6958_s13 }
 0x342   : > { %p7285_p3 = pnand %p7288_p2, %p7528_p6 }
 0x344   : > { %p7286_p4 = pneg %p7285_p3 }
 0x346   : > { %7429 = dma.done.wait (%p7286_p4), %s6959_s20, 1024  }
 0x347   : > { %7431 = vsyncadd (%p7286_p4), %s6959_s20, 4294966272  ;;  %p14_p7 = scmp.ge.s32.totalorder %s7511_s21, 4   ;;  %s9911_s15 = smov %s7438_s16 }
 0x348   : > { %s9912_s16 = smov %s7442_s17  ;;  %s9913_s17 = smov %s7522_s24 }
 0x349   : > { %s9914_s18 = smov %s7511_s21  ;;  %16 = sbr.rel (!%p14_p7) target bundleno = 3 (0x3), region = 195 }
 0x34e   :  { %6964 = vsyncpa [#allocation5], 1 }
 0x34f   :  { %6966 = vsyncpa [#allocation5 + $0x1], 1 }
 0x350   :  { %6967 = vsyncmov [#allocation3] }
 0x353   :  { %s6968_s18 = vpop.sfrf %6967 }
 0x354   :  { %p7267_p5 = scmp.ne.s32.totalorder %s6968_s18, 0 }
 0x356   :  { %6972 = shalt.err (%p7267_p5)  }
 0x357   :  { %6974 = vsyncmov [#allocation3 + $0x1] }
 0x35a   :  { %s6975_s25 = vpop.sfrf %6974 }
 0x35b   :  { %p7268_p6 = scmp.ne.s32.totalorder %s6975_s25, 0 }
 0x35d   :  { %6979 = shalt.err (%p7268_p6)  }

</bundles_post_ra>
